<compile_context>
chip_gen: v7x
topology: tpu7x:2x2x1
jax: 0.10.0
libtpu: 0.0.40
codegen_flags: <defaults>
</compile_context>

<pallas_src>
import functools

import jax
import jax.numpy as jnp
from jax.experimental import pallas as pl
from jax.experimental.pallas import tpu as pltpu


# ----------------------------- Pallas kernel --------------------------------

def _dfa_embed_kernel(feat_ref, w_in_ref, b_in_ref, w_lr_ref, b_lr_ref,
                      att_flat_ref, bias_sum_ref, adj_ref, nmask_ref,
                      sel_ref, w_g_ref, b_g_ref, o_ref,
                      *, n_layers, n_heads, hidden_dim):
    """Whole Model.forward in one VMEM-resident kernel.

    feat_ref     : [N, input_dim]
    w_in_ref     : [input_dim, hidden]      b_in_ref : [1, hidden]
    w_lr_ref     : [2*hidden, 2*H*C]        b_lr_ref : [1, 2*H*C]   (lin_l | lin_r fused)
    att_flat_ref : [1, H*C]                 bias_sum_ref : [1, C]   (conv biases summed over heads)
    adj_ref      : [L, N, N]  bf16 {0,1};   adj[l, i, j] = 1 iff edge j -> i active in layer l
    nmask_ref    : [L, N, 1]  float {0,1}   active-node mask per layer
    sel_ref      : [G, N]     one-hot rows selecting current_state nodes
    w_g_ref      : [hidden, out]            b_g_ref : [1, out]
    o_ref        : [G, out]
    """
    H, C = n_heads, hidden_dim
    HC = H * C
    NEG = jnp.float32(-1e30)

    # ---- linear_in: h0 = feat @ W_in^T + b_in ----
    h0 = (jnp.dot(feat_ref[...], w_in_ref[...], preferred_element_type=jnp.float32)
          + b_in_ref[...])
    h = h0

    bias_sum = bias_sum_ref[...]                 # [1, C]
    att_b3 = att_flat_ref[...][None, :, :]       # [1, 1, H*C]  (broadcast hoisted out of loops)
    w_lr = w_lr_ref[...]                         # [2*hidden, 2*H*C]
    b_lr = b_lr_ref[...]                         # [1, 2*H*C]
    w_h, w_h0 = w_lr[:hidden_dim, :], w_lr[hidden_dim:, :]

    # h0 branch of the fused lin_l/lin_r projection is loop-invariant -> hoist.
    xlr0 = jnp.dot(h0, w_h0, preferred_element_type=jnp.float32) + b_lr   # [N, 2*H*C]

    for l in range(n_layers):                    # static unroll, L small
        # TODO(synk): for large num_layers switch to lax.fori_loop indexing adj_ref[l].
        adj = adj_ref[l].astype(jnp.float32)     # [N, N], stored bf16 {0,1}
        nm = nmask_ref[l]                        # [N, 1]

        # Fused lin_l/lin_r projection of concat([h, h0], 1), kept lane-dense as
        # [N, 2*H*C]; the feature concat is folded into the two partial matmuls
        # (h0 part precomputed above).
        xlr = jnp.dot(h, w_h, preferred_element_type=jnp.float32) + xlr0
        xl = xlr[:, :HC]                         # [N, H*C] source-side (lin_l)
        xr = xlr[:, HC:]                         # [N, H*C] target-side (lin_r)

        # Merged per-head elementwise work: ONE full-lane [N, N, H*C] block.
        # TODO(synk): if N scales up, tile this [N_dst, N_src, H*C] intermediate over
        # dst rows with a "parallel" grid axis sized for v7x's 64 MiB VMEM, and build
        # adj tiles in-kernel from scalar-prefetched edge lists instead of [L,N,N].
        s_all = xr[:, None, :] + xl[None, :, :]            # [N_dst, N_src, H*C]
        s_all = jnp.maximum(s_all, 0.2 * s_all)            # LeakyReLU(0.2), one op
        w_all = s_all * att_b3                              # one full-lane multiply

        acc = jnp.zeros_like(h0)                            # [N, C]
        for hd in range(H):                                  # static unroll over heads
            lo = hd * C
            # TODO(synk): fold these H lane-reduces into one [N*N,H*C]@[H*C,H]
            # block-diag-att MXU matmul once the (dst,src)-pair reshape is validated.
            e = jnp.sum(w_all[:, :, lo:lo + C], axis=-1)     # [N_dst, N_src] logits
            m = jnp.max(jnp.where(adj > 0, e, NEG), axis=1, keepdims=True)  # masked max
            p = jnp.exp(e - m) * adj                         # mask via * adj
            denom = jnp.sum(p, axis=1, keepdims=True)        # >= 1 (self loop at max)
            alpha = p * pl.reciprocal(denom, approx=True)    # EUP reciprocal
            acc = acc + jnp.dot(alpha, xl[:, lo:lo + C],
                                preferred_element_type=jnp.float32)
        conv = jnp.tanh(acc + bias_sum)          # heads summed -> biases summed
        h = jnp.where(nm > 0, conv, h)           # only active nodes updated

    # hg = h[current_state.bool()] via static-size selection matmul, then g_embed.
    hg = jnp.dot(sel_ref[...], h, preferred_element_type=jnp.float32)
    o_ref[...] = (jnp.dot(hg, w_g_ref[...], preferred_element_type=jnp.float32)
                  + b_g_ref[...])


# ----------------------------- parameters -----------------------------------

def init_params(key, input_dim, output_dim, hidden_dim, n_heads):
    ks = jax.random.split(key, 10)

    def lin(kw, kb, fan_in, fan_out):
        w = jax.random.normal(kw, (fan_out, fan_in), jnp.float32) / jnp.sqrt(fan_in)
        b = jax.random.normal(kb, (fan_out,), jnp.float32) * 0.01
        return w, b

    W_in, b_in = lin(ks[0], ks[1], input_dim, hidden_dim)                       # linear_in
    W_l, b_l = lin(ks[2], ks[3], 2 * hidden_dim, n_heads * hidden_dim)          # conv.lin_l
    W_r, b_r = lin(ks[4], ks[5], 2 * hidden_dim, n_heads * hidden_dim)          # conv.lin_r
    att = jax.random.normal(ks[6], (n_heads, hidden_dim), jnp.float32) * 0.1    # conv.att
    conv_bias = jax.random.normal(ks[7], (n_heads, hidden_dim), jnp.float32) * 0.01
    W_g, b_g = lin(ks[8], ks[9], hidden_dim, output_dim)                        # g_embed

    # Kernel-ready parameters: transposes / lin_l|lin_r fusion / head-bias sum / att
    # flattening are done ONCE here, not per forward call.
    # TODO(synk): for v6e/v7x at scale, store these weights in bf16 (keep f32 accumulate).
    return {
        "w_in_t": W_in.T,                                       # [in, hidden]
        "b_in": b_in[None, :],                                  # [1, hidden]
        "w_lr_t": jnp.concatenate([W_l.T, W_r.T], axis=1),      # [2*hidden, 2*H*C]
        "b_lr": jnp.concatenate([b_l, b_r])[None, :],           # [1, 2*H*C]
        "att_flat": att.reshape(1, n_heads * hidden_dim),       # [1, H*C] (head-major)
        "bias_sum": jnp.sum(conv_bias, axis=0, keepdims=True),  # [1, C]
        "w_g_t": W_g.T,                                         # [hidden, out]
        "b_g": b_g[None, :],                                    # [1, out]
    }


# ----------------------------- forward ---------------------------------------

@functools.partial(jax.jit, static_argnames=("hidden_dim", "n_heads", "n_out_rows"))
def forward(params, feat, edge_index, current_state, node_masks, edge_masks,
            *, hidden_dim, n_heads, n_out_rows):
    N = feat.shape[0]
    L = node_masks.shape[0]
    src, dst = edge_index[0], edge_index[1]
    eye = jnp.eye(N, dtype=jnp.float32)

    # Dense adjacency per layer: active edges between active nodes; existing self
    # loops removed, self loops re-added (GATv2Conv(add_self_loops=True)).
    # Inactive-row self loops only avoid 0/0; those rows are discarded in-kernel.
    # Stored as bf16 ({0,1} exact) to halve DMA / VMEM footprint.
    def one_adj(nm, em):
        valid = em & (src != dst) & nm[src] & nm[dst]
        adj = jnp.zeros((N, N), jnp.float32).at[dst, src].max(valid.astype(jnp.float32))
        return jnp.maximum(adj, eye)

    adjs = jnp.stack([one_adj(node_masks[l], edge_masks[l])
                      for l in range(L)]).astype(jnp.bfloat16)                   # [L,N,N]
    nmask = node_masks.astype(jnp.float32)[:, :, None]                           # [L,N,1]

    # hg = h[current_state.bool()] via a static-size selection matrix.
    cs = current_state.astype(bool)
    rank = jnp.cumsum(cs.astype(jnp.int32)) - 1
    sel = ((rank[None, :] == jnp.arange(n_out_rows)[:, None]) & cs[None, :]
           ).astype(jnp.float32)                                                 # [G,N]

    out_dim = params["w_g_t"].shape[1]
    kernel = functools.partial(_dfa_embed_kernel, n_layers=L,
                               n_heads=n_heads, hidden_dim=hidden_dim)
    vmem = pl.BlockSpec(memory_space=pltpu.MemorySpace.VMEM)
    return pl.pallas_call(
        kernel,
        out_shape=jax.ShapeDtypeStruct((n_out_rows, out_dim), jnp.float32),
        in_specs=[vmem] * 12,
        out_specs=vmem,
    )(feat.astype(jnp.float32), params["w_in_t"], params["b_in"],
      params["w_lr_t"], params["b_lr"], params["att_flat"], params["bias_sum"],
      adjs, nmask, sel, params["w_g_t"], params["b_g"])


# ----------------------------- example run -----------------------------------

if __name__ == "__main__":
    input_dim, output_dim = 10, 8
    hidden_dim, n_heads, num_layers = 32, 4, 3
    N = 8

    key = jax.random.PRNGKey(0)
    kp, kf = jax.random.split(key)
    params = init_params(kp, input_dim, output_dim, hidden_dim, n_heads)

    feat = jax.random.normal(kf, (N, input_dim), jnp.float32)
    src = jnp.array([0, 1, 2, 3, 4, 5, 6, 7, 0, 2, 4, 6, 1, 3], jnp.int32)
    dst = jnp.array([1, 2, 3, 4, 5, 6, 7, 0, 3, 5, 7, 1, 1, 6], jnp.int32)  # (1,1) self loop included
    edge_index = jnp.stack([src, dst])

    current_state = jnp.zeros((N,), jnp.int32).at[2].set(1)   # one current DFA state

    node_masks = []
    edge_masks = []
    for t in range(num_layers):
        if t % 2 == 1:
            nm = jnp.array([True] * 6 + [False] * 2)
        else:
            nm = jnp.ones((N,), bool)
        node_masks.append(nm)
        edge_masks.append(nm[src] & nm[dst])
    node_masks = jnp.stack(node_masks)   # [L, N]
    edge_masks = jnp.stack(edge_masks)   # [L, E]

    out = forward(params, feat, edge_index, current_state, node_masks, edge_masks,
                  hidden_dim=hidden_dim, n_heads=n_heads, n_out_rows=1)
    out = jax.block_until_ready(out)
    assert out.shape == (1, output_dim)
    assert bool(jnp.all(jnp.isfinite(out)))
    print("KERNEL_OK")
</pallas_src>

<mosaic_0001>
module attributes {stable_mosaic.version = 11 : i64} {
  func.func @_dfa_embed_kernel(%arg0: memref<8x10xf32, #tpu.memory_space<vmem>>, %arg1: memref<10x32xf32, #tpu.memory_space<vmem>>, %arg2: memref<1x32xf32, #tpu.memory_space<vmem>>, %arg3: memref<64x256xf32, #tpu.memory_space<vmem>>, %arg4: memref<1x256xf32, #tpu.memory_space<vmem>>, %arg5: memref<1x128xf32, #tpu.memory_space<vmem>>, %arg6: memref<1x32xf32, #tpu.memory_space<vmem>>, %arg7: memref<3x8x8xbf16, #tpu.memory_space<vmem>>, %arg8: memref<3x8x1xf32, #tpu.memory_space<vmem>>, %arg9: memref<1x8xf32, #tpu.memory_space<vmem>>, %arg10: memref<32x8xf32, #tpu.memory_space<vmem>>, %arg11: memref<1x8xf32, #tpu.memory_space<vmem>>, %arg12: memref<1x8xf32, #tpu.memory_space<vmem>>) attributes {dimension_semantics = [], scalar_prefetch = 0 : i64, scratch_operands = 0 : i64, tpu.core_type = #tpu.core_type<tc>} {
    %c0 = arith.constant 0 : index
    %c0_0 = arith.constant 0 : index
    %0 = vector.load %arg0[%c0, %c0_0] : memref<8x10xf32, #tpu.memory_space<vmem>>, vector<8x10xf32>
    %c0_1 = arith.constant 0 : index
    %c0_2 = arith.constant 0 : index
    %1 = vector.load %arg1[%c0_1, %c0_2] : memref<10x32xf32, #tpu.memory_space<vmem>>, vector<10x32xf32>
    %cst = arith.constant dense<0.000000e+00> : vector<8x32xf32>
    %2 = tpu.matmul %0, %1, %cst {dimension_numbers = #tpu.dot_dimension_numbers<[1], [0], [0], [1], [0, 0, 1, 1], [], []>} : vector<8x10xf32>, vector<10x32xf32>, vector<8x32xf32> -> vector<8x32xf32>
    %c0_3 = arith.constant 0 : index
    %c0_4 = arith.constant 0 : index
    %3 = vector.load %arg2[%c0_3, %c0_4] : memref<1x32xf32, #tpu.memory_space<vmem>>, vector<1x32xf32>
    %4 = vector.broadcast %3 : vector<1x32xf32> to vector<8x32xf32>
    %5 = arith.addf %2, %4 : vector<8x32xf32>
    %c0_5 = arith.constant 0 : index
    %c0_6 = arith.constant 0 : index
    %6 = vector.load %arg6[%c0_5, %c0_6] : memref<1x32xf32, #tpu.memory_space<vmem>>, vector<1x32xf32>
    %c0_7 = arith.constant 0 : index
    %c0_8 = arith.constant 0 : index
    %7 = vector.load %arg5[%c0_7, %c0_8] : memref<1x128xf32, #tpu.memory_space<vmem>>, vector<1x128xf32>
    %8 = vector.shape_cast %7 : vector<1x128xf32> to vector<1x1x128xf32>
    %c0_9 = arith.constant 0 : index
    %c0_10 = arith.constant 0 : index
    %9 = vector.load %arg3[%c0_9, %c0_10] : memref<64x256xf32, #tpu.memory_space<vmem>>, vector<64x256xf32>
    %c0_11 = arith.constant 0 : index
    %c0_12 = arith.constant 0 : index
    %10 = vector.load %arg4[%c0_11, %c0_12] : memref<1x256xf32, #tpu.memory_space<vmem>>, vector<1x256xf32>
    %11 = vector.extract_strided_slice %9 {offsets = [0, 0], sizes = [32, 256], strides = [1, 1]} : vector<64x256xf32> to vector<32x256xf32>
    %12 = vector.extract_strided_slice %9 {offsets = [32, 0], sizes = [32, 256], strides = [1, 1]} : vector<64x256xf32> to vector<32x256xf32>
    %cst_13 = arith.constant dense<0.000000e+00> : vector<8x256xf32>
    %13 = tpu.matmul %5, %12, %cst_13 {dimension_numbers = #tpu.dot_dimension_numbers<[1], [0], [0], [1], [0, 0, 1, 1], [], []>} : vector<8x32xf32>, vector<32x256xf32>, vector<8x256xf32> -> vector<8x256xf32>
    %14 = vector.broadcast %10 : vector<1x256xf32> to vector<8x256xf32>
    %15 = arith.addf %13, %14 : vector<8x256xf32>
    %c0_14 = arith.constant 0 : index
    %c0_15 = arith.constant 0 : index
    %c0_16 = arith.constant 0 : index
    %16 = vector.load %arg7[%c0_14, %c0_15, %c0_16] : memref<3x8x8xbf16, #tpu.memory_space<vmem>>, vector<1x8x8xbf16>
    %17 = vector.shape_cast %16 : vector<1x8x8xbf16> to vector<8x8xbf16>
    %18 = arith.extf %17 : vector<8x8xbf16> to vector<8x8xf32>
    %c0_17 = arith.constant 0 : index
    %c0_18 = arith.constant 0 : index
    %c0_19 = arith.constant 0 : index
    %19 = vector.load %arg8[%c0_17, %c0_18, %c0_19] : memref<3x8x1xf32, #tpu.memory_space<vmem>>, vector<1x8x1xf32>
    %20 = vector.shape_cast %19 : vector<1x8x1xf32> to vector<8x1xf32>
    %cst_20 = arith.constant dense<0.000000e+00> : vector<8x256xf32>
    %21 = tpu.matmul %5, %11, %cst_20 {dimension_numbers = #tpu.dot_dimension_numbers<[1], [0], [0], [1], [0, 0, 1, 1], [], []>} : vector<8x32xf32>, vector<32x256xf32>, vector<8x256xf32> -> vector<8x256xf32>
    %22 = arith.addf %21, %15 : vector<8x256xf32>
    %23 = vector.extract_strided_slice %22 {offsets = [0, 0], sizes = [8, 128], strides = [1, 1]} : vector<8x256xf32> to vector<8x128xf32>
    %24 = vector.extract_strided_slice %22 {offsets = [0, 128], sizes = [8, 128], strides = [1, 1]} : vector<8x256xf32> to vector<8x128xf32>
    %25 = vector.shape_cast %24 : vector<8x128xf32> to vector<8x1x128xf32>
    %26 = vector.shape_cast %23 : vector<8x128xf32> to vector<1x8x128xf32>
    %27 = vector.broadcast %25 : vector<8x1x128xf32> to vector<8x8x128xf32>
    %28 = vector.broadcast %26 : vector<1x8x128xf32> to vector<8x8x128xf32>
    %29 = arith.addf %27, %28 : vector<8x8x128xf32>
    %cst_21 = arith.constant 2.000000e-01 : f32
    %30 = vector.broadcast %cst_21 : f32 to vector<8x8x128xf32>
    %31 = arith.mulf %30, %29 : vector<8x8x128xf32>
    %32 = arith.maximumf %29, %31 : vector<8x8x128xf32>
    %33 = vector.broadcast %8 : vector<1x1x128xf32> to vector<8x8x128xf32>
    %34 = arith.mulf %32, %33 : vector<8x8x128xf32>
    %cst_22 = arith.constant 0.000000e+00 : f32
    %35 = vector.broadcast %cst_22 : f32 to vector<8x32xf32>
    %36 = vector.extract_strided_slice %34 {offsets = [0, 0, 0], sizes = [8, 8, 32], strides = [1, 1, 1]} : vector<8x8x128xf32> to vector<8x8x32xf32>
    %cst_23 = arith.constant dense<0.000000e+00> : vector<8x8xf32>
    %37 = vector.multi_reduction <add>, %36, %cst_23 [2] : vector<8x8x32xf32> to vector<8x8xf32>
    %cst_24 = arith.constant 0.000000e+00 : f32
    %38 = vector.broadcast %cst_24 : f32 to vector<8x8xf32>
    %39 = arith.cmpf ogt, %18, %38 : vector<8x8xf32>
    %cst_25 = arith.constant -1.000000e+30 : f32
    %40 = vector.broadcast %cst_25 : f32 to vector<8x8xf32>
    %41 = arith.select %39, %37, %40 : vector<8x8xi1>, vector<8x8xf32>
    %cst_26 = arith.constant dense<0xFF800000> : vector<8xf32>
    %42 = vector.multi_reduction <maximumf>, %41, %cst_26 [1] : vector<8x8xf32> to vector<8xf32>
    %43 = vector.shape_cast %42 : vector<8xf32> to vector<8x1xf32>
    %44 = vector.broadcast %43 : vector<8x1xf32> to vector<8x8xf32>
    %45 = arith.subf %37, %44 : vector<8x8xf32>
    %46 = math.exp %45 : vector<8x8xf32>
    %47 = arith.mulf %46, %18 : vector<8x8xf32>
    %cst_27 = arith.constant dense<0.000000e+00> : vector<8xf32>
    %48 = vector.multi_reduction <add>, %47, %cst_27 [1] : vector<8x8xf32> to vector<8xf32>
    %49 = vector.shape_cast %48 : vector<8xf32> to vector<8x1xf32>
    %50 = tpu.reciprocal %49 {approx = true} : vector<8x1xf32> -> vector<8x1xf32>
    %51 = vector.broadcast %50 : vector<8x1xf32> to vector<8x8xf32>
    %52 = arith.mulf %47, %51 : vector<8x8xf32>
    %53 = vector.extract_strided_slice %23 {offsets = [0, 0], sizes = [8, 32], strides = [1, 1]} : vector<8x128xf32> to vector<8x32xf32>
    %cst_28 = arith.constant dense<0.000000e+00> : vector<8x32xf32>
    %54 = tpu.matmul %52, %53, %cst_28 {dimension_numbers = #tpu.dot_dimension_numbers<[1], [0], [0], [1], [0, 0, 1, 1], [], []>} : vector<8x8xf32>, vector<8x32xf32>, vector<8x32xf32> -> vector<8x32xf32>
    %55 = arith.addf %35, %54 : vector<8x32xf32>
    %56 = vector.extract_strided_slice %34 {offsets = [0, 0, 32], sizes = [8, 8, 32], strides = [1, 1, 1]} : vector<8x8x128xf32> to vector<8x8x32xf32>
    %cst_29 = arith.constant dense<0.000000e+00> : vector<8x8xf32>
    %57 = vector.multi_reduction <add>, %56, %cst_29 [2] : vector<8x8x32xf32> to vector<8x8xf32>
    %cst_30 = arith.constant 0.000000e+00 : f32
    %58 = vector.broadcast %cst_30 : f32 to vector<8x8xf32>
    %59 = arith.cmpf ogt, %18, %58 : vector<8x8xf32>
    %cst_31 = arith.constant -1.000000e+30 : f32
    %60 = vector.broadcast %cst_31 : f32 to vector<8x8xf32>
    %61 = arith.select %59, %57, %60 : vector<8x8xi1>, vector<8x8xf32>
    %cst_32 = arith.constant dense<0xFF800000> : vector<8xf32>
    %62 = vector.multi_reduction <maximumf>, %61, %cst_32 [1] : vector<8x8xf32> to vector<8xf32>
    %63 = vector.shape_cast %62 : vector<8xf32> to vector<8x1xf32>
    %64 = vector.broadcast %63 : vector<8x1xf32> to vector<8x8xf32>
    %65 = arith.subf %57, %64 : vector<8x8xf32>
    %66 = math.exp %65 : vector<8x8xf32>
    %67 = arith.mulf %66, %18 : vector<8x8xf32>
    %cst_33 = arith.constant dense<0.000000e+00> : vector<8xf32>
    %68 = vector.multi_reduction <add>, %67, %cst_33 [1] : vector<8x8xf32> to vector<8xf32>
    %69 = vector.shape_cast %68 : vector<8xf32> to vector<8x1xf32>
    %70 = tpu.reciprocal %69 {approx = true} : vector<8x1xf32> -> vector<8x1xf32>
    %71 = vector.broadcast %70 : vector<8x1xf32> to vector<8x8xf32>
    %72 = arith.mulf %67, %71 : vector<8x8xf32>
    %73 = vector.extract_strided_slice %23 {offsets = [0, 32], sizes = [8, 32], strides = [1, 1]} : vector<8x128xf32> to vector<8x32xf32>
    %cst_34 = arith.constant dense<0.000000e+00> : vector<8x32xf32>
    %74 = tpu.matmul %72, %73, %cst_34 {dimension_numbers = #tpu.dot_dimension_numbers<[1], [0], [0], [1], [0, 0, 1, 1], [], []>} : vector<8x8xf32>, vector<8x32xf32>, vector<8x32xf32> -> vector<8x32xf32>
    %75 = arith.addf %55, %74 : vector<8x32xf32>
    %76 = vector.extract_strided_slice %34 {offsets = [0, 0, 64], sizes = [8, 8, 32], strides = [1, 1, 1]} : vector<8x8x128xf32> to vector<8x8x32xf32>
    %cst_35 = arith.constant dense<0.000000e+00> : vector<8x8xf32>
    %77 = vector.multi_reduction <add>, %76, %cst_35 [2] : vector<8x8x32xf32> to vector<8x8xf32>
    %cst_36 = arith.constant 0.000000e+00 : f32
    %78 = vector.broadcast %cst_36 : f32 to vector<8x8xf32>
    %79 = arith.cmpf ogt, %18, %78 : vector<8x8xf32>
    %cst_37 = arith.constant -1.000000e+30 : f32
    %80 = vector.broadcast %cst_37 : f32 to vector<8x8xf32>
    %81 = arith.select %79, %77, %80 : vector<8x8xi1>, vector<8x8xf32>
    %cst_38 = arith.constant dense<0xFF800000> : vector<8xf32>
    %82 = vector.multi_reduction <maximumf>, %81, %cst_38 [1] : vector<8x8xf32> to vector<8xf32>
    %83 = vector.shape_cast %82 : vector<8xf32> to vector<8x1xf32>
    %84 = vector.broadcast %83 : vector<8x1xf32> to vector<8x8xf32>
    %85 = arith.subf %77, %84 : vector<8x8xf32>
    %86 = math.exp %85 : vector<8x8xf32>
    %87 = arith.mulf %86, %18 : vector<8x8xf32>
    %cst_39 = arith.constant dense<0.000000e+00> : vector<8xf32>
    %88 = vector.multi_reduction <add>, %87, %cst_39 [1] : vector<8x8xf32> to vector<8xf32>
    %89 = vector.shape_cast %88 : vector<8xf32> to vector<8x1xf32>
    %90 = tpu.reciprocal %89 {approx = true} : vector<8x1xf32> -> vector<8x1xf32>
    %91 = vector.broadcast %90 : vector<8x1xf32> to vector<8x8xf32>
    %92 = arith.mulf %87, %91 : vector<8x8xf32>
    %93 = vector.extract_strided_slice %23 {offsets = [0, 64], sizes = [8, 32], strides = [1, 1]} : vector<8x128xf32> to vector<8x32xf32>
    %cst_40 = arith.constant dense<0.000000e+00> : vector<8x32xf32>
    %94 = tpu.matmul %92, %93, %cst_40 {dimension_numbers = #tpu.dot_dimension_numbers<[1], [0], [0], [1], [0, 0, 1, 1], [], []>} : vector<8x8xf32>, vector<8x32xf32>, vector<8x32xf32> -> vector<8x32xf32>
    %95 = arith.addf %75, %94 : vector<8x32xf32>
    %96 = vector.extract_strided_slice %34 {offsets = [0, 0, 96], sizes = [8, 8, 32], strides = [1, 1, 1]} : vector<8x8x128xf32> to vector<8x8x32xf32>
    %cst_41 = arith.constant dense<0.000000e+00> : vector<8x8xf32>
    %97 = vector.multi_reduction <add>, %96, %cst_41 [2] : vector<8x8x32xf32> to vector<8x8xf32>
    %cst_42 = arith.constant 0.000000e+00 : f32
    %98 = vector.broadcast %cst_42 : f32 to vector<8x8xf32>
    %99 = arith.cmpf ogt, %18, %98 : vector<8x8xf32>
    %cst_43 = arith.constant -1.000000e+30 : f32
    %100 = vector.broadcast %cst_43 : f32 to vector<8x8xf32>
    %101 = arith.select %99, %97, %100 : vector<8x8xi1>, vector<8x8xf32>
    %cst_44 = arith.constant dense<0xFF800000> : vector<8xf32>
    %102 = vector.multi_reduction <maximumf>, %101, %cst_44 [1] : vector<8x8xf32> to vector<8xf32>
    %103 = vector.shape_cast %102 : vector<8xf32> to vector<8x1xf32>
    %104 = vector.broadcast %103 : vector<8x1xf32> to vector<8x8xf32>
    %105 = arith.subf %97, %104 : vector<8x8xf32>
    %106 = math.exp %105 : vector<8x8xf32>
    %107 = arith.mulf %106, %18 : vector<8x8xf32>
    %cst_45 = arith.constant dense<0.000000e+00> : vector<8xf32>
    %108 = vector.multi_reduction <add>, %107, %cst_45 [1] : vector<8x8xf32> to vector<8xf32>
    %109 = vector.shape_cast %108 : vector<8xf32> to vector<8x1xf32>
    %110 = tpu.reciprocal %109 {approx = true} : vector<8x1xf32> -> vector<8x1xf32>
    %111 = vector.broadcast %110 : vector<8x1xf32> to vector<8x8xf32>
    %112 = arith.mulf %107, %111 : vector<8x8xf32>
    %113 = vector.extract_strided_slice %23 {offsets = [0, 96], sizes = [8, 32], strides = [1, 1]} : vector<8x128xf32> to vector<8x32xf32>
    %cst_46 = arith.constant dense<0.000000e+00> : vector<8x32xf32>
    %114 = tpu.matmul %112, %113, %cst_46 {dimension_numbers = #tpu.dot_dimension_numbers<[1], [0], [0], [1], [0, 0, 1, 1], [], []>} : vector<8x8xf32>, vector<8x32xf32>, vector<8x32xf32> -> vector<8x32xf32>
    %115 = arith.addf %95, %114 : vector<8x32xf32>
    %116 = vector.broadcast %6 : vector<1x32xf32> to vector<8x32xf32>
    %117 = arith.addf %115, %116 : vector<8x32xf32>
    %118 = math.tanh %117 : vector<8x32xf32>
    %cst_47 = arith.constant 0.000000e+00 : f32
    %119 = vector.broadcast %cst_47 : f32 to vector<8x1xf32>
    %120 = arith.cmpf ogt, %20, %119 : vector<8x1xf32>
    %121 = vector.shape_cast %120 : vector<8x1xi1> to vector<8x1xi1>
    %122 = vector.broadcast %121 : vector<8x1xi1> to vector<8x32xi1>
    %123 = arith.select %122, %118, %5 : vector<8x32xi1>, vector<8x32xf32>
    %c1 = arith.constant 1 : index
    %c0_48 = arith.constant 0 : index
    %c0_49 = arith.constant 0 : index
    %124 = vector.load %arg7[%c1, %c0_48, %c0_49] : memref<3x8x8xbf16, #tpu.memory_space<vmem>>, vector<1x8x8xbf16>
    %125 = vector.shape_cast %124 : vector<1x8x8xbf16> to vector<8x8xbf16>
    %126 = arith.extf %125 : vector<8x8xbf16> to vector<8x8xf32>
    %c1_50 = arith.constant 1 : index
    %c0_51 = arith.constant 0 : index
    %c0_52 = arith.constant 0 : index
    %127 = vector.load %arg8[%c1_50, %c0_51, %c0_52] : memref<3x8x1xf32, #tpu.memory_space<vmem>>, vector<1x8x1xf32>
    %128 = vector.shape_cast %127 : vector<1x8x1xf32> to vector<8x1xf32>
    %cst_53 = arith.constant dense<0.000000e+00> : vector<8x256xf32>
    %129 = tpu.matmul %123, %11, %cst_53 {dimension_numbers = #tpu.dot_dimension_numbers<[1], [0], [0], [1], [0, 0, 1, 1], [], []>} : vector<8x32xf32>, vector<32x256xf32>, vector<8x256xf32> -> vector<8x256xf32>
    %130 = arith.addf %129, %15 : vector<8x256xf32>
    %131 = vector.extract_strided_slice %130 {offsets = [0, 0], sizes = [8, 128], strides = [1, 1]} : vector<8x256xf32> to vector<8x128xf32>
    %132 = vector.extract_strided_slice %130 {offsets = [0, 128], sizes = [8, 128], strides = [1, 1]} : vector<8x256xf32> to vector<8x128xf32>
    %133 = vector.shape_cast %132 : vector<8x128xf32> to vector<8x1x128xf32>
    %134 = vector.shape_cast %131 : vector<8x128xf32> to vector<1x8x128xf32>
    %135 = vector.broadcast %133 : vector<8x1x128xf32> to vector<8x8x128xf32>
    %136 = vector.broadcast %134 : vector<1x8x128xf32> to vector<8x8x128xf32>
    %137 = arith.addf %135, %136 : vector<8x8x128xf32>
    %cst_54 = arith.constant 2.000000e-01 : f32
    %138 = vector.broadcast %cst_54 : f32 to vector<8x8x128xf32>
    %139 = arith.mulf %138, %137 : vector<8x8x128xf32>
    %140 = arith.maximumf %137, %139 : vector<8x8x128xf32>
    %141 = vector.broadcast %8 : vector<1x1x128xf32> to vector<8x8x128xf32>
    %142 = arith.mulf %140, %141 : vector<8x8x128xf32>
    %cst_55 = arith.constant 0.000000e+00 : f32
    %143 = vector.broadcast %cst_55 : f32 to vector<8x32xf32>
    %144 = vector.extract_strided_slice %142 {offsets = [0, 0, 0], sizes = [8, 8, 32], strides = [1, 1, 1]} : vector<8x8x128xf32> to vector<8x8x32xf32>
    %cst_56 = arith.constant dense<0.000000e+00> : vector<8x8xf32>
    %145 = vector.multi_reduction <add>, %144, %cst_56 [2] : vector<8x8x32xf32> to vector<8x8xf32>
    %cst_57 = arith.constant 0.000000e+00 : f32
    %146 = vector.broadcast %cst_57 : f32 to vector<8x8xf32>
    %147 = arith.cmpf ogt, %126, %146 : vector<8x8xf32>
    %cst_58 = arith.constant -1.000000e+30 : f32
    %148 = vector.broadcast %cst_58 : f32 to vector<8x8xf32>
    %149 = arith.select %147, %145, %148 : vector<8x8xi1>, vector<8x8xf32>
    %cst_59 = arith.constant dense<0xFF800000> : vector<8xf32>
    %150 = vector.multi_reduction <maximumf>, %149, %cst_59 [1] : vector<8x8xf32> to vector<8xf32>
    %151 = vector.shape_cast %150 : vector<8xf32> to vector<8x1xf32>
    %152 = vector.broadcast %151 : vector<8x1xf32> to vector<8x8xf32>
    %153 = arith.subf %145, %152 : vector<8x8xf32>
    %154 = math.exp %153 : vector<8x8xf32>
    %155 = arith.mulf %154, %126 : vector<8x8xf32>
    %cst_60 = arith.constant dense<0.000000e+00> : vector<8xf32>
    %156 = vector.multi_reduction <add>, %155, %cst_60 [1] : vector<8x8xf32> to vector<8xf32>
    %157 = vector.shape_cast %156 : vector<8xf32> to vector<8x1xf32>
    %158 = tpu.reciprocal %157 {approx = true} : vector<8x1xf32> -> vector<8x1xf32>
    %159 = vector.broadcast %158 : vector<8x1xf32> to vector<8x8xf32>
    %160 = arith.mulf %155, %159 : vector<8x8xf32>
    %161 = vector.extract_strided_slice %131 {offsets = [0, 0], sizes = [8, 32], strides = [1, 1]} : vector<8x128xf32> to vector<8x32xf32>
    %cst_61 = arith.constant dense<0.000000e+00> : vector<8x32xf32>
    %162 = tpu.matmul %160, %161, %cst_61 {dimension_numbers = #tpu.dot_dimension_numbers<[1], [0], [0], [1], [0, 0, 1, 1], [], []>} : vector<8x8xf32>, vector<8x32xf32>, vector<8x32xf32> -> vector<8x32xf32>
    %163 = arith.addf %143, %162 : vector<8x32xf32>
    %164 = vector.extract_strided_slice %142 {offsets = [0, 0, 32], sizes = [8, 8, 32], strides = [1, 1, 1]} : vector<8x8x128xf32> to vector<8x8x32xf32>
    %cst_62 = arith.constant dense<0.000000e+00> : vector<8x8xf32>
    %165 = vector.multi_reduction <add>, %164, %cst_62 [2] : vector<8x8x32xf32> to vector<8x8xf32>
    %cst_63 = arith.constant 0.000000e+00 : f32
    %166 = vector.broadcast %cst_63 : f32 to vector<8x8xf32>
    %167 = arith.cmpf ogt, %126, %166 : vector<8x8xf32>
    %cst_64 = arith.constant -1.000000e+30 : f32
    %168 = vector.broadcast %cst_64 : f32 to vector<8x8xf32>
    %169 = arith.select %167, %165, %168 : vector<8x8xi1>, vector<8x8xf32>
    %cst_65 = arith.constant dense<0xFF800000> : vector<8xf32>
    %170 = vector.multi_reduction <maximumf>, %169, %cst_65 [1] : vector<8x8xf32> to vector<8xf32>
    %171 = vector.shape_cast %170 : vector<8xf32> to vector<8x1xf32>
    %172 = vector.broadcast %171 : vector<8x1xf32> to vector<8x8xf32>
    %173 = arith.subf %165, %172 : vector<8x8xf32>
    %174 = math.exp %173 : vector<8x8xf32>
    %175 = arith.mulf %174, %126 : vector<8x8xf32>
    %cst_66 = arith.constant dense<0.000000e+00> : vector<8xf32>
    %176 = vector.multi_reduction <add>, %175, %cst_66 [1] : vector<8x8xf32> to vector<8xf32>
    %177 = vector.shape_cast %176 : vector<8xf32> to vector<8x1xf32>
    %178 = tpu.reciprocal %177 {approx = true} : vector<8x1xf32> -> vector<8x1xf32>
    %179 = vector.broadcast %178 : vector<8x1xf32> to vector<8x8xf32>
    %180 = arith.mulf %175, %179 : vector<8x8xf32>
    %181 = vector.extract_strided_slice %131 {offsets = [0, 32], sizes = [8, 32], strides = [1, 1]} : vector<8x128xf32> to vector<8x32xf32>
    %cst_67 = arith.constant dense<0.000000e+00> : vector<8x32xf32>
    %182 = tpu.matmul %180, %181, %cst_67 {dimension_numbers = #tpu.dot_dimension_numbers<[1], [0], [0], [1], [0, 0, 1, 1], [], []>} : vector<8x8xf32>, vector<8x32xf32>, vector<8x32xf32> -> vector<8x32xf32>
    %183 = arith.addf %163, %182 : vector<8x32xf32>
    %184 = vector.extract_strided_slice %142 {offsets = [0, 0, 64], sizes = [8, 8, 32], strides = [1, 1, 1]} : vector<8x8x128xf32> to vector<8x8x32xf32>
    %cst_68 = arith.constant dense<0.000000e+00> : vector<8x8xf32>
    %185 = vector.multi_reduction <add>, %184, %cst_68 [2] : vector<8x8x32xf32> to vector<8x8xf32>
    %cst_69 = arith.constant 0.000000e+00 : f32
    %186 = vector.broadcast %cst_69 : f32 to vector<8x8xf32>
    %187 = arith.cmpf ogt, %126, %186 : vector<8x8xf32>
    %cst_70 = arith.constant -1.000000e+30 : f32
    %188 = vector.broadcast %cst_70 : f32 to vector<8x8xf32>
    %189 = arith.select %187, %185, %188 : vector<8x8xi1>, vector<8x8xf32>
    %cst_71 = arith.constant dense<0xFF800000> : vector<8xf32>
    %190 = vector.multi_reduction <maximumf>, %189, %cst_71 [1] : vector<8x8xf32> to vector<8xf32>
    %191 = vector.shape_cast %190 : vector<8xf32> to vector<8x1xf32>
    %192 = vector.broadcast %191 : vector<8x1xf32> to vector<8x8xf32>
    %193 = arith.subf %185, %192 : vector<8x8xf32>
    %194 = math.exp %193 : vector<8x8xf32>
    %195 = arith.mulf %194, %126 : vector<8x8xf32>
    %cst_72 = arith.constant dense<0.000000e+00> : vector<8xf32>
    %196 = vector.multi_reduction <add>, %195, %cst_72 [1] : vector<8x8xf32> to vector<8xf32>
    %197 = vector.shape_cast %196 : vector<8xf32> to vector<8x1xf32>
    %198 = tpu.reciprocal %197 {approx = true} : vector<8x1xf32> -> vector<8x1xf32>
    %199 = vector.broadcast %198 : vector<8x1xf32> to vector<8x8xf32>
    %200 = arith.mulf %195, %199 : vector<8x8xf32>
    %201 = vector.extract_strided_slice %131 {offsets = [0, 64], sizes = [8, 32], strides = [1, 1]} : vector<8x128xf32> to vector<8x32xf32>
    %cst_73 = arith.constant dense<0.000000e+00> : vector<8x32xf32>
    %202 = tpu.matmul %200, %201, %cst_73 {dimension_numbers = #tpu.dot_dimension_numbers<[1], [0], [0], [1], [0, 0, 1, 1], [], []>} : vector<8x8xf32>, vector<8x32xf32>, vector<8x32xf32> -> vector<8x32xf32>
    %203 = arith.addf %183, %202 : vector<8x32xf32>
    %204 = vector.extract_strided_slice %142 {offsets = [0, 0, 96], sizes = [8, 8, 32], strides = [1, 1, 1]} : vector<8x8x128xf32> to vector<8x8x32xf32>
    %cst_74 = arith.constant dense<0.000000e+00> : vector<8x8xf32>
    %205 = vector.multi_reduction <add>, %204, %cst_74 [2] : vector<8x8x32xf32> to vector<8x8xf32>
    %cst_75 = arith.constant 0.000000e+00 : f32
    %206 = vector.broadcast %cst_75 : f32 to vector<8x8xf32>
    %207 = arith.cmpf ogt, %126, %206 : vector<8x8xf32>
    %cst_76 = arith.constant -1.000000e+30 : f32
    %208 = vector.broadcast %cst_76 : f32 to vector<8x8xf32>
    %209 = arith.select %207, %205, %208 : vector<8x8xi1>, vector<8x8xf32>
    %cst_77 = arith.constant dense<0xFF800000> : vector<8xf32>
    %210 = vector.multi_reduction <maximumf>, %209, %cst_77 [1] : vector<8x8xf32> to vector<8xf32>
    %211 = vector.shape_cast %210 : vector<8xf32> to vector<8x1xf32>
    %212 = vector.broadcast %211 : vector<8x1xf32> to vector<8x8xf32>
    %213 = arith.subf %205, %212 : vector<8x8xf32>
    %214 = math.exp %213 : vector<8x8xf32>
    %215 = arith.mulf %214, %126 : vector<8x8xf32>
    %cst_78 = arith.constant dense<0.000000e+00> : vector<8xf32>
    %216 = vector.multi_reduction <add>, %215, %cst_78 [1] : vector<8x8xf32> to vector<8xf32>
    %217 = vector.shape_cast %216 : vector<8xf32> to vector<8x1xf32>
    %218 = tpu.reciprocal %217 {approx = true} : vector<8x1xf32> -> vector<8x1xf32>
    %219 = vector.broadcast %218 : vector<8x1xf32> to vector<8x8xf32>
    %220 = arith.mulf %215, %219 : vector<8x8xf32>
    %221 = vector.extract_strided_slice %131 {offsets = [0, 96], sizes = [8, 32], strides = [1, 1]} : vector<8x128xf32> to vector<8x32xf32>
    %cst_79 = arith.constant dense<0.000000e+00> : vector<8x32xf32>
    %222 = tpu.matmul %220, %221, %cst_79 {dimension_numbers = #tpu.dot_dimension_numbers<[1], [0], [0], [1], [0, 0, 1, 1], [], []>} : vector<8x8xf32>, vector<8x32xf32>, vector<8x32xf32> -> vector<8x32xf32>
    %223 = arith.addf %203, %222 : vector<8x32xf32>
    %224 = vector.broadcast %6 : vector<1x32xf32> to vector<8x32xf32>
    %225 = arith.addf %223, %224 : vector<8x32xf32>
    %226 = math.tanh %225 : vector<8x32xf32>
    %cst_80 = arith.constant 0.000000e+00 : f32
    %227 = vector.broadcast %cst_80 : f32 to vector<8x1xf32>
    %228 = arith.cmpf ogt, %128, %227 : vector<8x1xf32>
    %229 = vector.shape_cast %228 : vector<8x1xi1> to vector<8x1xi1>
    %230 = vector.broadcast %229 : vector<8x1xi1> to vector<8x32xi1>
    %231 = arith.select %230, %226, %123 : vector<8x32xi1>, vector<8x32xf32>
    %c2 = arith.constant 2 : index
    %c0_81 = arith.constant 0 : index
    %c0_82 = arith.constant 0 : index
    %232 = vector.load %arg7[%c2, %c0_81, %c0_82] : memref<3x8x8xbf16, #tpu.memory_space<vmem>>, vector<1x8x8xbf16>
    %233 = vector.shape_cast %232 : vector<1x8x8xbf16> to vector<8x8xbf16>
    %234 = arith.extf %233 : vector<8x8xbf16> to vector<8x8xf32>
    %c2_83 = arith.constant 2 : index
    %c0_84 = arith.constant 0 : index
    %c0_85 = arith.constant 0 : index
    %235 = vector.load %arg8[%c2_83, %c0_84, %c0_85] : memref<3x8x1xf32, #tpu.memory_space<vmem>>, vector<1x8x1xf32>
    %236 = vector.shape_cast %235 : vector<1x8x1xf32> to vector<8x1xf32>
    %cst_86 = arith.constant dense<0.000000e+00> : vector<8x256xf32>
    %237 = tpu.matmul %231, %11, %cst_86 {dimension_numbers = #tpu.dot_dimension_numbers<[1], [0], [0], [1], [0, 0, 1, 1], [], []>} : vector<8x32xf32>, vector<32x256xf32>, vector<8x256xf32> -> vector<8x256xf32>
    %238 = arith.addf %237, %15 : vector<8x256xf32>
    %239 = vector.extract_strided_slice %238 {offsets = [0, 0], sizes = [8, 128], strides = [1, 1]} : vector<8x256xf32> to vector<8x128xf32>
    %240 = vector.extract_strided_slice %238 {offsets = [0, 128], sizes = [8, 128], strides = [1, 1]} : vector<8x256xf32> to vector<8x128xf32>
    %241 = vector.shape_cast %240 : vector<8x128xf32> to vector<8x1x128xf32>
    %242 = vector.shape_cast %239 : vector<8x128xf32> to vector<1x8x128xf32>
    %243 = vector.broadcast %241 : vector<8x1x128xf32> to vector<8x8x128xf32>
    %244 = vector.broadcast %242 : vector<1x8x128xf32> to vector<8x8x128xf32>
    %245 = arith.addf %243, %244 : vector<8x8x128xf32>
    %cst_87 = arith.constant 2.000000e-01 : f32
    %246 = vector.broadcast %cst_87 : f32 to vector<8x8x128xf32>
    %247 = arith.mulf %246, %245 : vector<8x8x128xf32>
    %248 = arith.maximumf %245, %247 : vector<8x8x128xf32>
    %249 = vector.broadcast %8 : vector<1x1x128xf32> to vector<8x8x128xf32>
    %250 = arith.mulf %248, %249 : vector<8x8x128xf32>
    %cst_88 = arith.constant 0.000000e+00 : f32
    %251 = vector.broadcast %cst_88 : f32 to vector<8x32xf32>
    %252 = vector.extract_strided_slice %250 {offsets = [0, 0, 0], sizes = [8, 8, 32], strides = [1, 1, 1]} : vector<8x8x128xf32> to vector<8x8x32xf32>
    %cst_89 = arith.constant dense<0.000000e+00> : vector<8x8xf32>
    %253 = vector.multi_reduction <add>, %252, %cst_89 [2] : vector<8x8x32xf32> to vector<8x8xf32>
    %cst_90 = arith.constant 0.000000e+00 : f32
    %254 = vector.broadcast %cst_90 : f32 to vector<8x8xf32>
    %255 = arith.cmpf ogt, %234, %254 : vector<8x8xf32>
    %cst_91 = arith.constant -1.000000e+30 : f32
    %256 = vector.broadcast %cst_91 : f32 to vector<8x8xf32>
    %257 = arith.select %255, %253, %256 : vector<8x8xi1>, vector<8x8xf32>
    %cst_92 = arith.constant dense<0xFF800000> : vector<8xf32>
    %258 = vector.multi_reduction <maximumf>, %257, %cst_92 [1] : vector<8x8xf32> to vector<8xf32>
    %259 = vector.shape_cast %258 : vector<8xf32> to vector<8x1xf32>
    %260 = vector.broadcast %259 : vector<8x1xf32> to vector<8x8xf32>
    %261 = arith.subf %253, %260 : vector<8x8xf32>
    %262 = math.exp %261 : vector<8x8xf32>
    %263 = arith.mulf %262, %234 : vector<8x8xf32>
    %cst_93 = arith.constant dense<0.000000e+00> : vector<8xf32>
    %264 = vector.multi_reduction <add>, %263, %cst_93 [1] : vector<8x8xf32> to vector<8xf32>
    %265 = vector.shape_cast %264 : vector<8xf32> to vector<8x1xf32>
    %266 = tpu.reciprocal %265 {approx = true} : vector<8x1xf32> -> vector<8x1xf32>
    %267 = vector.broadcast %266 : vector<8x1xf32> to vector<8x8xf32>
    %268 = arith.mulf %263, %267 : vector<8x8xf32>
    %269 = vector.extract_strided_slice %239 {offsets = [0, 0], sizes = [8, 32], strides = [1, 1]} : vector<8x128xf32> to vector<8x32xf32>
    %cst_94 = arith.constant dense<0.000000e+00> : vector<8x32xf32>
    %270 = tpu.matmul %268, %269, %cst_94 {dimension_numbers = #tpu.dot_dimension_numbers<[1], [0], [0], [1], [0, 0, 1, 1], [], []>} : vector<8x8xf32>, vector<8x32xf32>, vector<8x32xf32> -> vector<8x32xf32>
    %271 = arith.addf %251, %270 : vector<8x32xf32>
    %272 = vector.extract_strided_slice %250 {offsets = [0, 0, 32], sizes = [8, 8, 32], strides = [1, 1, 1]} : vector<8x8x128xf32> to vector<8x8x32xf32>
    %cst_95 = arith.constant dense<0.000000e+00> : vector<8x8xf32>
    %273 = vector.multi_reduction <add>, %272, %cst_95 [2] : vector<8x8x32xf32> to vector<8x8xf32>
    %cst_96 = arith.constant 0.000000e+00 : f32
    %274 = vector.broadcast %cst_96 : f32 to vector<8x8xf32>
    %275 = arith.cmpf ogt, %234, %274 : vector<8x8xf32>
    %cst_97 = arith.constant -1.000000e+30 : f32
    %276 = vector.broadcast %cst_97 : f32 to vector<8x8xf32>
    %277 = arith.select %275, %273, %276 : vector<8x8xi1>, vector<8x8xf32>
    %cst_98 = arith.constant dense<0xFF800000> : vector<8xf32>
    %278 = vector.multi_reduction <maximumf>, %277, %cst_98 [1] : vector<8x8xf32> to vector<8xf32>
    %279 = vector.shape_cast %278 : vector<8xf32> to vector<8x1xf32>
    %280 = vector.broadcast %279 : vector<8x1xf32> to vector<8x8xf32>
    %281 = arith.subf %273, %280 : vector<8x8xf32>
    %282 = math.exp %281 : vector<8x8xf32>
    %283 = arith.mulf %282, %234 : vector<8x8xf32>
    %cst_99 = arith.constant dense<0.000000e+00> : vector<8xf32>
    %284 = vector.multi_reduction <add>, %283, %cst_99 [1] : vector<8x8xf32> to vector<8xf32>
    %285 = vector.shape_cast %284 : vector<8xf32> to vector<8x1xf32>
    %286 = tpu.reciprocal %285 {approx = true} : vector<8x1xf32> -> vector<8x1xf32>
    %287 = vector.broadcast %286 : vector<8x1xf32> to vector<8x8xf32>
    %288 = arith.mulf %283, %287 : vector<8x8xf32>
    %289 = vector.extract_strided_slice %239 {offsets = [0, 32], sizes = [8, 32], strides = [1, 1]} : vector<8x128xf32> to vector<8x32xf32>
    %cst_100 = arith.constant dense<0.000000e+00> : vector<8x32xf32>
    %290 = tpu.matmul %288, %289, %cst_100 {dimension_numbers = #tpu.dot_dimension_numbers<[1], [0], [0], [1], [0, 0, 1, 1], [], []>} : vector<8x8xf32>, vector<8x32xf32>, vector<8x32xf32> -> vector<8x32xf32>
    %291 = arith.addf %271, %290 : vector<8x32xf32>
    %292 = vector.extract_strided_slice %250 {offsets = [0, 0, 64], sizes = [8, 8, 32], strides = [1, 1, 1]} : vector<8x8x128xf32> to vector<8x8x32xf32>
    %cst_101 = arith.constant dense<0.000000e+00> : vector<8x8xf32>
    %293 = vector.multi_reduction <add>, %292, %cst_101 [2] : vector<8x8x32xf32> to vector<8x8xf32>
    %cst_102 = arith.constant 0.000000e+00 : f32
    %294 = vector.broadcast %cst_102 : f32 to vector<8x8xf32>
    %295 = arith.cmpf ogt, %234, %294 : vector<8x8xf32>
    %cst_103 = arith.constant -1.000000e+30 : f32
    %296 = vector.broadcast %cst_103 : f32 to vector<8x8xf32>
    %297 = arith.select %295, %293, %296 : vector<8x8xi1>, vector<8x8xf32>
    %cst_104 = arith.constant dense<0xFF800000> : vector<8xf32>
    %298 = vector.multi_reduction <maximumf>, %297, %cst_104 [1] : vector<8x8xf32> to vector<8xf32>
    %299 = vector.shape_cast %298 : vector<8xf32> to vector<8x1xf32>
    %300 = vector.broadcast %299 : vector<8x1xf32> to vector<8x8xf32>
    %301 = arith.subf %293, %300 : vector<8x8xf32>
    %302 = math.exp %301 : vector<8x8xf32>
    %303 = arith.mulf %302, %234 : vector<8x8xf32>
    %cst_105 = arith.constant dense<0.000000e+00> : vector<8xf32>
    %304 = vector.multi_reduction <add>, %303, %cst_105 [1] : vector<8x8xf32> to vector<8xf32>
    %305 = vector.shape_cast %304 : vector<8xf32> to vector<8x1xf32>
    %306 = tpu.reciprocal %305 {approx = true} : vector<8x1xf32> -> vector<8x1xf32>
    %307 = vector.broadcast %306 : vector<8x1xf32> to vector<8x8xf32>
    %308 = arith.mulf %303, %307 : vector<8x8xf32>
    %309 = vector.extract_strided_slice %239 {offsets = [0, 64], sizes = [8, 32], strides = [1, 1]} : vector<8x128xf32> to vector<8x32xf32>
    %cst_106 = arith.constant dense<0.000000e+00> : vector<8x32xf32>
    %310 = tpu.matmul %308, %309, %cst_106 {dimension_numbers = #tpu.dot_dimension_numbers<[1], [0], [0], [1], [0, 0, 1, 1], [], []>} : vector<8x8xf32>, vector<8x32xf32>, vector<8x32xf32> -> vector<8x32xf32>
    %311 = arith.addf %291, %310 : vector<8x32xf32>
    %312 = vector.extract_strided_slice %250 {offsets = [0, 0, 96], sizes = [8, 8, 32], strides = [1, 1, 1]} : vector<8x8x128xf32> to vector<8x8x32xf32>
    %cst_107 = arith.constant dense<0.000000e+00> : vector<8x8xf32>
    %313 = vector.multi_reduction <add>, %312, %cst_107 [2] : vector<8x8x32xf32> to vector<8x8xf32>
    %cst_108 = arith.constant 0.000000e+00 : f32
    %314 = vector.broadcast %cst_108 : f32 to vector<8x8xf32>
    %315 = arith.cmpf ogt, %234, %314 : vector<8x8xf32>
    %cst_109 = arith.constant -1.000000e+30 : f32
    %316 = vector.broadcast %cst_109 : f32 to vector<8x8xf32>
    %317 = arith.select %315, %313, %316 : vector<8x8xi1>, vector<8x8xf32>
    %cst_110 = arith.constant dense<0xFF800000> : vector<8xf32>
    %318 = vector.multi_reduction <maximumf>, %317, %cst_110 [1] : vector<8x8xf32> to vector<8xf32>
    %319 = vector.shape_cast %318 : vector<8xf32> to vector<8x1xf32>
    %320 = vector.broadcast %319 : vector<8x1xf32> to vector<8x8xf32>
    %321 = arith.subf %313, %320 : vector<8x8xf32>
    %322 = math.exp %321 : vector<8x8xf32>
    %323 = arith.mulf %322, %234 : vector<8x8xf32>
    %cst_111 = arith.constant dense<0.000000e+00> : vector<8xf32>
    %324 = vector.multi_reduction <add>, %323, %cst_111 [1] : vector<8x8xf32> to vector<8xf32>
    %325 = vector.shape_cast %324 : vector<8xf32> to vector<8x1xf32>
    %326 = tpu.reciprocal %325 {approx = true} : vector<8x1xf32> -> vector<8x1xf32>
    %327 = vector.broadcast %326 : vector<8x1xf32> to vector<8x8xf32>
    %328 = arith.mulf %323, %327 : vector<8x8xf32>
    %329 = vector.extract_strided_slice %239 {offsets = [0, 96], sizes = [8, 32], strides = [1, 1]} : vector<8x128xf32> to vector<8x32xf32>
    %cst_112 = arith.constant dense<0.000000e+00> : vector<8x32xf32>
    %330 = tpu.matmul %328, %329, %cst_112 {dimension_numbers = #tpu.dot_dimension_numbers<[1], [0], [0], [1], [0, 0, 1, 1], [], []>} : vector<8x8xf32>, vector<8x32xf32>, vector<8x32xf32> -> vector<8x32xf32>
    %331 = arith.addf %311, %330 : vector<8x32xf32>
    %332 = vector.broadcast %6 : vector<1x32xf32> to vector<8x32xf32>
    %333 = arith.addf %331, %332 : vector<8x32xf32>
    %334 = math.tanh %333 : vector<8x32xf32>
    %cst_113 = arith.constant 0.000000e+00 : f32
    %335 = vector.broadcast %cst_113 : f32 to vector<8x1xf32>
    %336 = arith.cmpf ogt, %236, %335 : vector<8x1xf32>
    %337 = vector.shape_cast %336 : vector<8x1xi1> to vector<8x1xi1>
    %338 = vector.broadcast %337 : vector<8x1xi1> to vector<8x32xi1>
    %339 = arith.select %338, %334, %231 : vector<8x32xi1>, vector<8x32xf32>
    %c0_114 = arith.constant 0 : index
    %c0_115 = arith.constant 0 : index
    %340 = vector.load %arg9[%c0_114, %c0_115] : memref<1x8xf32, #tpu.memory_space<vmem>>, vector<1x8xf32>
    %cst_116 = arith.constant dense<0.000000e+00> : vector<1x32xf32>
    %341 = tpu.matmul %340, %339, %cst_116 {dimension_numbers = #tpu.dot_dimension_numbers<[1], [0], [0], [1], [0, 0, 1, 1], [], []>} : vector<1x8xf32>, vector<8x32xf32>, vector<1x32xf32> -> vector<1x32xf32>
    %c0_117 = arith.constant 0 : index
    %c0_118 = arith.constant 0 : index
    %342 = vector.load %arg10[%c0_117, %c0_118] : memref<32x8xf32, #tpu.memory_space<vmem>>, vector<32x8xf32>
    %cst_119 = arith.constant dense<0.000000e+00> : vector<1x8xf32>
    %343 = tpu.matmul %341, %342, %cst_119 {dimension_numbers = #tpu.dot_dimension_numbers<[1], [0], [0], [1], [0, 0, 1, 1], [], []>} : vector<1x32xf32>, vector<32x8xf32>, vector<1x8xf32> -> vector<1x8xf32>
    %c0_120 = arith.constant 0 : index
    %c0_121 = arith.constant 0 : index
    %344 = vector.load %arg11[%c0_120, %c0_121] : memref<1x8xf32, #tpu.memory_space<vmem>>, vector<1x8xf32>
    %345 = arith.addf %343, %344 : vector<1x8xf32>
    %c0_122 = arith.constant 0 : index
    %c0_123 = arith.constant 0 : index
    %346 = vector.load %arg12[%c0_122, %c0_123] : memref<1x8xf32, #tpu.memory_space<vmem>>, vector<1x8xf32>
    tpu.vector_store %arg12[%c0_122, %c0_123], %345 {strides = array<i32>} : memref<1x8xf32, #tpu.memory_space<vmem>>, vector<1x8xf32>,
    return
  }
}

</mosaic_0001>

<bundles_post_ra>
// kernel: forward.1
= control target key start
LH: loop header
LB: loop body
LE: loop exit
PB: predicated region body
PF: predicated region fallthrough
CT: control target
= control target key end

     0   :  { %vm56_vm0 = vcmask 1041408   ;;  %v9545_v2 = vmov 0.0|0.0   ;;  %vm6977_vm1 = vmmov 1   ;;  %vm6978_vm3 = vmmov 0   ;;  %s9532_s0 = inlined_call_operand.vmem [shape: f32[8,10], index: 0, kind: input, shape index: {}]   ;;  %s9533_s1 = inlined_call_operand.vmem [shape: f32[10,32], index: 1, kind: input, shape index: {}]   ;;  %s9534_s2 = inlined_call_operand.vmem [shape: f32[1,32], index: 2, kind: input, shape index: {}]   ;;  %s9535_s3 = inlined_call_operand.vmem [shape: f32[64,256], index: 3, kind: input, shape index: {}]   ;;  %s9536_s4 = inlined_call_operand.vmem [shape: f32[1,256], index: 4, kind: input, shape index: {}]   ;;  %s9537_s5 = inlined_call_operand.vmem [shape: f32[1,128], index: 5, kind: input, shape index: {}]   ;;  %s9538_s6 = inlined_call_operand.vmem [shape: f32[1,32], index: 6, kind: input, shape index: {}]   ;;  %s9539_s7 = inlined_call_operand.vmem [shape: bf16[3,8,8], index: 7, kind: input, shape index: {}]   ;;  %s9540_s8 = inlined_call_operand.vmem [shape: f32[3,8,1], index: 8, kind: input, shape index: {}]   ;;  %s9541_s9 = inlined_call_operand.vmem [shape: f32[1,8], index: 9, kind: input, shape index: {}]   ;;  %s9542_s10 = inlined_call_operand.vmem [shape: f32[32,8], index: 10, kind: input, shape index: {}]   ;;  %s9543_s11 = inlined_call_operand.vmem [shape: f32[1,8], index: 11, kind: input, shape index: {}]   ;;  %s9544_s12 = inlined_call_operand.hbm [shape: f32[1,8], index: 12, kind: output, shape index: {}]  }
   0x1   :  { %v43_v0 = vld [vmem:[%s9533_s1] sm:$0xff]  ;;  %v44_v1 = vld [vmem:[%s9533_s1 + $0x8] sm:$0x3]  ;;  %6672 = vmatprep.subr.bf16.mxu1 %v9545_v2  ;;  %vm6674_vm2 = vmpackc.low %vm56_vm0, %vm6977_vm1  ;;  %v9547_v6 = vmov 0.0   ;;  %vm52_vm4 = vcmask 80896  }
   0x2   :  { %v6673_v3 = vpack.c.bf16 %v44_v1, %v43_v0  ;;  %v42_v4 = vld [vmem:[%s9532_s0] sm:$0xff]  ;;  %v141_v5 = vld [vmem:[%s9535_s3 + $0x48] sm:$0xff]  ;;  %6593 = vmatprep.mubr.msk.f32.mxu1 %vm6978_vm3, %v9547_v6  ;;  %v143_v7 = vld [vmem:[%s9535_s3 + $0x58] sm:$0xff]  ;;  %302 = vmatprep.mubr.f32.mxu0 %v9547_v6 }
   0x3   :  { %v133_v8 = vld [vmem:[%s9535_s3 + $0x8] sm:$0xff]  ;;  %v135_v9 = vld [vmem:[%s9535_s3 + $0x18] sm:$0xff]  ;;  %v6676_v10 = vpack.c.bf16 %v143_v7, %v141_v5  ;;  %v140_v12 = vld [vmem:[%s9535_s3 + $0x40] sm:$0xff] }
   0x4   :  { %6675 = vmatpush3.bf16.msk.msra.mxu1 %vm6674_vm2, %v6673_v3  ;;  %v7076_v11 = vpack.c.bf16 %v135_v9, %v133_v8  ;;  %v142_v13 = vld [vmem:[%s9535_s3 + $0x50] sm:$0xff]  ;;  %v132_v14 = vld [vmem:[%s9535_s3] sm:$0xff]  ;;  %v145_v17 = vld [vmem:[%s9535_s3 + $0x68] sm:$0xff] }
   0x5   :  { %v6678_v15 = vpack.c.bf16 %v142_v13, %v140_v12  ;;  %v134_v16 = vld [vmem:[%s9535_s3 + $0x10] sm:$0xff]  ;;  %v147_v18 = vld [vmem:[%s9535_s3 + $0x78] sm:$0xff]  ;;  %6677 = vmatprep.subr.bf16.mxu1 %v6676_v10  ;;  %v137_v21 = vld [vmem:[%s9535_s3 + $0x28] sm:$0xff] }
   0x6   :  { %9574 = vst [vmem:[#allocation5_spill] sm:$0xff] %v7076_v11  ;;  %6685 = vmatprep.subr.bf16.mxu0 %v7076_v11  ;;  %v7097_v19 = vpack.c.bf16 %v134_v16, %v132_v14  ;;  %v6680_v20 = vpack.c.bf16 %v147_v18, %v145_v17  ;;  %v139_v22 = vld [vmem:[%s9535_s3 + $0x38] sm:$0xff] }
   0x7   :  { %6594 = vmatmul.mubr.msk.f32.vlgmr.msra.gmra.mrb[0].mxu1 %vm52_vm4, %v42_v4  ;;  %v7106_v23 = vpack.c.bf16 %v139_v22, %v137_v21 }
   0x8   :  { %9575 = vst [vmem:[#allocation6_spill] sm:$0xff] %v7097_v19 }
   0x9   :  { %9576 = vst [vmem:[#allocation7_spill] sm:$0xff] %v7106_v23 }
   0xa   :  { %17 = vsyncpa [#allocation3], 0  ;;  %6679 = vmatpush1.bf16.msra.mxu1 %v6678_v15  ;;  %6687 = vmatpush1.bf16.msra.mxu0 %v7097_v19  ;;  %v144_v24 = vld [vmem:[%s9535_s3 + $0x60] sm:$0xff]  ;;  %v146_v25 = vld [vmem:[%s9535_s3 + $0x70] sm:$0xff]  ;;  %vm160_vm5 = vcmask 261120   ;;  %v150_v34 = vlaneseq  ;;  %s6981_s22 = smov 96  }
   0xb   :  { %6681 = vmatprep.subr.bf16.mxu1 %v6680_v20  ;;  %6689 = vmatprep.subr.bf16.mxu0 %v7106_v23  ;;  %v136_v26 = vld [vmem:[%s9535_s3 + $0x20] sm:$0xff]  ;;  %v6682_v27 = vpack.c.bf16 %v146_v25, %v144_v24  ;;  %v138_v28 = vld [vmem:[%s9535_s3 + $0x30] sm:$0xff]  ;;  %v6980_v39 = vmov 1966171168   ;;  %s6982_s23 = smov 64   ;;  %s6983_s24 = smov 32  }
   0xc   :  { %228 = vmatprep.mubr.f32.mxu1 %v9547_v6  ;;  %v7123_v29 = vpack.c.bf16 %v138_v28, %v136_v26  ;;  %v6528_v30 = vld [vmem:[%s9534_s2] ss:$0 sm:$0xff]  ;;  %v7142_v35 = vshrl.u32 %v150_v34, 7  ;;  %v312_v40 = vunpack.c.l.s4 %v6980_v39  ;;  %vm504_vm6 = vcmask 1041409   ;;  %s6985_s30 = smov [#allocation2]  }
   0xd   :  { %v148_v37 = vld [vmem:[%s9536_s4] sm:$0x3]  ;;  %vm506_vm7 = vcmask 1042434   ;;  %vm508_vm8 = vcmask 1043459   ;;  %vm510_vm9 = vcmask 1044484   ;;  %vm512_vm10 = vcmask 1045509  }
   0xe   :  { %9577 = vst [vmem:[#allocation8_spill] sm:$0xff] %v7123_v29  ;;  %6683 = vmatpush1.bf16.msra.mxu1 %v6682_v27  ;;  %6691 = vmatpush1.bf16.msra.mxu0 %v7123_v29  ;;  %v7145_v36 = vsub.s32 0, %v7142_v35  ;;  %v7151_v38 = vsub.s32 1, %v7142_v35  ;;  %v313_v43 = vunpack.c.0.s8 %v312_v40  ;;  %v7180_v3 = vld [vmem:[%s9537_s5] ss:$0 sm:$0xff]  ;;  %vm514_vm11 = vcmask 1046534  }
   0xf   :  { %6596 = vmatprep.subr.mxu1 %v9547_v6  ;;  %6601 = vmatprep.subr.mxu0 %v9547_v6  ;;  %vm516_vm12 = vcmask 1047559   ;;  %vm520_vm14 = vcmask 64512   ;;  %s6520_s13 = sshll.u32 %s6985_s30, 4  ;;  %s6521_s13 = int_to_ptr.vmem [resolvable:$true] %s6520_s13 }
  0x10   :  { %v153_v41 = vrot.slane %v148_v37, %v7145_v36  ;;  %v157_v42 = vrot.slane %v148_v37, %v7151_v38  ;;  %v7160_v50 = vsub.s32 %v313_v43, %v7142_v35  ;;  %s6956_s14 = scalar_lea.vmem %s6521_s13, 32  ;;  %p6957_p1 = scmp.lt.s32.totalorder %s6521_s13, %s6521_s13 }
  0x12   :  { %9581 = vst [vmem:[#allocation12_spill] sm:$0xff] %v7160_v50 }
  0xda   :  { %v126_v31 = vpop.f32.mrb[0].mxu1 }
  0xdb   :  { %v7131_v32 = vadd.f32 %v6528_v30, %v126_v31  ;;  %v6595_v33 = vpop.f32.mrb[1].mxu1 }
  0xdd   :  { %9578 = vst [vmem:[#allocation9_spill] sm:$0xff] %v7131_v32  ;;  %6531 = vmatmul.mubr.msk.f32.vlgmr.msra.gmra.mrb[2].mxu1 %vm160_vm5, %v7131_v32  ;;  %6532 = vmatmul.mubr.msk.f32.vlgmr.msra.gmra.mrb[0].mxu0 %vm160_vm5, %v7131_v32 }
  0xde   :  { %6603 = vmatprep.mubr.msk.f32.mxu0 %vm6978_vm3, %v9547_v6  ;;  %6598 = vmatprep.mubr.msk.f32.mxu1 %vm6978_vm3, %v9547_v6 }
 0x1b0   :  { %v230_v44 = vpop.f32.mrb[2].mxu1  ;;  %v304_v45 = vpop.f32.mrb[0].mxu0 }
 0x1b1   :  { %v7155_v46 = vadd.f32 %v230_v44, %v153_v41  ;;  %v232_v47 = vpop.f32.mrb[3].mxu1  ;;  %v306_v48 = vpop.f32.mrb[1].mxu0 }
 0x1b2   :  { %v7157_v49 = vadd.f32 %v232_v47, %v157_v42 }
 0x1b3   :  { %9579 = vst [vmem:[#allocation10_spill] sm:$0xff] %v7155_v46  ;;  %v7163_v51 = vadd.f32 %v304_v45, %v7155_v46 }
 0x1b4   :  { %9580 = vst [vmem:[#allocation11_spill] sm:$0xff] %v7157_v49  ;;  %v307_v52 = vadd.f32 %v306_v48, %v7157_v49 }
 0x1b5   :  { %9582 = vst [vmem:[#allocation13_spill] sm:$0xff] %v7163_v51  ;;  %6602 = vmatpush3.msra.mxu0 %v7163_v51 }
 0x1b6   :  { %v317_v53 = vrot.slane %v307_v52, %v7160_v50  ;;  %6611 = vmatprep.subr.mxu0 %v9547_v6  ;;  %v310_v60 = vcombine.high %v307_v52, %v307_v52 }
 0x1b8   :  { %v325_v54 = vcombine.high %v317_v53, %v317_v53  ;;  %v333_v55 = vrot.slane %v317_v53, %v7160_v50  ;;  %v324_v4 = vrot.slane %v310_v60, %v7160_v50 }
 0x1ba   :  { %v347_v56 = vrot.slane %v325_v54, %v7160_v50  ;;  %v355_v57 = vcombine.high %v333_v55, %v333_v55  ;;  %v362_v58 = vrot.slane %v333_v55, %v7145_v36  ;;  %v340_v12 = vrot.slane %v324_v4, %v7160_v50 }
 0x1bb   :  { %v326_v24 = vcombine.high %v324_v4, %v324_v4 }
 0x1bc   :  { %v366_v59 = vrot.slane %v347_v56, %v7145_v36  ;;  %v370_v61 = vrot.slane %v355_v57, %v7145_v36  ;;  %v399_v62 = vadd.f32 %v362_v58, %v7163_v51  ;;  %v378_v15 = vrot.slane %v340_v12, %v7145_v36 }
 0x1bd   :  { %v356_v25 = vcombine.high %v340_v12, %v340_v12  ;;  %v354_v26 = vrot.slane %v326_v24, %v7160_v50  ;;  %v357_v28 = vcombine.high %v347_v56, %v347_v56 }
 0x1be   :  { %v400_v63 = vadd.f32 %v366_v59, %v7163_v51  ;;  %v401_v0 = vadd.f32 %v370_v61, %v7163_v51  ;;  %v407_v1 = vmul.f32 0.2, %v399_v62  ;;  %v403_v17 = vadd.f32 %v378_v15, %v7163_v51 }
 0x1bf   :  { %v386_v27 = vrot.slane %v356_v25, %v7145_v36  ;;  %v382_v31 = vrot.slane %v354_v26, %v7145_v36  ;;  %v374_v37 = vrot.slane %v357_v28, %v7145_v36  ;;  %v358_v43 = vcombine.high %v354_v26, %v354_v26 }
 0x1c0   :  { %v415_v5 = vmax.f32 %v399_v62, %v407_v1  ;;  %v409_v7 = vmul.f32 0.2, %v401_v0  ;;  %v408_v8 = vmul.f32 0.2, %v400_v63  ;;  %v411_v18 = vmul.f32 0.2, %v403_v17 }
 0x1c1   :  { %v405_v33 = vadd.f32 %v386_v27, %v7163_v51  ;;  %v404_v41 = vadd.f32 %v382_v31, %v7163_v51  ;;  %v402_v42 = vadd.f32 %v374_v37, %v7163_v51  ;;  %v390_v48 = vrot.slane %v358_v43, %v7145_v36 }
 0x1c2   :  { %v429_v9 = vmul.f32 %v7180_v3, %v415_v5  ;;  %v417_v10 = vmax.f32 %v401_v0, %v409_v7  ;;  %v416_v14 = vmax.f32 %v400_v63, %v408_v8  ;;  %v419_v20 = vmax.f32 %v403_v17, %v411_v18 }
 0x1c3   :  { %v413_v40 = vmul.f32 0.2, %v405_v33  ;;  %v412_v45 = vmul.f32 0.2, %v404_v41  ;;  %v410_v47 = vmul.f32 0.2, %v402_v42  ;;  %v406_v56 = vadd.f32 %v390_v48, %v7163_v51 }
 0x1c4   :  { %795 = vrot.lane.b32.xlu0 %v429_v9, %s6981_s22  ;;  %v431_v13 = vmul.f32 %v7180_v3, %v417_v10  ;;  %v430_v16 = vmul.f32 %v7180_v3, %v416_v14  ;;  %v7198_v21 = vmul.f32 %v7180_v3, %v419_v20  ;;  %v437_v22 = vsel %vm160_vm5, %v429_v9, 0.0 }
 0x1c5   :  { %v421_v44 = vmax.f32 %v405_v33, %v413_v40  ;;  %v420_v53 = vmax.f32 %v404_v41, %v412_v45  ;;  %v418_v54 = vmax.f32 %v402_v42, %v410_v47  ;;  %v414_v58 = vmul.f32 0.2, %v406_v56 }
 0x1c6   :  { %799 = vrot.lane.b32.xlu1 %v431_v13, %s6981_s22  ;;  %v440_v30 = vsel %vm160_vm5, %v430_v16, 0.0  ;;  %v443_v39 = vsel %vm160_vm5, %v431_v13, 0.0 }
 0x1c7   :  { %v435_v52 = vmul.f32 %v7180_v3, %v421_v44  ;;  %v434_v55 = vmul.f32 %v7180_v3, %v420_v53  ;;  %v432_v57 = vmul.f32 %v7180_v3, %v418_v54  ;;  %v422_v59 = vmax.f32 %v406_v56, %v414_v58 }
 0x1c8   :  { %1383 = vrot.lane.b32.xlu0 %v429_v9, %s6982_s23 }
 0x1c9   :  { %v436_v60 = vmul.f32 %v7180_v3, %v422_v59  ;;  %v452_v61 = vsel %vm160_vm5, %v434_v55, 0.0  ;;  %v446_v0 = vsel %vm160_vm5, %v432_v57, 0.0  ;;  %v455_v15 = vsel %vm160_vm5, %v435_v52, 0.0 }
 0x1ca   :  { %1385 = vrot.lane.b32.xlu1 %v430_v16, %s6982_s23 }
 0x1cb   :  { %v458_v62 = vsel %vm160_vm5, %v436_v60, 0.0 }
 0x1cc   :  { %1828 = vrot.lane.b32.xlu0 %v429_v9, %s6983_s24 }
 0x1ce   :  { %1387 = vrot.lane.b32.xlu1 %v431_v13, %s6982_s23 }
 0x1d2   :  { %1830 = vrot.lane.b32.xlu1 %v430_v16, %s6983_s24 }
 0x1d6   :  { %1832 = vrot.lane.b32.xlu1 %v431_v13, %s6983_s24  ;;  %v449_v13 = vsel %vm160_vm5, %v7198_v21, 0.0 }
 0x1da   :  { %1836 = vrot.lane.b32.xlu1 %v7198_v21, %s6983_s24 }
 0x1eb   :  { %438 = vadd.xlane.f32.xlu0 %v437_v22 }
 0x1fe   :  { %441 = vadd.xlane.f32.xlu1 %v440_v30 }
 0x201   :  { %797 = vrot.lane.b32.xlu0 %v430_v16, %s6981_s22 }
 0x202   :  { %444 = vadd.xlane.f32.xlu1 %v443_v39 }
 0x205   :  { %803 = vrot.lane.b32.xlu0 %v7198_v21, %s6981_s22 }
 0x209   :  { %1391 = vrot.lane.b32.xlu0 %v7198_v21, %s6982_s23 }
 0x20d   :  { %807 = vrot.lane.b32.xlu0 %v435_v52, %s6981_s22 }
 0x211   :  { %1393 = vrot.lane.b32.xlu0 %v434_v55, %s6982_s23 }
 0x213   :  { %801 = vrot.lane.b32.xlu1 %v432_v57, %s6981_s22 }
 0x215   :  { %1395 = vrot.lane.b32.xlu0 %v435_v52, %s6982_s23 }
 0x217   :  { %805 = vrot.lane.b32.xlu1 %v434_v55, %s6981_s22 }
 0x219   :  { %1840 = vrot.lane.b32.xlu0 %v435_v52, %s6983_s24 }
 0x21b   :  { %1389 = vrot.lane.b32.xlu1 %v432_v57, %s6982_s23 }
 0x21d   :  { %809 = vrot.lane.b32.xlu0 %v436_v60, %s6981_s22 }
 0x21f   :  { %1834 = vrot.lane.b32.xlu1 %v432_v57, %s6983_s24 }
 0x221   :  { %1397 = vrot.lane.b32.xlu0 %v436_v60, %s6982_s23 }
 0x223   :  { %1838 = vrot.lane.b32.xlu1 %v434_v55, %s6983_s24 }
 0x236   :  { %v796_v63 = vpop.permute.xlu0 %795 }
 0x237   :  { %v819_v1 = vsel %vm160_vm5, %v796_v63, 0.0 }
 0x238   :  { %v800_v3 = vpop.permute.xlu1 %799 }
 0x239   :  { %v825_v4 = vsel %vm160_vm5, %v800_v3, 0.0  ;;  %v235_v3 = vld [vmem:[%s9539_s7] sm:$0xf] }
 0x23a   :  { %v1384_v5 = vpop.permute.xlu0 %1383 }
 0x23b   :  { %v1407_v20 = vsel %vm160_vm5, %v1384_v5, 0.0 }
 0x23c   :  { %v1386_v7 = vpop.permute.xlu1 %1385 }
 0x23d   :  { %v1410_v24 = vsel %vm160_vm5, %v1386_v7, 0.0  ;;  %v7278_v7 = vsub.s32 2, %v7142_v35 }
 0x23e   :  { %v1829_v8 = vpop.permute.xlu0 %1828 }
 0x23f   :  { %v1852_v21 = vsel %vm160_vm5, %v1829_v8, 0.0 }
 0x240   :  { %453 = vadd.xlane.f32.xlu0 %v452_v61  ;;  %v1388_v9 = vpop.permute.xlu1 %1387 }
 0x241   :  { %v1413_v39 = vsel %vm160_vm5, %v1388_v9, 0.0  ;;  %v7283_v9 = vsub.s32 3, %v7142_v35 }
 0x244   :  { %459 = vadd.xlane.f32.xlu0 %v458_v62  ;;  %v1831_v12 = vpop.permute.xlu1 %1830 }
 0x245   :  { %v1855_v27 = vsel %vm160_vm5, %v1831_v12, 0.0 }
 0x247   :  { %447 = vadd.xlane.f32.xlu1 %v446_v0 }
 0x248   :  { %820 = vadd.xlane.f32.xlu0 %v819_v1  ;;  %v1833_v17 = vpop.permute.xlu1 %1832 }
 0x249   :  { %v1858_v43 = vsel %vm160_vm5, %v1833_v17, 0.0 }
 0x24c   :  { %826 = vadd.xlane.f32.xlu0 %v825_v4  ;;  %v1837_v25 = vpop.permute.xlu1 %1836  ;;  %v7273_v4 = vunpack.c.l.bf16 %v235_v3 }
 0x24d   :  { %v1864_v41 = vsel %vm160_vm5, %v1837_v25, 0.0  ;;  %v471_v25 = vand.u32 127, %v150_v34 }
 0x24e   :  { %v593_v5 = vrot.slane %v7273_v4, %v7145_v36  ;;  %v607_v8 = vrot.slane %v7273_v4, %v7278_v7  ;;  %v614_v12 = vrot.slane %v7273_v4, %v7283_v9  ;;  %vm461_vm13 = vcmp.gt.f32.partialorder %v7273_v4, 0.0 }
 0x258   :  { %1842 = vrot.lane.b32.xlu1 %v436_v60, %s6983_s24 }
 0x278   :  { %v7240_v10 = vpop.xlane.xlu0 %438 }
 0x27c   :  { %450 = vadd.xlane.f32.xlu1 %v449_v13  ;;  %v798_v14 = vpop.permute.xlu0 %797  ;;  %v7288_v13 = vsub.s32 5, %v7142_v35 }
 0x27d   :  { %v822_v30 = vsel %vm160_vm5, %v798_v14, 0.0 }
 0x27e   :  { %v628_v14 = vrot.slane %v7273_v4, %v7288_v13 }
 0x280   :  { %456 = vadd.xlane.f32.xlu1 %v455_v15  ;;  %v804_v16 = vpop.permute.xlu0 %803 }
 0x281   :  { %v831_v18 = vsel %vm160_vm5, %v804_v16, 0.0 }
 0x282   :  { %832 = vadd.xlane.f32.xlu0 %v831_v18  ;;  %v600_v18 = vrot.slane %v7273_v4, %v7151_v38 }
 0x284   :  { %1408 = vadd.xlane.f32.xlu1 %v1407_v20  ;;  %v1392_v22 = vpop.permute.xlu0 %1391  ;;  %v7298_v20 = vsub.s32 4, %v7142_v35 }
 0x285   :  { %v1419_v33 = vsel %vm160_vm5, %v1392_v22, 0.0 }
 0x286   :  { %1411 = vadd.xlane.f32.xlu0 %v1410_v24  ;;  %v621_v22 = vrot.slane %v7273_v4, %v7298_v20 }
 0x288   :  { %1853 = vadd.xlane.f32.xlu1 %v1852_v21  ;;  %v808_v26 = vpop.permute.xlu0 %807 }
 0x289   :  { %v837_v56 = vsel %vm160_vm5, %v808_v26, 0.0  ;;  %v7308_v26 = vsub.s32 %v471_v25, %v7142_v35 }
 0x28a   :  { %1856 = vadd.xlane.f32.xlu0 %v1855_v27 }
 0x28b   :  { %v7250_v28 = vpop.xlane.xlu1 %441 }
 0x28c   :  { %823 = vadd.xlane.f32.xlu1 %v822_v30  ;;  %v1394_v31 = vpop.permute.xlu0 %1393  ;;  %v479_v27 = vrot.slane %v7250_v28, %v7308_v26 }
 0x28d   :  { %v1422_v48 = vsel %vm160_vm5, %v1394_v31, 0.0 }
 0x28e   :  { %1420 = vadd.xlane.f32.xlu0 %v1419_v33  ;;  %v475_v33 = vrot.slane %v7240_v10, %v7308_v26 }
 0x28f   :  { %v7254_v37 = vpop.xlane.xlu1 %444 }
 0x290   :  { %1414 = vadd.xlane.f32.xlu1 %v1413_v39  ;;  %v1396_v40 = vpop.permute.xlu0 %1395  ;;  %v483_v31 = vrot.slane %v7254_v37, %v7308_v26  ;;  %v505_v39 = vsel %vm504_vm6, %v479_v27, %v475_v33 }
 0x291   :  { %v1425_v55 = vsel %vm160_vm5, %v1396_v40, 0.0 }
 0x292   :  { %1865 = vadd.xlane.f32.xlu0 %v1864_v41  ;;  %v507_v41 = vsel %vm506_vm7, %v483_v31, %v505_v39 }
 0x293   :  { %v802_v42 = vpop.permute.xlu1 %801 }
 0x294   :  { %1859 = vadd.xlane.f32.xlu1 %v1858_v43  ;;  %v1841_v44 = vpop.permute.xlu0 %1840  ;;  %v828_v45 = vsel %vm160_vm5, %v802_v42, 0.0 }
 0x295   :  { %v1870_v0 = vsel %vm160_vm5, %v1841_v44, 0.0 }
 0x296   :  { %829 = vadd.xlane.f32.xlu0 %v828_v45 }
 0x297   :  { %v806_v47 = vpop.permute.xlu1 %805 }
 0x298   :  { %1423 = vadd.xlane.f32.xlu1 %v1422_v48  ;;  %v834_v52 = vsel %vm160_vm5, %v806_v47, 0.0  ;;  %v810_v53 = vpop.permute.xlu0 %809 }
 0x299   :  { %v840_v57 = vsel %vm160_vm5, %v810_v53, 0.0 }
 0x29a   :  { %835 = vadd.xlane.f32.xlu0 %v834_v52 }
 0x29b   :  { %v1390_v54 = vpop.permute.xlu1 %1389 }
 0x29c   :  { %1426 = vadd.xlane.f32.xlu1 %v1425_v55  ;;  %v1398_v58 = vpop.permute.xlu0 %1397  ;;  %v1416_v60 = vsel %vm160_vm5, %v1390_v54, 0.0 }
 0x29d   :  { %v1428_v61 = vsel %vm160_vm5, %v1398_v58, 0.0 }
 0x29e   :  { %838 = vadd.xlane.f32.xlu0 %v837_v56 }
 0x29f   :  { %v1835_v59 = vpop.permute.xlu1 %1834 }
 0x2a0   :  { %841 = vadd.xlane.f32.xlu1 %v840_v57  ;;  %v1861_v62 = vsel %vm160_vm5, %v1835_v59, 0.0 }
 0x2a2   :  { %1417 = vadd.xlane.f32.xlu0 %v1416_v60 }
 0x2a3   :  { %v1839_v63 = vpop.permute.xlu1 %1838 }
 0x2a4   :  { %1429 = vadd.xlane.f32.xlu1 %v1428_v61  ;;  %v1867_v1 = vsel %vm160_vm5, %v1839_v63, 0.0 }
 0x2a6   :  { %1862 = vadd.xlane.f32.xlu0 %v1861_v62 }
 0x2a8   :  { %1871 = vadd.xlane.f32.xlu1 %v1870_v0 }
 0x2aa   :  { %1868 = vadd.xlane.f32.xlu0 %v1867_v1 }
 0x2b9   :  { %595 = vbcast.lane.b32.xlu1 %v593_v5, 256 }
 0x2bd   :  { %609 = vbcast.lane.b32.xlu1 %v607_v8, 256 }
 0x2c1   :  { %616 = vbcast.lane.b32.xlu1 %v614_v12, 256 }
 0x2c5   :  { %630 = vbcast.lane.b32.xlu1 %v628_v14, 256  ;;  %v9549_v14 = vmov 0  }
 0x2c6   :  { %6725 = vset.pattern.permute.xlu1 %v9549_v14  ;;  %6724 = vset.pattern.permute.xlu0 %v9549_v14 }
 0x2cd   :  { %v7302_v24 = vpop.xlane.xlu0 %453 }
 0x2ce   :  { %v495_v47 = vrot.slane %v7302_v24, %v7308_v26 }
 0x2d1   :  { %v7305_v21 = vpop.xlane.xlu0 %459 }
 0x2d2   :  { %v503_v53 = vrot.slane %v7305_v21, %v7308_v26 }
 0x2d4   :  { %v7292_v15 = vpop.xlane.xlu1 %447 }
 0x2d5   :  { %v7312_v30 = vpop.xlane.xlu0 %820  ;;  %v487_v34 = vrot.slane %v7292_v15, %v7308_v26 }
 0x2d7   :  { %v509_v43 = vsel %vm508_vm8, %v487_v34, %v507_v41 }
 0x2d8   :  { %v1843_v16 = vpop.permute.xlu1 %1842 }
 0x2d9   :  { %v1873_v17 = vsel %vm160_vm5, %v1843_v16, 0.0  ;;  %v7327_v44 = vpop.xlane.xlu0 %826  ;;  %v854_v16 = vrot.slane %v7312_v30, %v7308_v26 }
 0x2da   :  { %1874 = vadd.xlane.f32.xlu0 %v1873_v17  ;;  %v862_v27 = vrot.slane %v7327_v44, %v7308_v26 }
 0x2f0   :  { %602 = vbcast.lane.b32.xlu0 %v600_v18, 256 }
 0x2f4   :  { %623 = vbcast.lane.b32.xlu0 %v621_v22, 256 }
 0x309   :  { %v7321_v40 = vpop.xlane.xlu1 %450 }
 0x30a   :  { %v491_v42 = vrot.slane %v7321_v40, %v7308_v26 }
 0x30c   :  { %v511_v45 = vsel %vm510_vm9, %v491_v42, %v509_v43 }
 0x30d   :  { %v7332_v48 = vpop.xlane.xlu1 %456  ;;  %v513_v55 = vsel %vm512_vm10, %v495_v47, %v511_v45 }
 0x30e   :  { %v499_v52 = vrot.slane %v7332_v48, %v7308_v26 }
 0x30f   :  { %v7338_v54 = vpop.xlane.xlu0 %832 }
 0x310   :  { %v515_v56 = vsel %vm514_vm11, %v499_v52, %v513_v55  ;;  %v870_v42 = vrot.slane %v7338_v54, %v7308_v26 }
 0x311   :  { %v7343_v57 = vpop.xlane.xlu1 %1408  ;;  %v517_v58 = vsel %vm516_vm12, %v503_v53, %v515_v56 }
 0x312   :  { %v519_v59 = vsel %vm461_vm13, %v517_v58, -1e+30  ;;  %v1442_v58 = vrot.slane %v7343_v57, %v7308_v26 }
 0x313   :  { %v7348_v60 = vpop.xlane.xlu0 %1411  ;;  %v521_v61 = vsel %vm520_vm14, %v519_v59, -inf }
 0x314   :  { %522 = vmax.xlane.f32.xlu0 %v521_v61  ;;  %v1446_v45 = vrot.slane %v7348_v60, %v7308_v26 }
 0x315   :  { %v7351_v62 = vpop.xlane.xlu1 %1853 }
 0x317   :  { %v7353_v63 = vpop.xlane.xlu0 %1856 }
 0x319   :  { %v7355_v0 = vpop.xlane.xlu1 %823 }
 0x31a   :  { %v858_v8 = vrot.slane %v7355_v0, %v7308_v26 }
 0x31b   :  { %v7357_v1 = vpop.xlane.xlu0 %1420 }
 0x31c   :  { %v883_v18 = vsel %vm504_vm6, %v858_v8, %v854_v16  ;;  %v1471_v16 = vsel %vm504_vm6, %v1446_v45, %v1442_v58 }
 0x31d   :  { %v7359_v3 = vpop.xlane.xlu1 %1414  ;;  %v884_v33 = vsel %vm506_vm7, %v862_v27, %v883_v18  ;;  %v1458_v27 = vrot.slane %v7357_v1, %v7308_v26 }
 0x31e   :  { %v1450_v53 = vrot.slane %v7359_v3, %v7308_v26 }
 0x31f   :  { %v7361_v5 = vpop.xlane.xlu0 %1865 }
 0x321   :  { %v7365_v12 = vpop.xlane.xlu1 %1859 }
 0x323   :  { %v7371_v17 = vpop.xlane.xlu0 %829 }
 0x324   :  { %v866_v22 = vrot.slane %v7371_v17, %v7308_v26 }
 0x325   :  { %v7376_v25 = vpop.xlane.xlu1 %1423 }
 0x326   :  { %v885_v34 = vsel %vm508_vm8, %v866_v22, %v884_v33  ;;  %v1472_v33 = vsel %vm506_vm7, %v1450_v53, %v1471_v16 }
 0x327   :  { %v7380_v31 = vpop.xlane.xlu0 %835  ;;  %v886_v52 = vsel %vm510_vm9, %v870_v42, %v885_v34  ;;  %v1462_v42 = vrot.slane %v7376_v25, %v7308_v26 }
 0x328   :  { %v874_v39 = vrot.slane %v7380_v31, %v7308_v26 }
 0x329   :  { %v7386_v41 = vpop.xlane.xlu1 %1426 }
 0x32a   :  { %v887_v56 = vsel %vm512_vm10, %v874_v39, %v886_v52  ;;  %v1466_v52 = vrot.slane %v7386_v41, %v7308_v26 }
 0x32b   :  { %v7390_v43 = vpop.xlane.xlu0 %838 }
 0x32c   :  { %v878_v47 = vrot.slane %v7390_v43, %v7308_v26 }
 0x32d   :  { %v7399_v55 = vpop.xlane.xlu1 %841 }
 0x32e   :  { %v882_v59 = vrot.slane %v7399_v55, %v7308_v26  ;;  %v888_v61 = vsel %vm514_vm11, %v878_v47, %v887_v56 }
 0x32f   :  { %v7407_v8 = vpop.xlane.xlu0 %1417 }
 0x330   :  { %v1454_v18 = vrot.slane %v7407_v8, %v7308_v26  ;;  %v889_v22 = vsel %vm516_vm12, %v882_v59, %v888_v61 }
 0x331   :  { %v7416_v34 = vpop.xlane.xlu1 %1429  ;;  %v891_v39 = vsel %vm461_vm13, %v889_v22, -1e+30  ;;  %v7436_v22 = vsub.s32 7, %v7142_v35 }
 0x332   :  { %v1473_v45 = vsel %vm508_vm8, %v1454_v18, %v1472_v33  ;;  %v892_v47 = vsel %vm520_vm14, %v891_v39, -inf  ;;  %v1470_v53 = vrot.slane %v7416_v34, %v7308_v26  ;;  %v1891_v39 = vrot.slane %v7353_v63, %v7308_v26 }
 0x333   :  { %893 = vmax.xlane.f32.xlu1 %v892_v47  ;;  %v1474_v56 = vsel %vm510_vm9, %v1458_v27, %v1473_v45  ;;  %v642_v27 = vrot.slane %v7273_v4, %v7436_v22  ;;  %v7440_v33 = vpop.xlane.xlu0 %1862  ;;  %v1887_v45 = vrot.slane %v7351_v62, %v7308_v26 }
 0x334   :  { %v1475_v58 = vsel %vm512_vm10, %v1462_v42, %v1474_v56  ;;  %v1895_v42 = vrot.slane %v7365_v12, %v7308_v26  ;;  %v1899_v47 = vrot.slane %v7440_v33, %v7308_v26 }
 0x335   :  { %v1476_v59 = vsel %vm514_vm11, %v1466_v52, %v1475_v58  ;;  %v1916_v56 = vsel %vm504_vm6, %v1891_v39, %v1887_v45 }
 0x336   :  { %v1477_v61 = vsel %vm516_vm12, %v1470_v53, %v1476_v59  ;;  %v1917_v53 = vsel %vm506_vm7, %v1895_v42, %v1916_v56 }
 0x337   :  { %v1479_v16 = vsel %vm461_vm13, %v1477_v61, -1e+30  ;;  %v7450_v52 = vpop.xlane.xlu0 %1868  ;;  %v1918_v58 = vsel %vm508_vm8, %v1899_v47, %v1917_v53  ;;  %v1903_v61 = vrot.slane %v7361_v5, %v7308_v26 }
 0x338   :  { %v1480_v18 = vsel %vm520_vm14, %v1479_v16, -inf  ;;  %v1907_v59 = vrot.slane %v7450_v52, %v7308_v26  ;;  %v7459_v16 = vpop.xlane.xlu1 %1871 }
 0x339   :  { %1481 = vmax.xlane.f32.xlu1 %v1480_v18  ;;  %v1919_v18 = vsel %vm510_vm9, %v1903_v61, %v1918_v58  ;;  %v1911_v2 = vrot.slane %v7459_v16, %v7308_v26  ;;  %v7475_v58 = vsub.s32 6, %v7142_v35 }
 0x34a   :  { %644 = vbcast.lane.b32.xlu1 %v642_v27, 256  ;;  %v1920_v27 = vsel %vm512_vm10, %v1907_v59, %v1919_v18  ;;  %v635_v59 = vrot.slane %v7273_v4, %v7475_v58  ;;  %v7493_v4 = vpop.permute.xlu1 %595 }
 0x34b   :  { %v1921_v45 = vsel %vm514_vm11, %v1911_v2, %v1920_v27 }
 0x34e   :  { %v7504_v23 = vpop.permute.xlu1 %609 }
 0x367   :  { %v7465_v39 = vpop.xlane.xlu0 %1874 }
 0x368   :  { %v1915_v42 = vrot.slane %v7465_v39, %v7308_v26 }
 0x36a   :  { %v1922_v47 = vsel %vm516_vm12, %v1915_v42, %v1921_v45 }
 0x36b   :  { %v1924_v56 = vsel %vm461_vm13, %v1922_v47, -1e+30  ;;  %v7479_v61 = vpop.permute.xlu0 %602 }
 0x36c   :  { %v1925_v53 = vsel %vm520_vm14, %v1924_v56, -inf }
 0x36d   :  { %1926 = vmax.xlane.f32.xlu0 %v1925_v53 }
 0x36f   :  { %v7481_v18 = vpop.permute.xlu0 %623 }
 0x383   :  { %637 = vbcast.lane.b32.xlu0 %v635_v59, 256 }
 0x3a1   :  { %v7483_v2 = vpop.xlane.xlu0 %522 }
 0x3a2   :  { %v532_v27 = vrot.slane %v7483_v2, %v7151_v38  ;;  %v528_v42 = vrot.slane %v7483_v2, %v7145_v36  ;;  %v536_v35 = vrot.slane %v7483_v2, %v7278_v7  ;;  %v548_v45 = vrot.slane %v7483_v2, %v7288_v13 }
 0x3a3   :  { %v540_v47 = vrot.slane %v7483_v2, %v7283_v9  ;;  %v544_v14 = vrot.slane %v7483_v2, %v7298_v20 }
 0x3a4   :  { %v566_v56 = vsub.f32 %v7250_v28, %v532_v27  ;;  %v565_v53 = vsub.f32 %v7240_v10, %v528_v42  ;;  %v567_v59 = vsub.f32 %v7254_v37, %v536_v35  ;;  %v570_v6 = vsub.f32 %v7302_v24, %v548_v45  ;;  %v7507_v24 = vpop.permute.xlu1 %616 }
 0x3a5   :  { %v568_v32 = vsub.f32 %v7292_v15, %v540_v47  ;;  %v569_v10 = vsub.f32 %v7321_v40, %v544_v14 }
 0x3a6   :  { %v575_v46 = vmul.f32 1.442695, %v566_v56  ;;  %v573_v50 = vmul.f32 1.442695, %v565_v53  ;;  %v577_v49 = vmul.f32 1.442695, %v567_v59 }
 0x3a7   :  { %v583_v29 = vmul.f32 1.442695, %v570_v6  ;;  %v579_v28 = vmul.f32 1.442695, %v568_v32  ;;  %v581_v37 = vmul.f32 1.442695, %v569_v10  ;;  %v556_v32 = vrot.slane %v7483_v2, %v7436_v22 }
 0x3a8   :  { %6726 = vpow2.f32 %v575_v46 }
 0x3a9   :  { %6728 = vpow2.f32 %v573_v50  ;;  %v7517_v50 = vpop.permute.xlu1 %630  ;;  %v572_v14 = vsub.f32 %v7305_v21, %v556_v32 }
 0x3aa   :  { %6730 = vpow2.f32 %v577_v49 }
 0x3ab   :  { %6732 = vpow2.f32 %v583_v29  ;;  %v587_v56 = vmul.f32 1.442695, %v572_v14 }
 0x3ac   :  { %6734 = vpow2.f32 %v579_v28 }
 0x3ad   :  { %6736 = vpow2.f32 %v581_v37 }
 0x3ae   :  { %6738 = vpow2.f32 %v587_v56 }
 0x3b2   :  { %v6727_v27 = vpop.eup %6726 }
 0x3b3   :  { %v6729_v42 = vpop.eup %6728  ;;  %v7510_v35 = vmul.f32 %v6727_v27, %v7479_v61 }
 0x3b4   :  { %v6731_v6 = vpop.eup %6730  ;;  %v7513_v46 = vmul.f32 %v6729_v42, %v7493_v4 }
 0x3b5   :  { %v6733_v49 = vpop.eup %6732  ;;  %674 = vperm.xlu1 %6725, %v7510_v35   ;;  %v7522_v29 = vmul.f32 %v6731_v6, %v7504_v23 }
 0x3b6   :  { %671 = vperm.xlu0 %6724, %v7513_v46   ;;  %v6735_v15 = vpop.eup %6734  ;;  %v7525_v40 = vmul.f32 %v6733_v49, %v7517_v50 }
 0x3b7   :  { %v7531_v45 = vmul.f32 %v6735_v15, %v7507_v24  ;;  %v6737_v47 = vpop.eup %6736 }
 0x3b8   :  { %v7535_v53 = vmul.f32 %v6737_v47, %v7481_v18 }
 0x3b9   :  { %677 = vperm.xlu1 %6725, %v7522_v29  }
 0x3ba   :  { %686 = vperm.xlu0 %6724, %v7525_v40  }
 0x3bd   :  { %680 = vperm.xlu1 %6725, %v7531_v45  }
 0x3c0   :  { %v7537_v59 = vpop.xlane.xlu1 %893 }
 0x3c1   :  { %683 = vperm.xlu1 %6725, %v7535_v53   ;;  %v899_v21 = vrot.slane %v7537_v59, %v7145_v36  ;;  %v911_v28 = vrot.slane %v7537_v59, %v7283_v9  ;;  %v915_v10 = vrot.slane %v7537_v59, %v7298_v20  ;;  %v919_v49 = vrot.slane %v7537_v59, %v7288_v13 }
 0x3c3   :  { %v936_v37 = vsub.f32 %v7312_v30, %v899_v21  ;;  %v939_v27 = vsub.f32 %v7371_v17, %v911_v28  ;;  %v940_v32 = vsub.f32 %v7338_v54, %v915_v10  ;;  %v941_v47 = vsub.f32 %v7380_v31, %v919_v49  ;;  %v6739_v30 = vpop.eup %6738 }
 0x3c5   :  { %v944_v42 = vmul.f32 1.442695, %v936_v37  ;;  %v950_v6 = vmul.f32 1.442695, %v939_v27  ;;  %v952_v14 = vmul.f32 1.442695, %v940_v32 }
 0x3c6   :  { %v7551_v15 = vpop.xlane.xlu1 %1481  ;;  %v954_v54 = vmul.f32 1.442695, %v941_v47 }
 0x3c7   :  { %6740 = vpow2.f32 %v944_v42  ;;  %v1491_v56 = vrot.slane %v7551_v15, %v7151_v38 }
 0x3c8   :  { %6742 = vpow2.f32 %v950_v6 }
 0x3c9   :  { %6744 = vpow2.f32 %v952_v14  ;;  %v1525_v28 = vsub.f32 %v7348_v60, %v1491_v56  ;;  %v552_v56 = vrot.slane %v7483_v2, %v7475_v58 }
 0x3ca   :  { %v7556_v21 = vpop.permute.xlu1 %644  ;;  %6746 = vpow2.f32 %v954_v54  ;;  %v903_v54 = vrot.slane %v7537_v59, %v7151_v38 }
 0x3cb   :  { %v7559_v17 = vmul.f32 %v6739_v30, %v7556_v21  ;;  %v1534_v37 = vmul.f32 1.442695, %v1525_v28  ;;  %v923_v30 = vrot.slane %v7537_v59, %v7475_v58  ;;  %v1499_v28 = vrot.slane %v7551_v15, %v7283_v9 }
 0x3cd   :  { %692 = vperm.xlu0 %6724, %v7559_v17   ;;  %6748 = vpow2.f32 %v1534_v37  ;;  %v942_v37 = vsub.f32 %v7390_v43, %v923_v30  ;;  %v1527_v2 = vsub.f32 %v7407_v8, %v1499_v28  ;;  %v1503_v8 = vrot.slane %v7551_v15, %v7298_v20 }
 0x3cf   :  { %v1538_v51 = vmul.f32 1.442695, %v1527_v2  ;;  %v1528_v28 = vsub.f32 %v7357_v1, %v1503_v8 }
 0x3d1   :  { %v6741_v10 = vpop.eup %6740 }
 0x3d2   :  { %v7564_v31 = vmul.f32 %v6741_v10, %v7493_v4  ;;  %v6743_v27 = vpop.eup %6742  ;;  %v571_v10 = vsub.f32 %v7332_v48, %v552_v56  ;;  %v1495_v48 = vrot.slane %v7551_v15, %v7278_v7 }
 0x3d3   :  { %v7568_v42 = vmul.f32 %v6743_v27, %v7507_v24  ;;  %v6745_v6 = vpop.eup %6744  ;;  %v937_v27 = vsub.f32 %v7355_v0, %v903_v54 }
 0x3d4   :  { %977 = vperm.xlu0 %6724, %v7564_v31   ;;  %v7572_v32 = vmul.f32 %v6745_v6, %v7481_v18  ;;  %v6747_v60 = vpop.eup %6746  ;;  %v907_v6 = vrot.slane %v7537_v59, %v7278_v7  ;;  %v1526_v56 = vsub.f32 %v7359_v3, %v1495_v48 }
 0x3d5   :  { %v7576_v49 = vmul.f32 %v6747_v60, %v7517_v50  ;;  %v585_v60 = vmul.f32 1.442695, %v571_v10  ;;  %v946_v19 = vmul.f32 1.442695, %v937_v27 }
 0x3d6   :  { %v938_v11 = vsub.f32 %v7327_v44, %v907_v6  ;;  %v927_v44 = vrot.slane %v7537_v59, %v7436_v22  ;;  %v1540_v59 = vmul.f32 1.442695, %v1528_v28 }
 0x3d7   :  { %v6749_v14 = vpop.eup %6748  ;;  %6750 = vpow2.f32 %v585_v60 }
 0x3d8   :  { %986 = vperm.xlu0 %6724, %v7568_v42   ;;  %v7580_v47 = vmul.f32 %v6749_v14, %v7479_v61  ;;  %v956_v14 = vmul.f32 1.442695, %v942_v37  ;;  %v948_v0 = vmul.f32 1.442695, %v938_v11  ;;  %v943_v3 = vsub.f32 %v7399_v55, %v927_v44 }
 0x3da   :  { %9583 = vst [vmem:[#allocation14_spill] sm:$0xff] %v7580_v47  ;;  %6752 = vpow2.f32 %v956_v14  ;;  %v958_v48 = vmul.f32 1.442695, %v943_v3 }
 0x3db   :  { %6754 = vpow2.f32 %v946_v19 }
 0x3dc   :  { %989 = vperm.xlu0 %6724, %v7572_v32   ;;  %6756 = vpow2.f32 %v1538_v51  ;;  %v1536_v51 = vmul.f32 1.442695, %v1526_v56 }
 0x3dd   :  { %6758 = vpow2.f32 %v948_v0 }
 0x3e0   :  { %992 = vperm.xlu0 %6724, %v7576_v49  }
 0x3e4   :  { %1568 = vperm.xlu0 %6724, %v7580_v47   ;;  %v1487_v47 = vrot.slane %v7551_v15, %v7145_v36 }
 0x3e6   :  { %v1524_v43 = vsub.f32 %v7343_v57, %v1487_v47  ;;  %v6751_v57 = vpop.eup %6750 }
 0x3e7   :  { %v6753_v10 = vpop.eup %6752 }
 0x3e8   :  { %v1532_v54 = vmul.f32 1.442695, %v1524_v43  ;;  %v6755_v6 = vpop.eup %6754 }
 0x3e9   :  { %v6757_v14 = vpop.eup %6756  ;;  %v7633_v0 = vmul.f32 %v6755_v6, %v7479_v61 }
 0x3ea   :  { %6760 = vpow2.f32 %v1532_v54  ;;  %v6759_v56 = vpop.eup %6758 }
 0x3eb   :  { %6762 = vpow2.f32 %v1536_v51 }
 0x3f4   :  { %v6761_v3 = vpop.eup %6760 }
 0x3f5   :  { %v7658_v6 = vmul.f32 %v6761_v3, %v7493_v4 }
 0x3fa   :  { %v7608_v30 = vpop.xlane.xlu0 %1926 }
 0x3fb   :  { %v1936_v11 = vrot.slane %v7608_v30, %v7151_v38  ;;  %v1944_v19 = vrot.slane %v7608_v30, %v7283_v9  ;;  %v1932_v1 = vrot.slane %v7608_v30, %v7145_v36  ;;  %v1948_v27 = vrot.slane %v7608_v30, %v7298_v20 }
 0x3fc   :  { %v1940_v8 = vrot.slane %v7608_v30, %v7278_v7  ;;  %v1952_v28 = vrot.slane %v7608_v30, %v7288_v13 }
 0x3fd   :  { %v1970_v47 = vsub.f32 %v7353_v63, %v1936_v11  ;;  %v1972_v55 = vsub.f32 %v7440_v33, %v1944_v19  ;;  %v1969_v43 = vsub.f32 %v7351_v62, %v1932_v1  ;;  %v7639_v33 = vmul.f32 %v6757_v14, %v7507_v24 }
 0x3fe   :  { %v7617_v37 = vpop.permute.xlu0 %637  ;;  %v1973_v54 = vsub.f32 %v7361_v5, %v1948_v27  ;;  %v1507_v62 = vrot.slane %v7551_v15, %v7288_v13  ;;  %v7649_v11 = vmul.f32 %v6759_v56, %v7504_v23  ;;  %v1971_v51 = vsub.f32 %v7365_v12, %v1940_v8 }
 0x3ff   :  { %v7624_v2 = vmul.f32 %v6751_v57, %v7617_v37  ;;  %v7627_v60 = vmul.f32 %v6753_v10, %v7617_v37  ;;  %v1979_v63 = vmul.f32 1.442695, %v1970_v47  ;;  %v1983_v44 = vmul.f32 1.442695, %v1972_v55  ;;  %v6763_v10 = vpop.eup %6762 }
 0x400   :  { %v1977_v19 = vmul.f32 1.442695, %v1969_v43  ;;  %v1985_v57 = vmul.f32 1.442695, %v1973_v54  ;;  %v1974_v5 = vsub.f32 %v7450_v52, %v1952_v28  ;;  %v1960_v47 = vrot.slane %v7608_v30, %v7436_v22 }
 0x401   :  { %689 = vperm.xlu1 %6725, %v7624_v2   ;;  %995 = vperm.xlu0 %6724, %v7627_v60   ;;  %6764 = vpow2.f32 %v1979_v63  ;;  %v1529_v1 = vsub.f32 %v7376_v25, %v1507_v62  ;;  %v1511_v14 = vrot.slane %v7551_v15, %v7475_v58  ;;  %v7671_v43 = vmul.f32 %v6763_v10, %v7504_v23 }
 0x402   :  { %6766 = vpow2.f32 %v1540_v59  ;;  %v1981_v59 = vmul.f32 1.442695, %v1971_v51  ;;  %v1987_v12 = vmul.f32 1.442695, %v1974_v5  ;;  %v1976_v63 = vsub.f32 %v7465_v39, %v1960_v47 }
 0x403   :  { %6768 = vpow2.f32 %v958_v48  ;;  %v1542_v25 = vmul.f32 1.442695, %v1529_v1  ;;  %v1515_v48 = vrot.slane %v7551_v15, %v7436_v22  ;;  %v1530_v56 = vsub.f32 %v7386_v41, %v1511_v14 }
 0x404   :  { %6770 = vpow2.f32 %v1983_v44  ;;  %v1991_v39 = vmul.f32 1.442695, %v1976_v63  ;;  %v1956_v15 = vrot.slane %v7608_v30, %v7475_v58 }
 0x405   :  { %980 = vperm.xlu1 %6725, %v7633_v0   ;;  %1574 = vperm.xlu0 %6724, %v7639_v33   ;;  %6772 = vpow2.f32 %v1977_v19  ;;  %v1531_v54 = vsub.f32 %v7416_v34, %v1515_v48  ;;  %v1544_v41 = vmul.f32 1.442695, %v1530_v56 }
 0x406   :  { %6774 = vpow2.f32 %v1985_v57  ;;  %v1975_v34 = vsub.f32 %v7459_v16, %v1956_v15 }
 0x407   :  { %6776 = vpow2.f32 %v1981_v59  ;;  %v1546_v57 = vmul.f32 1.442695, %v1531_v54 }
 0x408   :  { %6778 = vpow2.f32 %v1987_v12 }
 0x409   :  { %983 = vperm.xlu1 %6725, %v7649_v11   ;;  %6780 = vpow2.f32 %v1542_v25 }
 0x40a   :  { %6782 = vpow2.f32 %v1991_v39 }
 0x40b   :  { %v6765_v27 = vpop.eup %6764  ;;  %6784 = vpow2.f32 %v1544_v41 }
 0x40c   :  { %v6767_v52 = vpop.eup %6766  ;;  %v7662_v55 = vmul.f32 %v6765_v27, %v7479_v61  ;;  %6786 = vpow2.f32 %v1546_v57 }
 0x40d   :  { %1565 = vperm.xlu1 %6725, %v7658_v6   ;;  %v6769_v8 = vpop.eup %6768  ;;  %v7674_v61 = vmul.f32 %v6767_v52, %v7481_v18 }
 0x40e   :  { %2013 = vperm.xlu0 %6724, %v7662_v55   ;;  %v6771_v44 = vpop.eup %6770  ;;  %v7683_v28 = vmul.f32 %v6769_v8, %v7556_v21 }
 0x40f   :  { %v6773_v62 = vpop.eup %6772  ;;  %v7686_v19 = vmul.f32 %v6771_v44, %v7507_v24  ;;  %v1989_v24 = vmul.f32 1.442695, %v1975_v34 }
 0x410   :  { %v6775_v51 = vpop.eup %6774  ;;  %v7692_v5 = vmul.f32 %v6773_v62, %v7493_v4 }
 0x411   :  { %1571 = vperm.xlu1 %6725, %v7671_v43   ;;  %v6777_v30 = vpop.eup %6776  ;;  %v7695_v47 = vmul.f32 %v6775_v51, %v7481_v18  ;;  %6788 = vpow2.f32 %v1989_v24 }
 0x412   :  { %1577 = vperm.xlu0 %6724, %v7674_v61   ;;  %v6779_v3 = vpop.eup %6778  ;;  %v7700_v10 = vmul.f32 %v6777_v30, %v7504_v23 }
 0x413   :  { %v6781_v59 = vpop.eup %6780  ;;  %v7703_v16 = vmul.f32 %v6779_v3, %v7517_v50 }
 0x414   :  { %v6783_v4 = vpop.eup %6782  ;;  %v7708_v18 = vmul.f32 %v6781_v59, %v7517_v50 }
 0x415   :  { %998 = vperm.xlu1 %6725, %v7683_v28   ;;  %v7711_v1 = vmul.f32 %v6783_v4, %v7556_v21  ;;  %v6785_v23 = vpop.eup %6784 }
 0x416   :  { %2019 = vperm.xlu0 %6724, %v7686_v19   ;;  %v7716_v27 = vmul.f32 %v6785_v23, %v7617_v37  ;;  %v6787_v12 = vpop.eup %6786 }
 0x417   :  { %v7720_v63 = vmul.f32 %v6787_v12, %v7556_v21 }
 0x419   :  { %2010 = vperm.xlu1 %6725, %v7692_v5  }
 0x41a   :  { %2022 = vperm.xlu0 %6724, %v7695_v47  }
 0x41b   :  { %v6789_v52 = vpop.eup %6788 }
 0x41c   :  { %v7724_v50 = vmul.f32 %v6789_v52, %v7617_v37 }
 0x41d   :  { %2016 = vperm.xlu1 %6725, %v7700_v10  }
 0x41e   :  { %2025 = vperm.xlu0 %6724, %v7703_v16  }
 0x421   :  { %1580 = vperm.xlu1 %6725, %v7708_v18  }
 0x422   :  { %2031 = vperm.xlu0 %6724, %v7711_v1  }
 0x425   :  { %1583 = vperm.xlu1 %6725, %v7716_v27  }
 0x429   :  { %1586 = vperm.xlu1 %6725, %v7720_v63  }
 0x42d   :  { %2028 = vperm.xlu1 %6725, %v7724_v50  }
 0x434   :  { %v675_v39 = vpop.permute.xlu1 %674 }
 0x435   :  { %v672_v14 = vpop.permute.xlu0 %671  ;;  %v701_v21 = vrot.slane %v675_v39, %v7308_v26 }
 0x436   :  { %v697_v62 = vrot.slane %v672_v14, %v7308_v26 }
 0x438   :  { %v678_v56 = vpop.permute.xlu1 %677  ;;  %v726_v30 = vsel %vm504_vm6, %v701_v21, %v697_v62 }
 0x439   :  { %v687_v25 = vpop.permute.xlu0 %686  ;;  %v705_v51 = vrot.slane %v678_v56, %v7308_v26 }
 0x43a   :  { %v717_v23 = vrot.slane %v687_v25, %v7308_v26 }
 0x43b   :  { %v727_v3 = vsel %vm506_vm7, %v705_v51, %v726_v30 }
 0x43c   :  { %v681_v54 = vpop.permute.xlu1 %680 }
 0x43d   :  { %v709_v57 = vrot.slane %v681_v54, %v7308_v26 }
 0x43f   :  { %v728_v24 = vsel %vm508_vm8, %v709_v57, %v727_v3 }
 0x440   :  { %v684_v41 = vpop.permute.xlu1 %683 }
 0x441   :  { %v713_v34 = vrot.slane %v684_v41, %v7308_v26 }
 0x443   :  { %v729_v59 = vsel %vm510_vm9, %v713_v34, %v728_v24 }
 0x444   :  { %v730_v39 = vsel %vm512_vm10, %v717_v23, %v729_v59 }
 0x44c   :  { %v693_v48 = vpop.permute.xlu0 %692 }
 0x44d   :  { %v725_v14 = vrot.slane %v693_v48, %v7308_v26 }
 0x453   :  { %v978_v8 = vpop.permute.xlu0 %977 }
 0x454   :  { %v1003_v25 = vrot.slane %v978_v8, %v7308_v26 }
 0x457   :  { %v987_v44 = vpop.permute.xlu0 %986 }
 0x458   :  { %v1015_v3 = vrot.slane %v987_v44, %v7308_v26 }
 0x45b   :  { %v990_v15 = vpop.permute.xlu0 %989 }
 0x45f   :  { %v993_v37 = vpop.permute.xlu0 %992 }
 0x460   :  { %v1023_v8 = vrot.slane %v993_v37, %v7308_v26 }
 0x463   :  { %v1569_v4 = vpop.permute.xlu0 %1568 }
 0x480   :  { %v690_v12 = vpop.permute.xlu1 %689  ;;  %v996_v56 = vpop.permute.xlu0 %995 }
 0x481   :  { %v721_v52 = vrot.slane %v690_v12, %v7308_v26 }
 0x483   :  { %v731_v54 = vsel %vm514_vm11, %v721_v52, %v730_v39  ;;  %v1019_v52 = vrot.slane %v990_v15, %v7308_v26 }
 0x484   :  { %v981_v21 = vpop.permute.xlu1 %980  ;;  %v732_v62 = vsel %vm516_vm12, %v725_v14, %v731_v54  ;;  %v1575_v34 = vpop.permute.xlu0 %1574 }
 0x485   :  { %v734_v41 = vsel %vm520_vm14, %v732_v62, 0.0  ;;  %v1007_v51 = vrot.slane %v981_v21, %v7308_v26  ;;  %v1027_v62 = vrot.slane %v996_v56, %v7308_v26 }
 0x486   :  { %735 = vadd.xlane.f32.xlu0 %v734_v41 }
 0x487   :  { %v1032_v48 = vsel %vm504_vm6, %v1007_v51, %v1003_v25 }
 0x488   :  { %v984_v57 = vpop.permute.xlu1 %983 }
 0x489   :  { %v1011_v30 = vrot.slane %v984_v57, %v7308_v26 }
 0x48b   :  { %v1033_v24 = vsel %vm506_vm7, %v1011_v30, %v1032_v48 }
 0x48c   :  { %v1566_v59 = vpop.permute.xlu1 %1565  ;;  %v1034_v23 = vsel %vm508_vm8, %v1015_v3, %v1033_v24  ;;  %v1595_v24 = vrot.slane %v1569_v4, %v7308_v26 }
 0x48d   :  { %v2014_v12 = vpop.permute.xlu0 %2013  ;;  %v1035_v39 = vsel %vm510_vm9, %v1019_v52, %v1034_v23  ;;  %v1591_v37 = vrot.slane %v1566_v59, %v7308_v26 }
 0x48e   :  { %v1036_v21 = vsel %vm512_vm10, %v1023_v8, %v1035_v39 }
 0x48f   :  { %v1037_v51 = vsel %vm514_vm11, %v1027_v62, %v1036_v21  ;;  %v1620_v39 = vsel %vm504_vm6, %v1595_v24, %v1591_v37  ;;  %v2040_v21 = vrot.slane %v2014_v12, %v7308_v26 }
 0x490   :  { %v1572_v14 = vpop.permute.xlu1 %1571 }
 0x491   :  { %v1578_v54 = vpop.permute.xlu0 %1577  ;;  %v1599_v3 = vrot.slane %v1572_v14, %v7308_v26 }
 0x492   :  { %v1607_v59 = vrot.slane %v1578_v54, %v7308_v26 }
 0x493   :  { %v1621_v62 = vsel %vm506_vm7, %v1599_v3, %v1620_v39 }
 0x494   :  { %v999_v41 = vpop.permute.xlu1 %998 }
 0x495   :  { %v1031_v44 = vrot.slane %v999_v41, %v7308_v26  ;;  %v2020_v30 = vpop.permute.xlu0 %2019  ;;  %v1603_v41 = vrot.slane %v1575_v34, %v7308_v26 }
 0x497   :  { %v1038_v25 = vsel %vm516_vm12, %v1031_v44, %v1037_v51  ;;  %v1622_v4 = vsel %vm508_vm8, %v1603_v41, %v1621_v62 }
 0x498   :  { %v2011_v57 = vpop.permute.xlu1 %2010  ;;  %v1040_v15 = vsel %vm520_vm14, %v1038_v25, 0.0 }
 0x499   :  { %1041 = vadd.xlane.f32.xlu1 %v1040_v15  ;;  %v2023_v56 = vpop.permute.xlu0 %2022  ;;  %v2036_v23 = vrot.slane %v2011_v57, %v7308_v26  ;;  %v2048_v15 = vrot.slane %v2020_v30, %v7308_v26 }
 0x49a   :  { %v2052_v54 = vrot.slane %v2023_v56, %v7308_v26 }
 0x49b   :  { %v2065_v14 = vsel %vm504_vm6, %v2040_v21, %v2036_v23 }
 0x49c   :  { %v2017_v48 = vpop.permute.xlu1 %2016 }
 0x49d   :  { %v2044_v8 = vrot.slane %v2017_v48, %v7308_v26  ;;  %v2026_v25 = vpop.permute.xlu0 %2025  ;;  %v1623_v48 = vsel %vm510_vm9, %v1607_v59, %v1622_v4 }
 0x49f   :  { %v2066_v51 = vsel %vm506_vm7, %v2044_v8, %v2065_v14  ;;  %v2056_v8 = vrot.slane %v2026_v25, %v7308_v26 }
 0x4a0   :  { %v1581_v52 = vpop.permute.xlu1 %1580  ;;  %v2067_v34 = vsel %vm508_vm8, %v2048_v15, %v2066_v51 }
 0x4a1   :  { %v1611_v57 = vrot.slane %v1581_v52, %v7308_v26  ;;  %v2068_v39 = vsel %vm510_vm9, %v2052_v54, %v2067_v34  ;;  %v2032_v52 = vpop.permute.xlu0 %2031 }
 0x4a2   :  { %v2069_v56 = vsel %vm512_vm10, %v2056_v8, %v2068_v39  ;;  %v2064_v59 = vrot.slane %v2032_v52, %v7308_v26 }
 0x4a3   :  { %v1624_v3 = vsel %vm512_vm10, %v1611_v57, %v1623_v48 }
 0x4a4   :  { %v1584_v44 = vpop.permute.xlu1 %1583 }
 0x4a5   :  { %v1615_v12 = vrot.slane %v1584_v44, %v7308_v26 }
 0x4a7   :  { %v1625_v23 = vsel %vm514_vm11, %v1615_v12, %v1624_v3 }
 0x4a8   :  { %v1587_v37 = vpop.permute.xlu1 %1586 }
 0x4a9   :  { %v1619_v24 = vrot.slane %v1587_v37, %v7308_v26 }
 0x4ab   :  { %v1626_v30 = vsel %vm516_vm12, %v1619_v24, %v1625_v23 }
 0x4ac   :  { %v2029_v21 = vpop.permute.xlu1 %2028  ;;  %v1628_v62 = vsel %vm520_vm14, %v1626_v30, 0.0 }
 0x4ad   :  { %v2060_v41 = vrot.slane %v2029_v21, %v7308_v26  ;;  %1629 = vadd.xlane.f32.xlu0 %v1628_v62 }
 0x4af   :  { %v2070_v14 = vsel %vm514_vm11, %v2060_v41, %v2069_v56 }
 0x4b0   :  { %v2071_v44 = vsel %vm516_vm12, %v2064_v59, %v2070_v14 }
 0x4b1   :  { %v2073_v4 = vsel %vm520_vm14, %v2071_v44, 0.0 }
 0x4b2   :  { %2074 = vadd.xlane.f32.xlu1 %v2073_v4 }
 0x513   :  { %v736_v51 = vpop.xlane.xlu0 %735 }
 0x514   :  { %6790 = vrcp.f32 %v736_v51 }
 0x51e   :  { %v6791_v25 = vpop.eup %6790 }
 0x51f   :  { %v746_v57 = vrot.slane %v6791_v25, %v7151_v38  ;;  %v742_v15 = vrot.slane %v6791_v25, %v7145_v36  ;;  %v750_v34 = vrot.slane %v6791_v25, %v7278_v7  ;;  %v762_v37 = vrot.slane %v6791_v25, %v7288_v13 }
 0x520   :  { %v754_v24 = vrot.slane %v6791_v25, %v7283_v9  ;;  %v766_v23 = vrot.slane %v6791_v25, %v7475_v58  ;;  %v758_v52 = vrot.slane %v6791_v25, %v7298_v20 }
 0x521   :  { %v780_v12 = vmul.f32 %v746_v57, %v7510_v35  ;;  %v779_v48 = vmul.f32 %v742_v15, %v7513_v46  ;;  %v781_v54 = vmul.f32 %v750_v34, %v7522_v29  ;;  %v784_v3 = vmul.f32 %v762_v37, %v7525_v40 }
 0x522   :  { %v782_v35 = vmul.f32 %v754_v24, %v7531_v45  ;;  %v785_v46 = vmul.f32 %v766_v23, %v7624_v2  ;;  %v783_v29 = vmul.f32 %v758_v52, %v7535_v53  ;;  %v770_v40 = vrot.slane %v6791_v25, %v7436_v22 }
 0x523   :  { %1252 = vperm.xlu0 %6724, %v780_v12   ;;  %1249 = vperm.xlu1 %6725, %v779_v48  }
 0x524   :  { %v786_v8 = vmul.f32 %v770_v40, %v7559_v17 }
 0x526   :  { %v1042_v39 = vpop.xlane.xlu1 %1041 }
 0x527   :  { %6792 = vrcp.f32 %v1042_v39  ;;  %1255 = vperm.xlu0 %6724, %v781_v54   ;;  %1264 = vperm.xlu1 %6725, %v784_v3  }
 0x52b   :  { %1258 = vperm.xlu0 %6724, %v782_v35   ;;  %1267 = vperm.xlu1 %6725, %v785_v46  }
 0x52f   :  { %1261 = vperm.xlu0 %6724, %v783_v29  }
 0x531   :  { %v6793_v30 = vpop.eup %6792 }
 0x532   :  { %v1052_v21 = vrot.slane %v6793_v30, %v7151_v38  ;;  %v1048_v62 = vrot.slane %v6793_v30, %v7145_v36  ;;  %v1056_v41 = vrot.slane %v6793_v30, %v7278_v7  ;;  %v1060_v56 = vrot.slane %v6793_v30, %v7283_v9 }
 0x533   :  { %1270 = vperm.xlu0 %6724, %v786_v8   ;;  %v1064_v59 = vrot.slane %v6793_v30, %v7298_v20  ;;  %v1076_v12 = vrot.slane %v6793_v30, %v7436_v22 }
 0x534   :  { %v1086_v45 = vmul.f32 %v1052_v21, %v7633_v0  ;;  %v1085_v2 = vmul.f32 %v1048_v62, %v7564_v31  ;;  %v1087_v53 = vmul.f32 %v1056_v41, %v7649_v11  ;;  %v1088_v17 = vmul.f32 %v1060_v56, %v7568_v42  ;;  %v9584_v42 = vld [vmem:[#allocation14_spill] sm:$0xff] }
 0x535   :  { %v1089_v0 = vmul.f32 %v1064_v59, %v7572_v32  ;;  %v1068_v31 = vrot.slane %v6793_v30, %v7288_v13  ;;  %v1072_v32 = vrot.slane %v6793_v30, %v7475_v58  ;;  %v1092_v48 = vmul.f32 %v1076_v12, %v7683_v28 }
 0x536   :  { %1105 = vperm.xlu1 %6725, %v1086_v45   ;;  %v237_v45 = vld [vmem:[%s9540_s8] sm:$0xff] }
 0x537   :  { %1102 = vperm.xlu0 %6724, %v1085_v2   ;;  %v1090_v4 = vmul.f32 %v1068_v31, %v7576_v49  ;;  %v1091_v49 = vmul.f32 %v1072_v32, %v7627_v60  ;;  %vm2281_vm15 = vcmp.gt.f32.partialorder %v237_v45, 0.0 }
 0x53a   :  { %1108 = vperm.xlu1 %6725, %v1087_v53   ;;  %v1630_v14 = vpop.xlane.xlu0 %1629 }
 0x53b   :  { %6794 = vrcp.f32 %v1630_v14  ;;  %1111 = vperm.xlu0 %6724, %v1088_v17  }
 0x53e   :  { %1114 = vperm.xlu1 %6725, %v1089_v0  }
 0x53f   :  { %v2075_v44 = vpop.xlane.xlu1 %2074 }
 0x540   :  { %6796 = vrcp.f32 %v2075_v44 }
 0x542   :  { %1117 = vperm.xlu1 %6725, %v1090_v4  }
 0x545   :  { %v6795_v51 = vpop.eup %6794 }
 0x546   :  { %v1640_v11 = vrot.slane %v6795_v51, %v7151_v38  ;;  %v1636_v25 = vrot.slane %v6795_v51, %v7145_v36  ;;  %v1648_v34 = vrot.slane %v6795_v51, %v7283_v9  ;;  %v1644_v37 = vrot.slane %v6795_v51, %v7278_v7 }
 0x547   :  { %v1652_v39 = vrot.slane %v6795_v51, %v7298_v20  ;;  %v1656_v52 = vrot.slane %v6795_v51, %v7288_v13  ;;  %v1660_v40 = vrot.slane %v6795_v51, %v7475_v58  ;;  %v1664_v8 = vrot.slane %v6795_v51, %v7436_v22 }
 0x548   :  { %v1674_v57 = vmul.f32 %v1640_v11, %v9584_v42  ;;  %v1673_v15 = vmul.f32 %v1636_v25, %v7658_v6  ;;  %v1676_v3 = vmul.f32 %v1648_v34, %v7639_v33  ;;  %v1675_v6 = vmul.f32 %v1644_v37, %v7671_v43 }
 0x549   :  { %v1677_v33 = vmul.f32 %v1652_v39, %v7674_v61 }
 0x54a   :  { %1693 = vperm.xlu0 %6724, %v1674_v57   ;;  %1690 = vperm.xlu1 %6725, %v1673_v15   ;;  %v6797_v54 = vpop.eup %6796 }
 0x54b   :  { %v2085_v24 = vrot.slane %v6797_v54, %v7151_v38  ;;  %v2081_v23 = vrot.slane %v6797_v54, %v7145_v36  ;;  %v2089_v35 = vrot.slane %v6797_v54, %v7278_v7  ;;  %v2093_v46 = vrot.slane %v6797_v54, %v7283_v9 }
 0x54c   :  { %v2097_v29 = vrot.slane %v6797_v54, %v7298_v20  ;;  %v2101_v30 = vrot.slane %v6797_v54, %v7288_v13  ;;  %v2109_v21 = vrot.slane %v6797_v54, %v7436_v22  ;;  %v2105_v62 = vrot.slane %v6797_v54, %v7475_v58 }
 0x54d   :  { %v2119_v28 = vmul.f32 %v2085_v24, %v7662_v55  ;;  %v2118_v60 = vmul.f32 %v2081_v23, %v7692_v5  ;;  %v2120_v43 = vmul.f32 %v2089_v35, %v7700_v10  ;;  %v2121_v55 = vmul.f32 %v2093_v46, %v7686_v19 }
 0x54e   :  { %1123 = vperm.xlu0 %6724, %v1092_v48   ;;  %1120 = vperm.xlu1 %6725, %v1091_v49   ;;  %v1678_v5 = vmul.f32 %v1656_v52, %v7708_v18  ;;  %v2122_v61 = vmul.f32 %v2097_v29, %v7695_v47  ;;  %v1679_v10 = vmul.f32 %v1660_v40, %v7716_v27  ;;  %v9587_v54 = vmov 0.0  }
 0x54f   :  { %v2123_v19 = vmul.f32 %v2101_v30, %v7703_v16  ;;  %v1680_v18 = vmul.f32 %v1664_v8, %v7720_v63  ;;  %v2125_v47 = vmul.f32 %v2109_v21, %v7711_v1  ;;  %v2124_v27 = vmul.f32 %v2105_v62, %v7724_v50  ;;  %v9585_v16 = vld [vmem:[#allocation13_spill] sm:$0xff] }
 0x550   :  { %v9586_v63 = vmov 0  }
 0x551   :  { %v2282_v2 = vsel %vm2281_vm15, 1, %v9586_v63 }
 0x552   :  { %1699 = vperm.xlu0 %6724, %v1676_v3   ;;  %1696 = vperm.xlu1 %6725, %v1675_v6  }
 0x556   :  { %2138 = vperm.xlu0 %6724, %v2119_v28   ;;  %2135 = vperm.xlu1 %6725, %v2118_v60  }
 0x55a   :  { %1702 = vperm.xlu0 %6724, %v1677_v33   ;;  %2141 = vperm.xlu1 %6725, %v2120_v43  }
 0x55e   :  { %2144 = vperm.xlu0 %6724, %v2121_v55   ;;  %1705 = vperm.xlu1 %6725, %v1678_v5  }
 0x562   :  { %2147 = vperm.xlu0 %6724, %v2122_v61   ;;  %1708 = vperm.xlu1 %6725, %v1679_v10  }
 0x566   :  { %2150 = vperm.xlu0 %6724, %v2123_v19   ;;  %1711 = vperm.xlu1 %6725, %v1680_v18  }
 0x56a   :  { %2156 = vperm.xlu0 %6724, %v2125_v47   ;;  %2153 = vperm.xlu1 %6725, %v2124_v27  }
 0x56e   :  { %1752 = vrot.lane.b32.xlu0 %v9585_v16, %s6982_s23  ;;  %1165 = vrot.lane.b32.xlu1 %v9585_v16, %s6981_s22 }
 0x572   :  { %2284 = vperm.xlu0 %6724, %v2282_v2   ;;  %2197 = vrot.lane.b32.xlu1 %v9585_v16, %s6983_s24 }
 0x5a2   :  { %v1250_v1 = vpop.permute.xlu1 %1249  ;;  %v1253_v50 = vpop.permute.xlu0 %1252 }
 0x5a3   :  { %v1275_v53 = vrot.slane %v1250_v1, %v7308_v26  ;;  %v1279_v59 = vrot.slane %v1253_v50, %v7308_v26 }
 0x5a5   :  { %v1304_v31 = vsel %vm504_vm6, %v1279_v59, %v1275_v53 }
 0x5a6   :  { %v1256_v41 = vpop.permute.xlu0 %1255  ;;  %v1265_v56 = vpop.permute.xlu1 %1264 }
 0x5a7   :  { %v1283_v14 = vrot.slane %v1256_v41, %v7308_v26  ;;  %v1295_v25 = vrot.slane %v1265_v56, %v7308_v26 }
 0x5a9   :  { %v1305_v51 = vsel %vm506_vm7, %v1283_v14, %v1304_v31 }
 0x5aa   :  { %v1259_v17 = vpop.permute.xlu0 %1258  ;;  %v1268_v44 = vpop.permute.xlu1 %1267 }
 0x5ab   :  { %v1287_v0 = vrot.slane %v1259_v17, %v7308_v26  ;;  %v1299_v57 = vrot.slane %v1268_v44, %v7308_v26 }
 0x5ad   :  { %v1306_v42 = vsel %vm508_vm8, %v1287_v0, %v1305_v51 }
 0x5ae   :  { %v1262_v4 = vpop.permute.xlu0 %1261 }
 0x5af   :  { %v1291_v11 = vrot.slane %v1262_v4, %v7308_v26 }
 0x5b1   :  { %v1307_v15 = vsel %vm510_vm9, %v1291_v11, %v1306_v42 }
 0x5b2   :  { %v1308_v12 = vsel %vm512_vm10, %v1295_v25, %v1307_v15  ;;  %v1271_v32 = vpop.permute.xlu0 %1270 }
 0x5b3   :  { %v1303_v48 = vrot.slane %v1271_v32, %v7308_v26  ;;  %v1309_v49 = vsel %vm514_vm11, %v1299_v57, %v1308_v12 }
 0x5b5   :  { %v1106_v34 = vpop.permute.xlu1 %1105  ;;  %v1310_v37 = vsel %vm516_vm12, %v1303_v48, %v1309_v49 }
 0x5b6   :  { %6604 = vmatmul.mubr.msk.f32.vlgmr.msra.gmra.mrb[2].mxu0 %vm520_vm14, %v1310_v37  ;;  %v1103_v6 = vpop.permute.xlu0 %1102  ;;  %v1132_v10 = vrot.slane %v1106_v34, %v7308_v26 }
 0x5b7   :  { %6613 = vmatprep.mubr.msk.f32.mxu0 %vm6978_vm3, %v9587_v54  ;;  %v1128_v30 = vrot.slane %v1103_v6, %v7308_v26 }
 0x5b9   :  { %v1109_v3 = vpop.permute.xlu1 %1108  ;;  %v1157_v21 = vsel %vm504_vm6, %v1132_v10, %v1128_v30 }
 0x5ba   :  { %v1112_v23 = vpop.permute.xlu0 %1111  ;;  %v1136_v8 = vrot.slane %v1109_v3, %v7308_v26 }
 0x5bb   :  { %v1140_v62 = vrot.slane %v1112_v23, %v7308_v26 }
 0x5bc   :  { %v1158_v47 = vsel %vm506_vm7, %v1136_v8, %v1157_v21  ;;  %v9589_v8 = vld [vmem:[#allocation6_spill] sm:$0xff] }
 0x5bd   :  { %v1115_v24 = vpop.permute.xlu1 %1114  ;;  %v1159_v59 = vsel %vm508_vm8, %v1140_v62, %v1158_v47 }
 0x5be   :  { %v1144_v27 = vrot.slane %v1115_v24, %v7308_v26 }
 0x5c0   :  { %v1160_v0 = vsel %vm510_vm9, %v1144_v27, %v1159_v59 }
 0x5c1   :  { %v1118_v28 = vpop.permute.xlu1 %1117 }
 0x5c2   :  { %v1148_v45 = vrot.slane %v1118_v28, %v7308_v26 }
 0x5c4   :  { %v1161_v44 = vsel %vm512_vm10, %v1148_v45, %v1160_v0  ;;  %v9592_v0 = vld [vmem:[#allocation9_spill] sm:$0xff] }
 0x5c9   :  { %v1691_v60 = vpop.permute.xlu1 %1690  ;;  %v1694_v39 = vpop.permute.xlu0 %1693 }
 0x5ca   :  { %v1716_v16 = vrot.slane %v1691_v60, %v7308_v26  ;;  %v1720_v2 = vrot.slane %v1694_v39, %v7308_v26 }
 0x5cc   :  { %v1745_v4 = vsel %vm504_vm6, %v1720_v2, %v1716_v16 }
 0x5cd   :  { %v1121_v35 = vpop.permute.xlu1 %1120  ;;  %v1124_v33 = vpop.permute.xlu0 %1123 }
 0x5ce   :  { %v1152_v41 = vrot.slane %v1121_v35, %v7308_v26  ;;  %v1156_v51 = vrot.slane %v1124_v33, %v7308_v26 }
 0x5d0   :  { %v1162_v57 = vsel %vm514_vm11, %v1152_v41, %v1161_v44  ;;  %v6539_v44 = vld [vmem:[%s9539_s7 + $0x4] sm:$0xf] }
 0x5d1   :  { %v1697_v43 = vpop.permute.xlu1 %1696  ;;  %v1700_v46 = vpop.permute.xlu0 %1699  ;;  %v1163_v60 = vsel %vm516_vm12, %v1156_v51, %v1162_v57 }
 0x5d2   :  { %v1724_v17 = vrot.slane %v1697_v43, %v7308_v26  ;;  %v1728_v15 = vrot.slane %v1700_v46, %v7308_v26 }
 0x5d4   :  { %v1746_v48 = vsel %vm506_vm7, %v1724_v17, %v1745_v4  ;;  %v7956_v4 = vunpack.c.l.bf16 %v6539_v44 }
 0x5d5   :  { %v2136_v52 = vpop.permute.xlu1 %2135  ;;  %v2139_v55 = vpop.permute.xlu0 %2138  ;;  %v1747_v39 = vsel %vm508_vm8, %v1728_v15, %v1746_v48  ;;  %v9594_v15 = vld [vmem:[#allocation11_spill] sm:$0xff] }
 0x5d6   :  { %v2161_v56 = vrot.slane %v2136_v52, %v7308_v26  ;;  %v2165_v53 = vrot.slane %v2139_v55, %v7308_v26  ;;  %v2642_v51 = vrot.slane %v7956_v4, %v7151_v38  ;;  %vm2513_vm1 = vcmp.gt.f32.partialorder %v7956_v4, 0.0 }
 0x5d8   :  { %v2190_v12 = vsel %vm504_vm6, %v2165_v53, %v2161_v56  ;;  %v6538_v56 = vld [vmem:[%s9538_s6] ss:$0 sm:$0xff]  ;;  %2644 = vbcast.lane.b32.xlu1 %v2642_v51, 256 }
 0x5d9   :  { %v2142_v5 = vpop.permute.xlu1 %2141  ;;  %v1703_v29 = vpop.permute.xlu0 %1702 }
 0x5da   :  { %v2169_v14 = vrot.slane %v2142_v5, %v7308_v26  ;;  %v1732_v34 = vrot.slane %v1703_v29, %v7308_v26 }
 0x5dc   :  { %v2191_v49 = vsel %vm506_vm7, %v2169_v14, %v2190_v12  ;;  %v1748_v46 = vsel %vm510_vm9, %v1732_v34, %v1747_v39 }
 0x5dd   :  { %v1706_v40 = vpop.permute.xlu1 %1705  ;;  %v2145_v61 = vpop.permute.xlu0 %2144 }
 0x5de   :  { %v2173_v31 = vrot.slane %v2145_v61, %v7308_v26  ;;  %v1736_v3 = vrot.slane %v1706_v40, %v7308_v26  ;;  %v9588_v61 = vld [vmem:[#allocation5_spill] sm:$0xff] }
 0x5e0   :  { %v2192_v6 = vsel %vm508_vm8, %v2173_v31, %v2191_v49  ;;  %v1749_v5 = vsel %vm512_vm10, %v1736_v3, %v1748_v46 }
 0x5e1   :  { %v1709_v19 = vpop.permute.xlu1 %1708  ;;  %v2148_v18 = vpop.permute.xlu0 %2147 }
 0x5e2   :  { %v2177_v11 = vrot.slane %v2148_v18, %v7308_v26  ;;  %v1740_v24 = vrot.slane %v1709_v19, %v7308_v26  ;;  %v9590_v19 = vld [vmem:[#allocation7_spill] sm:$0xff]  ;;  %v9591_v18 = vld [vmem:[#allocation8_spill] sm:$0xff] }
 0x5e4   :  { %v2193_v23 = vsel %vm510_vm9, %v2177_v11, %v2192_v6  ;;  %v1750_v29 = vsel %vm514_vm11, %v1740_v24, %v1749_v5  ;;  %v2635_v11 = vrot.slane %v7956_v4, %v7145_v36  ;;  %v9596_v6 = vld [vmem:[#allocation10_spill] sm:$0xff] }
 0x5e5   :  { %v1712_v1 = vpop.permute.xlu1 %1711  ;;  %v2151_v50 = vpop.permute.xlu0 %2150 }
 0x5e6   :  { %v2181_v32 = vrot.slane %v2151_v50, %v7308_v26  ;;  %v1744_v35 = vrot.slane %v1712_v1, %v7308_v26  ;;  %2637 = vbcast.lane.b32.xlu0 %v2635_v11, 256 }
 0x5e8   :  { %v2194_v33 = vsel %vm512_vm10, %v2181_v32, %v2193_v23  ;;  %v1751_v10 = vsel %vm516_vm12, %v1744_v35, %v1750_v29  ;;  %v9595_v32 = vld [vmem:[#allocation12_spill] sm:$0xff] }
 0x5e9   :  { %v2154_v25 = vpop.permute.xlu1 %2153  ;;  %v2157_v42 = vpop.permute.xlu0 %2156  ;;  %v7981_v29 = vld [vmem:[%s9537_s5] ss:$0 sm:$0xff] }
 0x5ea   :  { %v2185_v37 = vrot.slane %v2154_v25, %v7308_v26  ;;  %v2189_v43 = vrot.slane %v2157_v42, %v7308_v26  ;;  %v2649_v25 = vrot.slane %v7956_v4, %v7278_v7 }
 0x5ec   :  { %v2195_v52 = vsel %vm514_vm11, %v2185_v37, %v2194_v33  ;;  %2651 = vbcast.lane.b32.xlu1 %v2649_v25, 256 }
 0x5ed   :  { %v1166_v28 = vpop.permute.xlu1 %1165  ;;  %v1753_v55 = vpop.permute.xlu0 %1752  ;;  %v2196_v30 = vsel %vm516_vm12, %v2189_v43, %v2195_v52 }
 0x5ee   :  { %6597 = vmatpush3.msra.mxu1 %v1166_v28 }
 0x5ef   :  { %6599 = vmatmul.mubr.msk.f32.vlgmr.msra.gmra.mrb[4].mxu1 %vm520_vm14, %v1163_v60  ;;  %6606 = vmatprep.subr.mxu1 %v9587_v54 }
 0x5f0   :  { %6607 = vmatpush3.msra.mxu1 %v1753_v55  ;;  %6608 = vmatprep.mubr.msk.f32.mxu1 %vm6978_vm3, %v9587_v54 }
 0x5f1   :  { %v2198_v40 = vpop.permute.xlu1 %2197  ;;  %6693 = vmatprep.subr.bf16.mxu1 %v9588_v61  ;;  %v2285_v17 = vpop.permute.xlu0 %2284 }
 0x5f2   :  { %6612 = vmatpush3.msra.mxu0 %v2198_v40  ;;  %vm2286_vm0 = vcmp.eq.s32.totalorder %v2285_v17, 1 }
 0x5f3   :  { %6609 = vmatmul.mubr.msk.f32.vlgmr.msra.gmra.mrb[6].mxu1 %vm520_vm14, %v1751_v10  ;;  %6614 = vmatmul.mubr.msk.f32.vlgmr.msra.gmra.mrb[4].mxu0 %vm520_vm14, %v2196_v30 }
 0x5f4   :  { %6695 = vmatpush1.bf16.msra.mxu1 %v9589_v8  ;;  %2360 = vmatprep.mubr.f32.mxu1 %v9587_v54 }
 0x5f5   :  { %6697 = vmatprep.subr.bf16.mxu1 %v9590_v19  ;;  %6616 = vmatprep.subr.mxu0 %v9587_v54 }
 0x5f6   :  { %6618 = vmatprep.mubr.msk.f32.mxu0 %vm6978_vm3, %v9587_v54 }
 0x5f8   :  { %6699 = vmatpush1.bf16.msra.mxu1 %v9591_v18 }
 0x5f9   :  { %6626 = vmatprep.subr.mxu1 %v9587_v54 }
 0x689   :  { %v1379_v21 = vpop.f32.mrb[2].mxu0 }
 0x68a   :  { %v6605_v62 = vpop.f32.mrb[3].mxu0 }
 0x6c2   :  { %v1236_v47 = vpop.f32.mrb[4].mxu1 }
 0x6c3   :  { %v1380_v27 = vadd.f32 %v1379_v21, %v1236_v47  ;;  %v6600_v45 = vpop.f32.mrb[5].mxu1 }
 0x6c6   :  { %v1823_v16 = vpop.f32.mrb[6].mxu1  ;;  %v2268_v2 = vpop.f32.mrb[4].mxu0 }
 0x6c7   :  { %v1827_v1 = vadd.f32 %v1823_v16, %v1380_v27  ;;  %v6610_v50 = vpop.f32.mrb[7].mxu1  ;;  %v6615_v41 = vpop.f32.mrb[5].mxu0 }
 0x6c9   :  { %v2272_v53 = vadd.f32 %v2268_v2, %v1827_v1 }
 0x6cb   :  { %v2279_v59 = vadd.f32 %v6538_v56, %v2272_v53 }
 0x6cd   :  { %6798 = vtanh.f32 %v2279_v59 }
 0x6d7   :  { %v6799_v14 = vpop.eup %6798 }
 0x6d8   :  { %v7947_v31 = vsel %vm2286_vm0, %v6799_v14, %v9592_v0 }
 0x6d9   :  { %9593 = vst [vmem:[#allocation14_spill] sm:$0xff] %v7947_v31  ;;  %6541 = vmatmul.mubr.msk.f32.vlgmr.msra.gmra.mrb[8].mxu1 %vm160_vm5, %v7947_v31 }
 0x6da   :  { %6628 = vmatprep.mubr.msk.f32.mxu1 %vm6978_vm3, %v9587_v54 }
 0x7ac   :  { %v2362_v42 = vpop.f32.mrb[8].mxu1 }
 0x7ad   :  { %v2364_v57 = vpop.f32.mrb[9].mxu1  ;;  %v7969_v24 = vadd.f32 %v2362_v42, %v9596_v6 }
 0x7ae   :  { %v2365_v12 = vadd.f32 %v2364_v57, %v9594_v15 }
 0x7b0   :  { %v2375_v48 = vrot.slane %v2365_v12, %v9595_v32  ;;  %v2368_v37 = vcombine.high %v2365_v12, %v2365_v12 }
 0x7b2   :  { %v2383_v49 = vcombine.high %v2375_v48, %v2375_v48  ;;  %v2391_v34 = vrot.slane %v2375_v48, %v9595_v32  ;;  %v2382_v60 = vrot.slane %v2368_v37, %v9595_v32 }
 0x7b4   :  { %v2405_v3 = vrot.slane %v2383_v49, %v9595_v32  ;;  %v2420_v23 = vrot.slane %v2391_v34, %v7145_v36  ;;  %v2413_v39 = vcombine.high %v2391_v34, %v2391_v34  ;;  %v2398_v46 = vrot.slane %v2382_v60, %v9595_v32 }
 0x7b5   :  { %v2384_v59 = vcombine.high %v2382_v60, %v2382_v60 }
 0x7b6   :  { %v2424_v28 = vrot.slane %v2405_v3, %v7145_v36  ;;  %v2457_v35 = vadd.f32 %v2420_v23, %v7969_v24  ;;  %v2428_v52 = vrot.slane %v2413_v39, %v7145_v36  ;;  %v2436_v30 = vrot.slane %v2398_v46, %v7145_v36 }
 0x7b7   :  { %v2414_v17 = vcombine.high %v2398_v46, %v2398_v46  ;;  %v2415_v0 = vcombine.high %v2405_v3, %v2405_v3  ;;  %v2412_v44 = vrot.slane %v2384_v59, %v9595_v32 }
 0x7b8   :  { %v2458_v33 = vadd.f32 %v2424_v28, %v7969_v24  ;;  %v2465_v43 = vmul.f32 0.2, %v2457_v35  ;;  %v2459_v21 = vadd.f32 %v2428_v52, %v7969_v24  ;;  %v2461_v47 = vadd.f32 %v2436_v30, %v7969_v24 }
 0x7b9   :  { %v2444_v51 = vrot.slane %v2414_v17, %v7145_v36  ;;  %v2432_v11 = vrot.slane %v2415_v0, %v7145_v36  ;;  %v2440_v25 = vrot.slane %v2412_v44, %v7145_v36  ;;  %v2416_v34 = vcombine.high %v2412_v44, %v2412_v44 }
 0x7ba   :  { %v2473_v55 = vmax.f32 %v2457_v35, %v2465_v43  ;;  %v2466_v5 = vmul.f32 0.2, %v2458_v33  ;;  %v2467_v27 = vmul.f32 0.2, %v2459_v21  ;;  %v2469_v16 = vmul.f32 0.2, %v2461_v47 }
 0x7bb   :  { %v2463_v42 = vadd.f32 %v2444_v51, %v7969_v24  ;;  %v2460_v57 = vadd.f32 %v2432_v11, %v7969_v24  ;;  %v2462_v48 = vadd.f32 %v2440_v25, %v7969_v24  ;;  %v2448_v28 = vrot.slane %v2416_v34, %v7145_v36 }
 0x7bc   :  { %v2481_v40 = vmul.f32 %v7981_v29, %v2473_v55  ;;  %v2474_v10 = vmax.f32 %v2458_v33, %v2466_v5  ;;  %v2475_v45 = vmax.f32 %v2459_v21, %v2467_v27  ;;  %v2477_v1 = vmax.f32 %v2461_v47, %v2469_v16  ;;  %v8029_v5 = vpop.permute.xlu1 %2644 }
 0x7bd   :  { %v2471_v12 = vmul.f32 0.2, %v2463_v42  ;;  %v2468_v49 = vmul.f32 0.2, %v2460_v57  ;;  %v2470_v3 = vmul.f32 0.2, %v2462_v48  ;;  %v2464_v43 = vadd.f32 %v2448_v28, %v7969_v24 }
 0x7be   :  { %2837 = vrot.lane.b32.xlu1 %v2481_v40, %s6981_s22  ;;  %v2482_v62 = vmul.f32 %v7981_v29, %v2474_v10  ;;  %v2483_v2 = vmul.f32 %v7981_v29, %v2475_v45  ;;  %v2485_v50 = vmul.f32 %v7981_v29, %v2477_v1  ;;  %v2489_v41 = vsel %vm160_vm5, %v2481_v40, 0.0 }
 0x7bf   :  { %v2479_v37 = vmax.f32 %v2463_v42, %v2471_v12  ;;  %v2476_v23 = vmax.f32 %v2460_v57, %v2468_v49  ;;  %v2478_v39 = vmax.f32 %v2462_v48, %v2470_v3  ;;  %v2472_v46 = vmul.f32 0.2, %v2464_v43 }
 0x7c0   :  { %2839 = vrot.lane.b32.xlu0 %v2482_v62, %s6981_s22  ;;  %v2492_v56 = vsel %vm160_vm5, %v2482_v62, 0.0  ;;  %v2495_v53 = vsel %vm160_vm5, %v2483_v2, 0.0  ;;  %v2501_v14 = vsel %vm160_vm5, %v2485_v50, 0.0  ;;  %v8033_v10 = vpop.permute.xlu1 %2651 }
 0x7c1   :  { %v2487_v60 = vmul.f32 %v7981_v29, %v2479_v37  ;;  %v2484_v35 = vmul.f32 %v7981_v29, %v2476_v23  ;;  %v2486_v33 = vmul.f32 %v7981_v29, %v2478_v39  ;;  %v2480_v52 = vmax.f32 %v2464_v43, %v2472_v46 }
 0x7c2   :  { %3425 = vrot.lane.b32.xlu1 %v2481_v40, %s6982_s23 }
 0x7c3   :  { %v2488_v55 = vmul.f32 %v7981_v29, %v2480_v52  ;;  %v2498_v30 = vsel %vm160_vm5, %v2484_v35, 0.0  ;;  %v2504_v29 = vsel %vm160_vm5, %v2486_v33, 0.0  ;;  %v2507_v16 = vsel %vm160_vm5, %v2487_v60, 0.0 }
 0x7c4   :  { %3427 = vrot.lane.b32.xlu0 %v2482_v62, %s6982_s23 }
 0x7c6   :  { %3870 = vrot.lane.b32.xlu1 %v2481_v40, %s6983_s24  ;;  %v8031_v40 = vpop.permute.xlu0 %2637 }
 0x7c8   :  { %3872 = vrot.lane.b32.xlu0 %v2482_v62, %s6983_s24  ;;  %v2510_v62 = vsel %vm160_vm5, %v2488_v55, 0.0 }
 0x7cc   :  { %3874 = vrot.lane.b32.xlu0 %v2483_v2, %s6983_s24 }
 0x7d0   :  { %3878 = vrot.lane.b32.xlu0 %v2485_v50, %s6983_s24 }
 0x7ea   :  { %2490 = vadd.xlane.f32.xlu1 %v2489_v41 }
 0x7ef   :  { %2493 = vadd.xlane.f32.xlu0 %v2492_v56 }
 0x7f3   :  { %2496 = vadd.xlane.f32.xlu0 %v2495_v53 }
 0x7f7   :  { %2502 = vadd.xlane.f32.xlu0 %v2501_v14 }
 0x7fb   :  { %2841 = vrot.lane.b32.xlu1 %v2483_v2, %s6981_s22 }
 0x7ff   :  { %2845 = vrot.lane.b32.xlu1 %v2485_v50, %s6981_s22 }
 0x803   :  { %3429 = vrot.lane.b32.xlu1 %v2483_v2, %s6982_s23 }
 0x807   :  { %3433 = vrot.lane.b32.xlu1 %v2485_v50, %s6982_s23 }
 0x80b   :  { %2849 = vrot.lane.b32.xlu1 %v2487_v60, %s6981_s22 }
 0x80d   :  { %2843 = vrot.lane.b32.xlu0 %v2484_v35, %s6981_s22 }
 0x80f   :  { %3435 = vrot.lane.b32.xlu1 %v2486_v33, %s6982_s23 }
 0x811   :  { %2847 = vrot.lane.b32.xlu0 %v2486_v33, %s6981_s22 }
 0x813   :  { %3437 = vrot.lane.b32.xlu1 %v2487_v60, %s6982_s23 }
 0x815   :  { %3431 = vrot.lane.b32.xlu0 %v2484_v35, %s6982_s23 }
 0x817   :  { %3882 = vrot.lane.b32.xlu1 %v2487_v60, %s6983_s24 }
 0x819   :  { %3876 = vrot.lane.b32.xlu0 %v2484_v35, %s6983_s24 }
 0x81b   :  { %3439 = vrot.lane.b32.xlu1 %v2488_v55, %s6982_s23 }
 0x81d   :  { %3880 = vrot.lane.b32.xlu0 %v2486_v33, %s6983_s24 }
 0x830   :  { %v2838_v47 = vpop.permute.xlu1 %2837 }
 0x831   :  { %v2861_v27 = vsel %vm160_vm5, %v2838_v47, 0.0 }
 0x832   :  { %v2840_v21 = vpop.permute.xlu0 %2839 }
 0x833   :  { %v2864_v42 = vsel %vm160_vm5, %v2840_v21, 0.0 }
 0x834   :  { %v3426_v50 = vpop.permute.xlu1 %3425 }
 0x835   :  { %v3449_v0 = vsel %vm160_vm5, %v3426_v50, 0.0 }
 0x836   :  { %v3428_v45 = vpop.permute.xlu0 %3427 }
 0x837   :  { %v3452_v2 = vsel %vm160_vm5, %v3428_v45, 0.0 }
 0x838   :  { %v3871_v56 = vpop.permute.xlu1 %3870 }
 0x839   :  { %v3894_v51 = vsel %vm160_vm5, %v3871_v56, 0.0  ;;  %v2656_v56 = vrot.slane %v7956_v4, %v7283_v9 }
 0x83a   :  { %v3873_v1 = vpop.permute.xlu0 %3872 }
 0x83b   :  { %v3897_v34 = vsel %vm160_vm5, %v3873_v1, 0.0 }
 0x83c   :  { %2499 = vadd.xlane.f32.xlu0 %v2498_v30 }
 0x83e   :  { %v3875_v41 = vpop.permute.xlu0 %3874 }
 0x83f   :  { %2511 = vadd.xlane.f32.xlu1 %v2510_v62  ;;  %v3900_v39 = vsel %vm160_vm5, %v3875_v41, 0.0 }
 0x840   :  { %2505 = vadd.xlane.f32.xlu0 %v2504_v29 }
 0x842   :  { %v3879_v59 = vpop.permute.xlu0 %3878 }
 0x843   :  { %2862 = vadd.xlane.f32.xlu1 %v2861_v27  ;;  %v3906_v35 = vsel %vm160_vm5, %v3879_v59, 0.0 }
 0x844   :  { %2508 = vadd.xlane.f32.xlu0 %v2507_v16 }
 0x847   :  { %3453 = vadd.xlane.f32.xlu1 %v3452_v2 }
 0x85a   :  { %2851 = vrot.lane.b32.xlu0 %v2488_v55, %s6981_s22 }
 0x85e   :  { %3884 = vrot.lane.b32.xlu0 %v2488_v55, %s6983_s24 }
 0x877   :  { %v8043_v53 = vpop.xlane.xlu1 %2490 }
 0x87b   :  { %v2842_v17 = vpop.permute.xlu1 %2841 }
 0x87c   :  { %v8045_v14 = vpop.xlane.xlu0 %2493  ;;  %v2867_v49 = vsel %vm160_vm5, %v2842_v17, 0.0 }
 0x87d   :  { %3450 = vadd.xlane.f32.xlu0 %v3449_v0 }
 0x87f   :  { %v2846_v44 = vpop.permute.xlu1 %2845 }
 0x880   :  { %v8049_v11 = vpop.xlane.xlu0 %2496  ;;  %v2873_v3 = vsel %vm160_vm5, %v2846_v44, 0.0 }
 0x881   :  { %3895 = vadd.xlane.f32.xlu0 %v3894_v51 }
 0x883   :  { %v3430_v25 = vpop.permute.xlu1 %3429 }
 0x884   :  { %v3455_v57 = vsel %vm160_vm5, %v3430_v25, 0.0  ;;  %v8053_v12 = vpop.xlane.xlu0 %2502 }
 0x885   :  { %2865 = vadd.xlane.f32.xlu0 %v2864_v42  ;;  %3456 = vadd.xlane.f32.xlu1 %v3455_v57  ;;  %v2663_v57 = vrot.slane %v7956_v4, %v7298_v20 }
 0x887   :  { %v3434_v48 = vpop.permute.xlu1 %3433 }
 0x888   :  { %v3461_v23 = vsel %vm160_vm5, %v3434_v48, 0.0  ;;  %v2844_v28 = vpop.permute.xlu0 %2843  ;;  %v2529_v48 = vrot.slane %v8045_v14, %v7308_v26 }
 0x889   :  { %2868 = vadd.xlane.f32.xlu0 %v2867_v49  ;;  %3898 = vadd.xlane.f32.xlu1 %v3897_v34  ;;  %v2870_v52 = vsel %vm160_vm5, %v2844_v28, 0.0  ;;  %v2533_v49 = vrot.slane %v8049_v11, %v7308_v26  ;;  %v2525_v34 = vrot.slane %v8043_v53, %v7308_v26 }
 0x88b   :  { %v2850_v37 = vpop.permute.xlu1 %2849 }
 0x88c   :  { %v2848_v33 = vpop.permute.xlu0 %2847  ;;  %v2879_v29 = vsel %vm160_vm5, %v2850_v37, 0.0 }
 0x88d   :  { %2874 = vadd.xlane.f32.xlu0 %v2873_v3  ;;  %3462 = vadd.xlane.f32.xlu1 %v3461_v23  ;;  %v2876_v21 = vsel %vm160_vm5, %v2848_v33, 0.0  ;;  %v2554_v3 = vsel %vm504_vm6, %v2529_v48, %v2525_v34 }
 0x88e   :  { %v2555_v23 = vsel %vm506_vm7, %v2533_v49, %v2554_v3 }
 0x88f   :  { %v3436_v60 = vpop.permute.xlu1 %3435 }
 0x890   :  { %v3464_v46 = vsel %vm160_vm5, %v3436_v60, 0.0  ;;  %v3432_v62 = vpop.permute.xlu0 %3431 }
 0x891   :  { %3901 = vadd.xlane.f32.xlu0 %v3900_v39  ;;  %3907 = vadd.xlane.f32.xlu1 %v3906_v35  ;;  %v3458_v2 = vsel %vm160_vm5, %v3432_v62, 0.0  ;;  %v2541_v39 = vrot.slane %v8053_v12, %v7308_v26 }
 0x893   :  { %v3438_v43 = vpop.permute.xlu1 %3437 }
 0x894   :  { %v3467_v30 = vsel %vm160_vm5, %v3438_v43, 0.0  ;;  %v3877_v45 = vpop.permute.xlu0 %3876 }
 0x895   :  { %3465 = vadd.xlane.f32.xlu0 %v3464_v46  ;;  %2871 = vadd.xlane.f32.xlu1 %v2870_v52  ;;  %v3903_v1 = vsel %vm160_vm5, %v3877_v45, 0.0 }
 0x897   :  { %v3883_v55 = vpop.permute.xlu1 %3882 }
 0x898   :  { %v3912_v47 = vsel %vm160_vm5, %v3883_v55, 0.0  ;;  %v3881_v50 = vpop.permute.xlu0 %3880 }
 0x899   :  { %3468 = vadd.xlane.f32.xlu0 %v3467_v30  ;;  %2877 = vadd.xlane.f32.xlu1 %v2876_v21  ;;  %v3909_v41 = vsel %vm160_vm5, %v3881_v50, 0.0 }
 0x89b   :  { %v3440_v27 = vpop.permute.xlu1 %3439 }
 0x89c   :  { %v3470_v16 = vsel %vm160_vm5, %v3440_v27, 0.0 }
 0x89d   :  { %3913 = vadd.xlane.f32.xlu0 %v3912_v47  ;;  %2880 = vadd.xlane.f32.xlu1 %v2879_v29  ;;  %v2677_v47 = vrot.slane %v7956_v4, %v7475_v58 }
 0x8a1   :  { %3471 = vadd.xlane.f32.xlu0 %v3470_v16  ;;  %3459 = vadd.xlane.f32.xlu1 %v3458_v2 }
 0x8a5   :  { %3904 = vadd.xlane.f32.xlu1 %v3903_v1 }
 0x8a9   :  { %3910 = vadd.xlane.f32.xlu1 %v3909_v41 }
 0x8b7   :  { %2658 = vbcast.lane.b32.xlu0 %v2656_v56, 256 }
 0x8c9   :  { %v8073_v59 = vpop.xlane.xlu0 %2499 }
 0x8ca   :  { %v2537_v37 = vrot.slane %v8073_v59, %v7308_v26 }
 0x8cc   :  { %v2556_v28 = vsel %vm508_vm8, %v2537_v37, %v2555_v23  ;;  %v8100_v33 = vpop.xlane.xlu1 %2511 }
 0x8cd   :  { %v8075_v17 = vpop.xlane.xlu0 %2505  ;;  %v2557_v43 = vsel %vm510_vm9, %v2541_v39, %v2556_v28  ;;  %v2553_v55 = vrot.slane %v8100_v33, %v7308_v26 }
 0x8ce   :  { %v2545_v60 = vrot.slane %v8075_v17, %v7308_v26 }
 0x8d0   :  { %v2558_v46 = vsel %vm512_vm10, %v2545_v60, %v2557_v43  ;;  %v8114_v29 = vpop.xlane.xlu1 %2862 }
 0x8d1   :  { %v8077_v0 = vpop.xlane.xlu0 %2508  ;;  %v2896_v28 = vrot.slane %v8114_v29, %v7308_v26 }
 0x8d2   :  { %v2549_v35 = vrot.slane %v8077_v0, %v7308_v26 }
 0x8d4   :  { %v2559_v52 = vsel %vm514_vm11, %v2549_v35, %v2558_v46  ;;  %v8116_v27 = vpop.xlane.xlu1 %3453 }
 0x8d5   :  { %v2852_v44 = vpop.permute.xlu0 %2851  ;;  %v2560_v30 = vsel %vm516_vm12, %v2553_v55, %v2559_v52 }
 0x8d6   :  { %v2882_v51 = vsel %vm160_vm5, %v2852_v44, 0.0  ;;  %v2562_v21 = vsel %vm2513_vm1, %v2560_v30, -1e+30 }
 0x8d7   :  { %2883 = vadd.xlane.f32.xlu1 %v2882_v51  ;;  %v2563_v62 = vsel %vm520_vm14, %v2562_v21, -inf }
 0x8d9   :  { %v3885_v25 = vpop.permute.xlu0 %3884 }
 0x8da   :  { %v3915_v42 = vsel %vm160_vm5, %v3885_v25, 0.0 }
 0x8db   :  { %3916 = vadd.xlane.f32.xlu1 %v3915_v42 }
 0x8ec   :  { %2665 = vbcast.lane.b32.xlu1 %v2663_v57, 256 }
 0x90a   :  { %v8122_v2 = vpop.xlane.xlu0 %3450 }
 0x90e   :  { %v8126_v50 = vpop.xlane.xlu0 %3895 }
 0x90f   :  { %v3929_v43 = vrot.slane %v8126_v50, %v7308_v26 }
 0x910   :  { %2564 = vmax.xlane.f32.xlu1 %v2563_v62 }
 0x912   :  { %v8118_v45 = vpop.xlane.xlu1 %3456  ;;  %v8130_v56 = vpop.xlane.xlu0 %2865 }
 0x913   :  { %v2900_v3 = vrot.slane %v8130_v56, %v7308_v26 }
 0x915   :  { %v2925_v46 = vsel %vm504_vm6, %v2900_v3, %v2896_v28 }
 0x916   :  { %v8120_v16 = vpop.xlane.xlu1 %3898  ;;  %v8134_v51 = vpop.xlane.xlu0 %2868 }
 0x917   :  { %v2904_v23 = vrot.slane %v8134_v51, %v7308_v26  ;;  %v3933_v60 = vrot.slane %v8120_v16, %v7308_v26 }
 0x919   :  { %v2926_v30 = vsel %vm506_vm7, %v2904_v23, %v2925_v46  ;;  %v3958_v62 = vsel %vm504_vm6, %v3933_v60, %v3929_v43 }
 0x91a   :  { %v8124_v1 = vpop.xlane.xlu1 %3462  ;;  %v8138_v42 = vpop.xlane.xlu0 %2874 }
 0x91b   :  { %v2912_v32 = vrot.slane %v8138_v42, %v7308_v26 }
 0x91e   :  { %v8128_v41 = vpop.xlane.xlu1 %3907  ;;  %v8142_v48 = vpop.xlane.xlu0 %3901 }
 0x91f   :  { %v3937_v35 = vrot.slane %v8142_v48, %v7308_v26  ;;  %v3945_v60 = vrot.slane %v8128_v41, %v7308_v26 }
 0x921   :  { %2679 = vbcast.lane.b32.xlu1 %v2677_v47, 256  ;;  %v3959_v3 = vsel %vm506_vm7, %v3937_v35, %v3958_v62 }
 0x922   :  { %v8132_v44 = vpop.xlane.xlu1 %2871  ;;  %v8146_v34 = vpop.xlane.xlu0 %3465 }
 0x923   :  { %v2908_v39 = vrot.slane %v8132_v44, %v7308_v26 }
 0x925   :  { %v2927_v47 = vsel %vm508_vm8, %v2908_v39, %v2926_v30 }
 0x926   :  { %v8136_v25 = vpop.xlane.xlu1 %2877  ;;  %v8165_v52 = vpop.xlane.xlu0 %3468  ;;  %v2928_v39 = vsel %vm510_vm9, %v2912_v32, %v2927_v47 }
 0x927   :  { %v2916_v6 = vrot.slane %v8136_v25, %v7308_v26 }
 0x929   :  { %v2929_v46 = vsel %vm512_vm10, %v2916_v6, %v2928_v39 }
 0x92a   :  { %v8140_v57 = vpop.xlane.xlu1 %2880  ;;  %v8190_v30 = vpop.xlane.xlu0 %3913 }
 0x92b   :  { %v2920_v28 = vrot.slane %v8140_v57, %v7308_v26  ;;  %v3953_v32 = vrot.slane %v8190_v30, %v7308_v26 }
 0x92e   :  { %v8144_v49 = vpop.xlane.xlu1 %3459 }
 0x932   :  { %v8148_v37 = vpop.xlane.xlu1 %3904 }
 0x933   :  { %v3941_v55 = vrot.slane %v8148_v37, %v7308_v26 }
 0x935   :  { %v3960_v15 = vsel %vm508_vm8, %v3941_v55, %v3959_v3  ;;  %v2930_v55 = vsel %vm514_vm11, %v2920_v28, %v2929_v46  ;;  %v2670_v46 = vrot.slane %v7956_v4, %v7288_v13 }
 0x936   :  { %v8170_v21 = vpop.xlane.xlu1 %3910  ;;  %v3961_v62 = vsel %vm510_vm9, %v3945_v60, %v3960_v15 }
 0x937   :  { %v3949_v23 = vrot.slane %v8170_v21, %v7308_v26 }
 0x939   :  { %v3962_v3 = vsel %vm512_vm10, %v3949_v23, %v3961_v62  ;;  %v3496_v62 = vrot.slane %v8144_v49, %v7308_v26 }
 0x93a   :  { %v3963_v15 = vsel %vm514_vm11, %v3953_v32, %v3962_v3 }
 0x964   :  { %v8187_v43 = vpop.xlane.xlu1 %2883 }
 0x965   :  { %v2924_v35 = vrot.slane %v8187_v43, %v7308_v26 }
 0x967   :  { %v2931_v31 = vsel %vm516_vm12, %v2924_v35, %v2930_v55  ;;  %v3488_v35 = vrot.slane %v8116_v27, %v7308_v26 }
 0x968   :  { %v8200_v47 = vpop.xlane.xlu1 %3916  ;;  %v2933_v6 = vsel %vm2513_vm1, %v2931_v31, -1e+30  ;;  %v3484_v31 = vrot.slane %v8122_v2, %v7308_v26 }
 0x969   :  { %v3957_v39 = vrot.slane %v8200_v47, %v7308_v26  ;;  %v2934_v18 = vsel %vm520_vm14, %v2933_v6, -inf  ;;  %v3500_v6 = vrot.slane %v8124_v1, %v7308_v26 }
 0x96a   :  { %2935 = vmax.xlane.f32.xlu0 %v2934_v18  ;;  %v3492_v18 = vrot.slane %v8118_v45, %v7308_v26  ;;  %v3513_v55 = vsel %vm504_vm6, %v3488_v35, %v3484_v31 }
 0x96b   :  { %v3964_v28 = vsel %vm516_vm12, %v3957_v39, %v3963_v15  ;;  %v3504_v15 = vrot.slane %v8146_v34, %v7308_v26 }
 0x96c   :  { %v3966_v23 = vsel %vm2513_vm1, %v3964_v28, -1e+30  ;;  %v3514_v3 = vsel %vm506_vm7, %v3492_v18, %v3513_v55  ;;  %v8238_v18 = vpop.permute.xlu1 %2665 }
 0x96d   :  { %v3967_v60 = vsel %vm520_vm14, %v3966_v23, -inf  ;;  %v3515_v32 = vsel %vm508_vm8, %v3496_v62, %v3514_v3  ;;  %v3508_v23 = vrot.slane %v8165_v52, %v7308_v26 }
 0x96e   :  { %3968 = vmax.xlane.f32.xlu1 %v3967_v60  ;;  %v3516_v39 = vsel %vm510_vm9, %v3500_v6, %v3515_v32  ;;  %v8233_v60 = vpop.xlane.xlu0 %3471 }
 0x96f   :  { %v3517_v28 = vsel %vm512_vm10, %v3504_v15, %v3516_v39  ;;  %v3512_v31 = vrot.slane %v8233_v60, %v7308_v26 }
 0x980   :  { %2672 = vbcast.lane.b32.xlu0 %v2670_v46, 256  ;;  %v3518_v46 = vsel %vm514_vm11, %v3508_v23, %v3517_v28 }
 0x981   :  { %v3519_v35 = vsel %vm516_vm12, %v3512_v31, %v3518_v46 }
 0x982   :  { %v3521_v62 = vsel %vm2513_vm1, %v3519_v35, -1e+30 }
 0x983   :  { %v3522_v3 = vsel %vm520_vm14, %v3521_v62, -inf }
 0x99d   :  { %v8243_v55 = vpop.xlane.xlu1 %2564 }
 0x99e   :  { %v2574_v32 = vrot.slane %v8243_v55, %v7151_v38  ;;  %v2578_v6 = vrot.slane %v8243_v55, %v7278_v7  ;;  %v2570_v39 = vrot.slane %v8243_v55, %v7145_v36  ;;  %v2582_v15 = vrot.slane %v8243_v55, %v7283_v9 }
 0x99f   :  { %3523 = vmax.xlane.f32.xlu0 %v3522_v3  ;;  %v2586_v19 = vrot.slane %v8243_v55, %v7298_v20 }
 0x9a0   :  { %v2608_v28 = vsub.f32 %v8045_v14, %v2574_v32  ;;  %v2609_v23 = vsub.f32 %v8049_v11, %v2578_v6  ;;  %v2607_v46 = vsub.f32 %v8043_v53, %v2570_v39  ;;  %v2610_v62 = vsub.f32 %v8073_v59, %v2582_v15 }
 0x9a1   :  { %v2611_v54 = vsub.f32 %v8053_v12, %v2586_v19  ;;  %v2684_v59 = vrot.slane %v7956_v4, %v7436_v22  ;;  %v8270_v19 = vpop.permute.xlu0 %2658  ;;  %v2590_v12 = vrot.slane %v8243_v55, %v7288_v13  ;;  %v2594_v15 = vrot.slane %v8243_v55, %v7475_v58 }
 0x9a2   :  { %v2617_v31 = vmul.f32 1.442695, %v2608_v28  ;;  %v2619_v35 = vmul.f32 1.442695, %v2609_v23  ;;  %v2615_v8 = vmul.f32 1.442695, %v2607_v46 }
 0x9a3   :  { %v2621_v61 = vmul.f32 1.442695, %v2610_v62  ;;  %v2623_v14 = vmul.f32 1.442695, %v2611_v54  ;;  %v2612_v28 = vsub.f32 %v8075_v17, %v2590_v12  ;;  %v2613_v23 = vsub.f32 %v8077_v0, %v2594_v15 }
 0x9a4   :  { %6800 = vpow2.f32 %v2617_v31 }
 0x9a5   :  { %6802 = vpow2.f32 %v2619_v35  ;;  %v2625_v46 = vmul.f32 1.442695, %v2612_v28  ;;  %v2627_v31 = vmul.f32 1.442695, %v2613_v23  ;;  %v8307_v28 = vpop.permute.xlu1 %2679 }
 0x9a6   :  { %6804 = vpow2.f32 %v2615_v8 }
 0x9a7   :  { %6806 = vpow2.f32 %v2621_v61 }
 0x9a8   :  { %6808 = vpow2.f32 %v2623_v14 }
 0x9a9   :  { %6810 = vpow2.f32 %v2625_v46 }
 0x9aa   :  { %6812 = vpow2.f32 %v2627_v31 }
 0x9ae   :  { %v6801_v3 = vpop.eup %6800 }
 0x9af   :  { %v8262_v53 = vmul.f32 %v6801_v3, %v8029_v5  ;;  %v6803_v11 = vpop.eup %6802 }
 0x9b0   :  { %v6805_v32 = vpop.eup %6804  ;;  %v8268_v6 = vmul.f32 %v6803_v11, %v8033_v10 }
 0x9b1   :  { %2716 = vperm.xlu1 %6725, %v8262_v53   ;;  %v6807_v39 = vpop.eup %6806  ;;  %v8274_v54 = vmul.f32 %v6805_v32, %v8031_v40 }
 0x9b2   :  { %v8277_v61 = vmul.f32 %v6807_v39, %v8270_v19  ;;  %v6809_v8 = vpop.eup %6808 }
 0x9b3   :  { %v8282_v4 = vmul.f32 %v6809_v8, %v8238_v18  ;;  %v6811_v0 = vpop.eup %6810 }
 0x9b4   :  { %v6813_v15 = vpop.eup %6812 }
 0x9b5   :  { %2719 = vperm.xlu1 %6725, %v8268_v6   ;;  %2686 = vbcast.lane.b32.xlu0 %v2684_v59, 256 }
 0x9b9   :  { %2713 = vperm.xlu0 %6724, %v8274_v54   ;;  %2722 = vperm.xlu1 %6725, %v8277_v61  }
 0x9bd   :  { %2725 = vperm.xlu1 %6725, %v8282_v4  }
 0x9f7   :  { %v8291_v35 = vpop.xlane.xlu0 %2935 }
 0x9f8   :  { %v2941_v62 = vrot.slane %v8291_v35, %v7145_v36  ;;  %v2949_v14 = vrot.slane %v8291_v35, %v7278_v7  ;;  %v2957_v3 = vrot.slane %v8291_v35, %v7298_v20 }
 0x9fa   :  { %v2978_v11 = vsub.f32 %v8114_v29, %v2941_v62  ;;  %v2980_v17 = vsub.f32 %v8134_v51, %v2949_v14  ;;  %v2982_v12 = vsub.f32 %v8138_v42, %v2957_v3  ;;  %v8311_v29 = vmul.f32 %v6813_v15, %v8307_v28 }
 0x9fb   :  { %v8301_v59 = vpop.permute.xlu0 %2672  ;;  %v2598_v3 = vrot.slane %v8243_v55, %v7436_v22 }
 0x9fc   :  { %v8304_v32 = vmul.f32 %v6811_v0, %v8301_v59  ;;  %v2986_v39 = vmul.f32 1.442695, %v2978_v11  ;;  %v2990_v8 = vmul.f32 1.442695, %v2980_v17  ;;  %v2994_v51 = vmul.f32 1.442695, %v2982_v12 }
 0x9fd   :  { %v2945_v11 = vrot.slane %v8291_v35, %v7151_v38  ;;  %v2614_v17 = vsub.f32 %v8100_v33, %v2598_v3  ;;  %v2965_v33 = vrot.slane %v8291_v35, %v7475_v58 }
 0x9fe   :  { %2728 = vperm.xlu1 %6725, %v8304_v32   ;;  %6814 = vpow2.f32 %v2986_v39  ;;  %v2953_v39 = vrot.slane %v8291_v35, %v7283_v9 }
 0x9ff   :  { %6816 = vpow2.f32 %v2990_v8  ;;  %v2979_v0 = vsub.f32 %v8130_v56, %v2945_v11  ;;  %v2629_v8 = vmul.f32 1.442695, %v2614_v17  ;;  %v2984_v3 = vsub.f32 %v8140_v57, %v2965_v33 }
 0xa00   :  { %6818 = vpow2.f32 %v2994_v51  ;;  %v2981_v15 = vsub.f32 %v8132_v44, %v2953_v39  ;;  %v2961_v51 = vrot.slane %v8291_v35, %v7288_v13 }
 0xa01   :  { %v2988_v12 = vmul.f32 1.442695, %v2979_v0  ;;  %6820 = vpow2.f32 %v2629_v8  ;;  %v2969_v0 = vrot.slane %v8291_v35, %v7436_v22 }
 0xa02   :  { %2731 = vperm.xlu1 %6725, %v8311_v29   ;;  %v2992_v55 = vmul.f32 1.442695, %v2981_v15  ;;  %v2998_v15 = vmul.f32 1.442695, %v2984_v3 }
 0xa03   :  { %6822 = vpow2.f32 %v2988_v12 }
 0xa04   :  { %6824 = vpow2.f32 %v2992_v55 }
 0xa08   :  { %v6815_v23 = vpop.eup %6814 }
 0xa09   :  { %v8315_v46 = vmul.f32 %v6815_v23, %v8031_v40  ;;  %v6817_v31 = vpop.eup %6816  ;;  %v8337_v23 = vpop.xlane.xlu1 %3968 }
 0xa0a   :  { %v8319_v42 = vmul.f32 %v6817_v31, %v8033_v10  ;;  %v6819_v62 = vpop.eup %6818  ;;  %v2983_v31 = vsub.f32 %v8136_v25, %v2961_v51  ;;  %v3974_v56 = vrot.slane %v8337_v23, %v7145_v36  ;;  %v3982_v11 = vrot.slane %v8337_v23, %v7278_v7 }
 0xa0b   :  { %3019 = vperm.xlu1 %6725, %v8315_v46   ;;  %v8323_v14 = vmul.f32 %v6819_v62, %v8238_v18  ;;  %v6821_v8 = vpop.eup %6820 }
 0xa0c   :  { %v2996_v44 = vmul.f32 1.442695, %v2983_v31  ;;  %v4011_v25 = vsub.f32 %v8126_v50, %v3974_v56  ;;  %v4013_v57 = vsub.f32 %v8142_v48, %v3982_v11 }
 0xa0d   :  { %v6823_v33 = vpop.eup %6822 }
 0xa0e   :  { %6826 = vpow2.f32 %v2996_v44  ;;  %v4019_v50 = vmul.f32 1.442695, %v4011_v25  ;;  %v4023_v56 = vmul.f32 1.442695, %v4013_v57  ;;  %v8371_v3 = vmul.f32 %v6823_v33, %v8029_v5 }
 0xa0f   :  { %3025 = vperm.xlu1 %6725, %v8319_v42  }
 0xa13   :  { %3031 = vperm.xlu1 %6725, %v8323_v14  }
 0xa2c   :  { %v8344_v62 = vpop.xlane.xlu0 %3523 }
 0xa2d   :  { %v3529_v17 = vrot.slane %v8344_v62, %v7145_v36  ;;  %v3533_v51 = vrot.slane %v8344_v62, %v7151_v38  ;;  %v3549_v35 = vrot.slane %v8344_v62, %v7288_v13  ;;  %v3537_v44 = vrot.slane %v8344_v62, %v7278_v7 }
 0xa2e   :  { %v3557_v57 = vrot.slane %v8344_v62, %v7436_v22 }
 0xa2f   :  { %v3566_v39 = vsub.f32 %v8122_v2, %v3529_v17  ;;  %v2985_v2 = vsub.f32 %v8187_v43, %v2969_v0  ;;  %v3567_v48 = vsub.f32 %v8116_v27, %v3533_v51  ;;  %v3571_v11 = vsub.f32 %v8146_v34, %v3549_v35  ;;  %v6825_v43 = vpop.eup %6824 }
 0xa30   :  { %v8355_v12 = vpop.permute.xlu0 %2686  ;;  %v3553_v17 = vrot.slane %v8344_v62, %v7475_v58  ;;  %v3568_v27 = vsub.f32 %v8118_v45, %v3537_v44  ;;  %v6827_v51 = vpop.eup %6826  ;;  %v3998_v35 = vrot.slane %v8337_v23, %v7475_v58 }
 0xa31   :  { %v8361_v55 = vmul.f32 %v6821_v8, %v8355_v12  ;;  %v3574_v31 = vmul.f32 1.442695, %v3566_v39  ;;  %v3000_v25 = vmul.f32 1.442695, %v2985_v2  ;;  %v3576_v0 = vmul.f32 1.442695, %v3567_v48 }
 0xa32   :  { %v3541_v39 = vrot.slane %v8344_v62, %v7283_v9  ;;  %v8381_v8 = vmul.f32 %v6825_v43, %v8270_v19  ;;  %v3572_v34 = vsub.f32 %v8165_v52, %v3553_v17  ;;  %v3578_v45 = vmul.f32 1.442695, %v3568_v27 }
 0xa33   :  { %2734 = vperm.xlu0 %6724, %v8361_v55   ;;  %6828 = vpow2.f32 %v3574_v31  ;;  %v3978_v31 = vrot.slane %v8337_v23, %v7151_v38  ;;  %v8393_v52 = vmul.f32 %v6827_v51, %v8301_v59  ;;  %v3545_v43 = vrot.slane %v8344_v62, %v7298_v20 }
 0xa34   :  { %6830 = vpow2.f32 %v2998_v15  ;;  %v3584_v15 = vmul.f32 1.442695, %v3571_v11  ;;  %v3586_v2 = vmul.f32 1.442695, %v3572_v34  ;;  %v3986_v34 = vrot.slane %v8337_v23, %v7283_v9 }
 0xa35   :  { %6832 = vpow2.f32 %v4019_v50  ;;  %v3569_v50 = vsub.f32 %v8144_v49, %v3541_v39  ;;  %v4012_v17 = vsub.f32 %v8120_v16, %v3978_v31  ;;  %v3570_v62 = vsub.f32 %v8124_v1, %v3545_v43 }
 0xa36   :  { %6834 = vpow2.f32 %v4023_v56  ;;  %v3573_v56 = vsub.f32 %v8233_v60, %v3557_v57  ;;  %v4014_v1 = vsub.f32 %v8148_v37, %v3986_v34 }
 0xa37   :  { %3022 = vperm.xlu0 %6724, %v8371_v3   ;;  %6836 = vpow2.f32 %v3000_v25  ;;  %v3580_v49 = vmul.f32 1.442695, %v3569_v50  ;;  %v4021_v16 = vmul.f32 1.442695, %v4012_v17  ;;  %v3990_v50 = vrot.slane %v8337_v23, %v7298_v20 }
 0xa38   :  { %6838 = vpow2.f32 %v3576_v0  ;;  %v3588_v60 = vmul.f32 1.442695, %v3573_v56  ;;  %v4017_v0 = vsub.f32 %v8190_v30, %v3998_v35 }
 0xa39   :  { %6840 = vpow2.f32 %v3584_v15  ;;  %v4015_v37 = vsub.f32 %v8128_v41, %v3990_v50 }
 0xa3a   :  { %6842 = vpow2.f32 %v3578_v45  ;;  %v4031_v30 = vmul.f32 1.442695, %v4017_v0  ;;  %v3582_v45 = vmul.f32 1.442695, %v3570_v62 }
 0xa3b   :  { %3028 = vperm.xlu0 %6724, %v8381_v8   ;;  %6844 = vpow2.f32 %v3586_v2  ;;  %v4027_v0 = vmul.f32 1.442695, %v4015_v37 }
 0xa3c   :  { %6846 = vpow2.f32 %v3580_v49 }
 0xa3d   :  { %v6829_v33 = vpop.eup %6828  ;;  %6848 = vpow2.f32 %v3588_v60 }
 0xa3e   :  { %v6831_v48 = vpop.eup %6830  ;;  %v8397_v44 = vmul.f32 %v6829_v33, %v8031_v40  ;;  %6850 = vpow2.f32 %v4021_v16  ;;  %v4002_v16 = vrot.slane %v8337_v23, %v7436_v22 }
 0xa3f   :  { %v6833_v11 = vpop.eup %6832  ;;  %3034 = vperm.xlu0 %6724, %v8393_v52   ;;  %v8405_v25 = vmul.f32 %v6831_v48, %v8307_v28  ;;  %6852 = vpow2.f32 %v4031_v30  ;;  %v4025_v48 = vmul.f32 1.442695, %v4014_v1 }
 0xa40   :  { %3607 = vperm.xlu1 %6725, %v8397_v44   ;;  %v6835_v27 = vpop.eup %6834  ;;  %v8409_v39 = vmul.f32 %v6833_v11, %v8031_v40  ;;  %6854 = vpow2.f32 %v3582_v45  ;;  %v3994_v11 = vrot.slane %v8337_v23, %v7288_v13 }
 0xa41   :  { %v6837_v15 = vpop.eup %6836  ;;  %v8420_v40 = vmul.f32 %v6835_v27, %v8033_v10  ;;  %6856 = vpow2.f32 %v4025_v48 }
 0xa42   :  { %v8417_v57 = vmul.f32 %v6837_v15, %v8355_v12  ;;  %v6839_v51 = vpop.eup %6838  ;;  %v4016_v27 = vsub.f32 %v8170_v21, %v3994_v11  ;;  %6858 = vpow2.f32 %v4027_v0 }
 0xa43   :  { %3037 = vperm.xlu0 %6724, %v8405_v25   ;;  %v6841_v31 = vpop.eup %6840  ;;  %v8428_v35 = vmul.f32 %v6839_v51, %v8029_v5 }
 0xa44   :  { %4052 = vperm.xlu1 %6725, %v8409_v39   ;;  %v6843_v33 = vpop.eup %6842  ;;  %v8431_v2 = vmul.f32 %v6841_v31, %v8301_v59  ;;  %v4029_v34 = vmul.f32 1.442695, %v4016_v27  ;;  %v4018_v31 = vsub.f32 %v8200_v47, %v4002_v16 }
 0xa45   :  { %v6845_v56 = vpop.eup %6844  ;;  %v8439_v49 = vmul.f32 %v6843_v33, %v8033_v10 }
 0xa46   :  { %v6847_v17 = vpop.eup %6846  ;;  %v8442_v43 = vmul.f32 %v6845_v56, %v8307_v28  ;;  %6860 = vpow2.f32 %v4029_v34  ;;  %v4033_v1 = vmul.f32 1.442695, %v4018_v31 }
 0xa47   :  { %3040 = vperm.xlu0 %6724, %v8417_v57   ;;  %v6849_v60 = vpop.eup %6848  ;;  %v8448_v41 = vmul.f32 %v6847_v17, %v8270_v19 }
 0xa48   :  { %4058 = vperm.xlu1 %6725, %v8420_v40   ;;  %v6851_v15 = vpop.eup %6850  ;;  %v8451_v10 = vmul.f32 %v6849_v60, %v8355_v12  ;;  %6862 = vpow2.f32 %v4033_v1 }
 0xa49   :  { %v6853_v62 = vpop.eup %6852  ;;  %v8458_v30 = vmul.f32 %v6851_v15, %v8029_v5 }
 0xa4a   :  { %v6855_v21 = vpop.eup %6854  ;;  %v8461_v51 = vmul.f32 %v6853_v62, %v8307_v28 }
 0xa4b   :  { %3610 = vperm.xlu0 %6724, %v8428_v35   ;;  %v8467_v23 = vmul.f32 %v6855_v21, %v8238_v18  ;;  %v6857_v45 = vpop.eup %6856 }
 0xa4c   :  { %3622 = vperm.xlu1 %6725, %v8431_v2   ;;  %v8471_v5 = vmul.f32 %v6857_v45, %v8270_v19  ;;  %v6859_v50 = vpop.eup %6858  ;;  %v2717_v19 = vpop.permute.xlu1 %2716 }
 0xa4d   :  { %v8475_v47 = vmul.f32 %v6859_v50, %v8238_v18  ;;  %v2714_v18 = vpop.permute.xlu0 %2713  ;;  %v2743_v27 = vrot.slane %v2717_v19, %v7308_v26 }
 0xa4e   :  { %v2739_v60 = vrot.slane %v2714_v18, %v7308_v26 }
 0xa4f   :  { %3613 = vperm.xlu0 %6724, %v8439_v49  }
 0xa50   :  { %3625 = vperm.xlu1 %6725, %v8442_v43   ;;  %v6861_v28 = vpop.eup %6860  ;;  %v2720_v37 = vpop.permute.xlu1 %2719 }
 0xa51   :  { %v8479_v33 = vmul.f32 %v6861_v28, %v8301_v59  ;;  %v2768_v59 = vsel %vm504_vm6, %v2743_v27, %v2739_v60  ;;  %v2747_v15 = vrot.slane %v2720_v37, %v7308_v26 }
 0xa52   :  { %v6863_v56 = vpop.eup %6862 }
 0xa53   :  { %3616 = vperm.xlu0 %6724, %v8448_v41   ;;  %v8483_v48 = vmul.f32 %v6863_v56, %v8355_v12  ;;  %v2769_v12 = vsel %vm506_vm7, %v2747_v15, %v2768_v59 }
 0xa54   :  { %3628 = vperm.xlu1 %6725, %v8451_v10   ;;  %v2723_v11 = vpop.permute.xlu1 %2722 }
 0xa55   :  { %v2751_v62 = vrot.slane %v2723_v11, %v7308_v26 }
 0xa57   :  { %4055 = vperm.xlu0 %6724, %v8458_v30   ;;  %v2770_v21 = vsel %vm508_vm8, %v2751_v62, %v2769_v12 }
 0xa58   :  { %4070 = vperm.xlu1 %6725, %v8461_v51   ;;  %v2726_v17 = vpop.permute.xlu1 %2725 }
 0xa59   :  { %v2755_v34 = vrot.slane %v2726_v17, %v7308_v26 }
 0xa5b   :  { %3619 = vperm.xlu0 %6724, %v8467_v23   ;;  %v2771_v50 = vsel %vm510_vm9, %v2755_v34, %v2770_v21 }
 0xa5f   :  { %4061 = vperm.xlu0 %6724, %v8471_v5  }
 0xa63   :  { %4064 = vperm.xlu0 %6724, %v8475_v47  }
 0xa67   :  { %4067 = vperm.xlu0 %6724, %v8479_v33  }
 0xa6b   :  { %4073 = vperm.xlu0 %6724, %v8483_v48  }
 0xa7d   :  { %v2729_v0 = vpop.permute.xlu1 %2728 }
 0xa7e   :  { %v2759_v31 = vrot.slane %v2729_v0, %v7308_v26 }
 0xa80   :  { %v2772_v56 = vsel %vm512_vm10, %v2759_v31, %v2771_v50 }
 0xa81   :  { %v2732_v16 = vpop.permute.xlu1 %2731 }
 0xa82   :  { %v2763_v1 = vrot.slane %v2732_v16, %v7308_v26 }
 0xa84   :  { %v2773_v37 = vsel %vm514_vm11, %v2763_v1, %v2772_v56 }
 0xa8a   :  { %v3020_v45 = vpop.permute.xlu1 %3019 }
 0xa8b   :  { %v3045_v15 = vrot.slane %v3020_v45, %v7308_v26 }
 0xa8e   :  { %v3026_v18 = vpop.permute.xlu1 %3025 }
 0xa8f   :  { %v3053_v21 = vrot.slane %v3026_v18, %v7308_v26 }
 0xa92   :  { %v3032_v27 = vpop.permute.xlu1 %3031 }
 0xab2   :  { %v2735_v28 = vpop.permute.xlu0 %2734 }
 0xab3   :  { %v2767_v19 = vrot.slane %v2735_v28, %v7308_v26 }
 0xab5   :  { %v2774_v11 = vsel %vm516_vm12, %v2767_v19, %v2773_v37  ;;  %v3061_v19 = vrot.slane %v3032_v27, %v7308_v26 }
 0xab6   :  { %v3023_v17 = vpop.permute.xlu0 %3022  ;;  %v2776_v60 = vsel %vm520_vm14, %v2774_v11, 0.0 }
 0xab7   :  { %2777 = vadd.xlane.f32.xlu0 %v2776_v60  ;;  %v3049_v59 = vrot.slane %v3023_v17, %v7308_v26 }
 0xab9   :  { %v3074_v12 = vsel %vm504_vm6, %v3049_v59, %v3045_v15 }
 0xaba   :  { %v3029_v0 = vpop.permute.xlu0 %3028  ;;  %v3075_v31 = vsel %vm506_vm7, %v3053_v21, %v3074_v12 }
 0xabb   :  { %v3057_v62 = vrot.slane %v3029_v0, %v7308_v26 }
 0xabd   :  { %v3076_v50 = vsel %vm508_vm8, %v3057_v62, %v3075_v31 }
 0xabe   :  { %v3035_v16 = vpop.permute.xlu0 %3034  ;;  %v3077_v37 = vsel %vm510_vm9, %v3061_v19, %v3076_v50 }
 0xabf   :  { %v3608_v34 = vpop.permute.xlu1 %3607  ;;  %v3065_v28 = vrot.slane %v3035_v16, %v7308_v26 }
 0xac1   :  { %v3078_v17 = vsel %vm512_vm10, %v3065_v28, %v3077_v37  ;;  %v3633_v28 = vrot.slane %v3608_v34, %v7308_v26 }
 0xac2   :  { %v3038_v1 = vpop.permute.xlu0 %3037 }
 0xac3   :  { %v4053_v56 = vpop.permute.xlu1 %4052  ;;  %v3069_v45 = vrot.slane %v3038_v1, %v7308_v26 }
 0xac5   :  { %v3079_v18 = vsel %vm514_vm11, %v3069_v45, %v3078_v17 }
 0xac6   :  { %v3041_v11 = vpop.permute.xlu0 %3040 }
 0xac7   :  { %v3073_v60 = vrot.slane %v3041_v11, %v7308_v26  ;;  %v4059_v0 = vpop.permute.xlu1 %4058 }
 0xac9   :  { %v3080_v59 = vsel %vm516_vm12, %v3073_v60, %v3079_v18 }
 0xaca   :  { %v3611_v15 = vpop.permute.xlu0 %3610  ;;  %v3082_v16 = vsel %vm520_vm14, %v3080_v59, 0.0 }
 0xacb   :  { %3083 = vadd.xlane.f32.xlu1 %v3082_v16  ;;  %v3623_v27 = vpop.permute.xlu1 %3622  ;;  %v3637_v31 = vrot.slane %v3611_v15, %v7308_v26 }
 0xacc   :  { %v3653_v18 = vrot.slane %v3623_v27, %v7308_v26 }
 0xacd   :  { %v3662_v45 = vsel %vm504_vm6, %v3637_v31, %v3633_v28 }
 0xace   :  { %v3614_v12 = vpop.permute.xlu0 %3613 }
 0xacf   :  { %v3626_v21 = vpop.permute.xlu1 %3625  ;;  %v3641_v50 = vrot.slane %v3614_v12, %v7308_v26 }
 0xad0   :  { %v3657_v15 = vrot.slane %v3626_v21, %v7308_v26 }
 0xad1   :  { %v3663_v11 = vsel %vm506_vm7, %v3641_v50, %v3662_v45  ;;  %v4078_v45 = vrot.slane %v4053_v56, %v7308_v26 }
 0xad2   :  { %v3617_v62 = vpop.permute.xlu0 %3616 }
 0xad3   :  { %v3645_v19 = vrot.slane %v3617_v62, %v7308_v26  ;;  %v3629_v17 = vpop.permute.xlu1 %3628 }
 0xad4   :  { %v3661_v34 = vrot.slane %v3629_v17, %v7308_v26 }
 0xad5   :  { %v3664_v59 = vsel %vm508_vm8, %v3645_v19, %v3663_v11  ;;  %v4086_v11 = vrot.slane %v4059_v0, %v7308_v26 }
 0xad6   :  { %v4056_v1 = vpop.permute.xlu0 %4055 }
 0xad7   :  { %v4082_v31 = vrot.slane %v4056_v1, %v7308_v26 }
 0xad9   :  { %v4107_v21 = vsel %vm504_vm6, %v4082_v31, %v4078_v45 }
 0xada   :  { %v3620_v37 = vpop.permute.xlu0 %3619  ;;  %v4108_v1 = vsel %vm506_vm7, %v4086_v11, %v4107_v21 }
 0xadb   :  { %v3649_v60 = vrot.slane %v3620_v37, %v7308_v26 }
 0xadd   :  { %v3665_v16 = vsel %vm510_vm9, %v3649_v60, %v3664_v59 }
 0xade   :  { %v4062_v12 = vpop.permute.xlu0 %4061  ;;  %v3666_v62 = vsel %vm512_vm10, %v3653_v18, %v3665_v16  ;;  %v4071_v18 = vpop.permute.xlu1 %4070 }
 0xadf   :  { %v3667_v50 = vsel %vm514_vm11, %v3657_v15, %v3666_v62  ;;  %v4090_v37 = vrot.slane %v4062_v12, %v7308_v26 }
 0xae0   :  { %v3668_v28 = vsel %vm516_vm12, %v3661_v34, %v3667_v50  ;;  %v4102_v34 = vrot.slane %v4071_v18, %v7308_v26 }
 0xae1   :  { %v3670_v27 = vsel %vm520_vm14, %v3668_v28, 0.0  ;;  %v4109_v59 = vsel %vm508_vm8, %v4090_v37, %v4108_v1 }
 0xae2   :  { %3671 = vadd.xlane.f32.xlu0 %v3670_v27  ;;  %v4065_v19 = vpop.permute.xlu0 %4064 }
 0xae3   :  { %v4094_v17 = vrot.slane %v4065_v19, %v7308_v26 }
 0xae5   :  { %v4110_v15 = vsel %vm510_vm9, %v4094_v17, %v4109_v59 }
 0xae6   :  { %v4068_v60 = vpop.permute.xlu0 %4067 }
 0xae7   :  { %v4098_v56 = vrot.slane %v4068_v60, %v7308_v26 }
 0xae9   :  { %v4111_v16 = vsel %vm512_vm10, %v4098_v56, %v4110_v15 }
 0xaea   :  { %v4074_v62 = vpop.permute.xlu0 %4073  ;;  %v4112_v0 = vsel %vm514_vm11, %v4102_v34, %v4111_v16 }
 0xaeb   :  { %v4106_v12 = vrot.slane %v4074_v62, %v7308_v26 }
 0xaed   :  { %v4113_v31 = vsel %vm516_vm12, %v4106_v12, %v4112_v0 }
 0xaee   :  { %v4115_v50 = vsel %vm520_vm14, %v4113_v31, 0.0 }
 0xaef   :  { %4116 = vadd.xlane.f32.xlu1 %v4115_v50 }
 0xb44   :  { %v2778_v28 = vpop.xlane.xlu0 %2777 }
 0xb45   :  { %6864 = vrcp.f32 %v2778_v28 }
 0xb4f   :  { %v6865_v45 = vpop.eup %6864 }
 0xb50   :  { %v2788_v27 = vrot.slane %v6865_v45, %v7151_v38  ;;  %v2784_v19 = vrot.slane %v6865_v45, %v7145_v36  ;;  %v2792_v11 = vrot.slane %v6865_v45, %v7278_v7  ;;  %v2800_v17 = vrot.slane %v6865_v45, %v7298_v20 }
 0xb51   :  { %v2796_v18 = vrot.slane %v6865_v45, %v7283_v9  ;;  %v2804_v59 = vrot.slane %v6865_v45, %v7288_v13  ;;  %v2812_v15 = vrot.slane %v6865_v45, %v7436_v22  ;;  %v2808_v16 = vrot.slane %v6865_v45, %v7475_v58 }
 0xb52   :  { %v2822_v21 = vmul.f32 %v2788_v27, %v8262_v53  ;;  %v2821_v37 = vmul.f32 %v2784_v19, %v8274_v54  ;;  %v2823_v1 = vmul.f32 %v2792_v11, %v8268_v6  ;;  %v2825_v60 = vmul.f32 %v2800_v17, %v8282_v4 }
 0xb53   :  { %v2824_v53 = vmul.f32 %v2796_v18, %v8277_v61  ;;  %v2826_v54 = vmul.f32 %v2804_v59, %v8304_v32  ;;  %v2828_v6 = vmul.f32 %v2812_v15, %v8361_v55  ;;  %v2827_v4 = vmul.f32 %v2808_v16, %v8311_v29 }
 0xb54   :  { %3294 = vperm.xlu0 %6724, %v2822_v21   ;;  %3291 = vperm.xlu1 %6725, %v2821_v37  }
 0xb58   :  { %v3084_v56 = vpop.xlane.xlu1 %3083  ;;  %3297 = vperm.xlu0 %6724, %v2823_v1   ;;  %3303 = vperm.xlu1 %6725, %v2825_v60  }
 0xb59   :  { %6866 = vrcp.f32 %v3084_v56 }
 0xb5c   :  { %3300 = vperm.xlu0 %6724, %v2824_v53   ;;  %3306 = vperm.xlu1 %6725, %v2826_v54  }
 0xb60   :  { %3312 = vperm.xlu0 %6724, %v2828_v6   ;;  %3309 = vperm.xlu1 %6725, %v2827_v4  }
 0xb63   :  { %v6867_v34 = vpop.eup %6866 }
 0xb64   :  { %v3090_v62 = vrot.slane %v6867_v34, %v7145_v36  ;;  %v3094_v12 = vrot.slane %v6867_v34, %v7151_v38  ;;  %v3102_v0 = vrot.slane %v6867_v34, %v7283_v9  ;;  %v3098_v31 = vrot.slane %v6867_v34, %v7278_v7 }
 0xb65   :  { %v3110_v50 = vrot.slane %v6867_v34, %v7288_v13  ;;  %v3106_v28 = vrot.slane %v6867_v34, %v7298_v20  ;;  %v3114_v45 = vrot.slane %v6867_v34, %v7475_v58 }
 0xb66   :  { %v3127_v61 = vmul.f32 %v3090_v62, %v8315_v46  ;;  %v3128_v32 = vmul.f32 %v3094_v12, %v8371_v3  ;;  %v3130_v55 = vmul.f32 %v3102_v0, %v8381_v8  ;;  %v3129_v29 = vmul.f32 %v3098_v31, %v8319_v42 }
 0xb67   :  { %v3132_v46 = vmul.f32 %v3110_v50, %v8393_v52  ;;  %v3131_v3 = vmul.f32 %v3106_v28, %v8323_v14  ;;  %v3133_v8 = vmul.f32 %v3114_v45, %v8405_v25  ;;  %v3118_v42 = vrot.slane %v6867_v34, %v7436_v22 }
 0xb68   :  { %3144 = vperm.xlu0 %6724, %v3127_v61   ;;  %3147 = vperm.xlu1 %6725, %v3128_v32   ;;  %v6540_v32 = vld [vmem:[%s9540_s8 + $0x8] sm:$0xff] }
 0xb69   :  { %v3134_v19 = vmul.f32 %v3118_v42, %v8417_v57  ;;  %vm4317_vm2 = vcmp.gt.f32.partialorder %v6540_v32, 0.0 }
 0xb6c   :  { %3153 = vperm.xlu0 %6724, %v3130_v55   ;;  %3150 = vperm.xlu1 %6725, %v3129_v29  }
 0xb6f   :  { %v3672_v27 = vpop.xlane.xlu0 %3671 }
 0xb70   :  { %6868 = vrcp.f32 %v3672_v27  ;;  %3159 = vperm.xlu0 %6724, %v3132_v46   ;;  %3156 = vperm.xlu1 %6725, %v3131_v3  }
 0xb74   :  { %3162 = vperm.xlu1 %6725, %v3133_v8  }
 0xb78   :  { %3165 = vperm.xlu1 %6725, %v3134_v19  }
 0xb7a   :  { %v6869_v21 = vpop.eup %6868 }
 0xb7b   :  { %v3682_v37 = vrot.slane %v6869_v21, %v7151_v38  ;;  %v3678_v52 = vrot.slane %v6869_v21, %v7145_v36  ;;  %v3686_v1 = vrot.slane %v6869_v21, %v7278_v7  ;;  %v3690_v57 = vrot.slane %v6869_v21, %v7283_v9 }
 0xb7c   :  { %v4117_v14 = vpop.xlane.xlu1 %4116  ;;  %v3694_v53 = vrot.slane %v6869_v21, %v7298_v20  ;;  %v3698_v16 = vrot.slane %v6869_v21, %v7288_v13  ;;  %v3702_v4 = vrot.slane %v6869_v21, %v7475_v58  ;;  %v3706_v62 = vrot.slane %v6869_v21, %v7436_v22 }
 0xb7d   :  { %6870 = vrcp.f32 %v4117_v14  ;;  %v3716_v11 = vmul.f32 %v3682_v37, %v8428_v35  ;;  %v3715_v17 = vmul.f32 %v3678_v52, %v8397_v44  ;;  %v3717_v25 = vmul.f32 %v3686_v1, %v8439_v49 }
 0xb7e   :  { %v3718_v60 = vmul.f32 %v3690_v57, %v8448_v41  ;;  %v3719_v49 = vmul.f32 %v3694_v53, %v8467_v23 }
 0xb7f   :  { %3735 = vperm.xlu0 %6724, %v3716_v11   ;;  %3732 = vperm.xlu1 %6725, %v3715_v17  }
 0xb83   :  { %3738 = vperm.xlu0 %6724, %v3717_v25  }
 0xb87   :  { %v6871_v18 = vpop.eup %6870  ;;  %3741 = vperm.xlu0 %6724, %v3718_v60  }
 0xb88   :  { %v4127_v59 = vrot.slane %v6871_v18, %v7151_v38  ;;  %v4123_v56 = vrot.slane %v6871_v18, %v7145_v36  ;;  %v4131_v54 = vrot.slane %v6871_v18, %v7278_v7  ;;  %v4135_v15 = vrot.slane %v6871_v18, %v7283_v9 }
 0xb89   :  { %v4139_v6 = vrot.slane %v6871_v18, %v7298_v20  ;;  %v4143_v34 = vrot.slane %v6871_v18, %v7288_v13  ;;  %v4151_v12 = vrot.slane %v6871_v18, %v7436_v22  ;;  %v4147_v61 = vrot.slane %v6871_v18, %v7475_v58 }
 0xb8a   :  { %v4161_v35 = vmul.f32 %v4127_v59, %v8458_v30  ;;  %v4160_v44 = vmul.f32 %v4123_v56, %v8409_v39  ;;  %v4162_v41 = vmul.f32 %v4131_v54, %v8420_v40  ;;  %v4163_v30 = vmul.f32 %v4135_v15, %v8471_v5 }
 0xb8b   :  { %v3720_v39 = vmul.f32 %v3698_v16, %v8431_v2  ;;  %v4164_v23 = vmul.f32 %v4139_v6, %v8475_v47  ;;  %v3721_v40 = vmul.f32 %v3702_v4, %v8442_v43  ;;  %v4165_v5 = vmul.f32 %v4143_v34, %v8479_v33 }
 0xb8c   :  { %4180 = vperm.xlu0 %6724, %v4161_v35   ;;  %4177 = vperm.xlu1 %6725, %v4160_v44   ;;  %v3722_v2 = vmul.f32 %v3706_v62, %v8451_v10  ;;  %v4167_v47 = vmul.f32 %v4151_v12, %v8483_v48  ;;  %v4166_v43 = vmul.f32 %v4147_v61, %v8461_v51  ;;  %v4318_v10 = vsel %vm4317_vm2, 1, %v9586_v63 }
 0xb90   :  { %3744 = vperm.xlu0 %6724, %v3719_v49   ;;  %4183 = vperm.xlu1 %6725, %v4162_v41  }
 0xb94   :  { %4186 = vperm.xlu0 %6724, %v4163_v30   ;;  %3747 = vperm.xlu1 %6725, %v3720_v39  }
 0xb98   :  { %4189 = vperm.xlu0 %6724, %v4164_v23   ;;  %3750 = vperm.xlu1 %6725, %v3721_v40  }
 0xb9c   :  { %4192 = vperm.xlu0 %6724, %v4165_v5   ;;  %3753 = vperm.xlu1 %6725, %v3722_v2  }
 0xba0   :  { %4198 = vperm.xlu0 %6724, %v4167_v47   ;;  %4195 = vperm.xlu1 %6725, %v4166_v43  }
 0xba4   :  { %3794 = vrot.lane.b32.xlu0 %v7969_v24, %s6982_s23  ;;  %3207 = vrot.lane.b32.xlu1 %v7969_v24, %s6981_s22 }
 0xba8   :  { %4320 = vperm.xlu0 %6724, %v4318_v10   ;;  %4239 = vrot.lane.b32.xlu1 %v7969_v24, %s6983_s24 }
 0xbd3   :  { %v3292_v51 = vpop.permute.xlu1 %3291  ;;  %v3295_v33 = vpop.permute.xlu0 %3294 }
 0xbd4   :  { %v3317_v57 = vrot.slane %v3292_v51, %v7308_v26  ;;  %v3321_v60 = vrot.slane %v3295_v33, %v7308_v26 }
 0xbd6   :  { %v3346_v49 = vsel %vm504_vm6, %v3321_v60, %v3317_v57 }
 0xbd7   :  { %v3304_v48 = vpop.permute.xlu1 %3303  ;;  %v3298_v0 = vpop.permute.xlu0 %3297 }
 0xbd8   :  { %v3325_v56 = vrot.slane %v3298_v0, %v7308_v26  ;;  %v3333_v4 = vrot.slane %v3304_v48, %v7308_v26 }
 0xbda   :  { %v3347_v16 = vsel %vm506_vm7, %v3325_v56, %v3346_v49  ;;  %v9597_v49 = vmov 0.0  }
 0xbdb   :  { %v3307_v31 = vpop.permute.xlu1 %3306  ;;  %v3301_v55 = vpop.permute.xlu0 %3300 }
 0xbdc   :  { %v3329_v35 = vrot.slane %v3301_v55, %v7308_v26  ;;  %v3337_v47 = vrot.slane %v3307_v31, %v7308_v26 }
 0xbde   :  { %v3348_v30 = vsel %vm508_vm8, %v3329_v35, %v3347_v16 }
 0xbdf   :  { %v8624_v29 = vpop.permute.xlu1 %3309  ;;  %v8626_v50 = vpop.permute.xlu0 %3312  ;;  %v3349_v12 = vsel %vm510_vm9, %v3333_v4, %v3348_v30 }
 0xbe0   :  { %v3341_v51 = vrot.slane %v8624_v29, %v7308_v26  ;;  %v3350_v55 = vsel %vm512_vm10, %v3337_v47, %v3349_v12 }
 0xbe2   :  { %v3351_v57 = vsel %vm514_vm11, %v3341_v51, %v3350_v55  ;;  %v6949_v55 = vld [vmem:[%s9538_s6] ss:$0 sm:$0xff] }
 0xbe7   :  { %v3148_v28 = vpop.permute.xlu1 %3147  ;;  %v3145_v46 = vpop.permute.xlu0 %3144 }
 0xbe8   :  { %v3174_v44 = vrot.slane %v3148_v28, %v7308_v26  ;;  %v3170_v53 = vrot.slane %v3145_v46, %v7308_v26 }
 0xbea   :  { %v3199_v39 = vsel %vm504_vm6, %v3174_v44, %v3170_v53 }
 0xbeb   :  { %v3151_v3 = vpop.permute.xlu1 %3150  ;;  %v3154_v45 = vpop.permute.xlu0 %3153 }
 0xbec   :  { %v3178_v54 = vrot.slane %v3151_v3, %v7308_v26  ;;  %v3182_v6 = vrot.slane %v3154_v45, %v7308_v26 }
 0xbee   :  { %v3200_v23 = vsel %vm506_vm7, %v3178_v54, %v3199_v39 }
 0xbef   :  { %v3157_v27 = vpop.permute.xlu1 %3156  ;;  %v3160_v8 = vpop.permute.xlu0 %3159  ;;  %v3201_v43 = vsel %vm508_vm8, %v3182_v6, %v3200_v23  ;;  %v9598_v23 = vld [vmem:[#allocation5_spill] sm:$0xff] }
 0xbf0   :  { %v3186_v40 = vrot.slane %v3157_v27, %v7308_v26  ;;  %v3190_v32 = vrot.slane %v3160_v8, %v7308_v26 }
 0xbf2   :  { %v3202_v33 = vsel %vm510_vm9, %v3186_v40, %v3201_v43  ;;  %v9599_v40 = vld [vmem:[#allocation6_spill] sm:$0xff] }
 0xbf3   :  { %v3163_v42 = vpop.permute.xlu1 %3162 }
 0xbf4   :  { %v3194_v48 = vrot.slane %v3163_v42, %v7308_v26 }
 0xbf7   :  { %v8628_v37 = vpop.permute.xlu1 %3165 }
 0xbf8   :  { %v3198_v31 = vrot.slane %v8628_v37, %v7308_v26 }
 0xbfe   :  { %v3736_v19 = vpop.permute.xlu0 %3735  ;;  %v3733_v14 = vpop.permute.xlu1 %3732 }
 0xbff   :  { %v3758_v34 = vrot.slane %v3733_v14, %v7308_v26  ;;  %v3762_v62 = vrot.slane %v3736_v19, %v7308_v26  ;;  %v3203_v19 = vsel %vm512_vm10, %v3190_v32, %v3202_v33  ;;  %v3345_v14 = vrot.slane %v8626_v50, %v7308_v26 }
 0xc01   :  { %v3787_v28 = vsel %vm504_vm6, %v3762_v62, %v3758_v34  ;;  %v3352_v4 = vsel %vm516_vm12, %v3345_v14, %v3351_v57  ;;  %v9600_v34 = vld [vmem:[#allocation7_spill] sm:$0xff] }
 0xc02   :  { %v3739_v21 = vpop.permute.xlu0 %3738 }
 0xc03   :  { %v3766_v61 = vrot.slane %v3739_v21, %v7308_v26 }
 0xc05   :  { %v3788_v27 = vsel %vm506_vm7, %v3766_v61, %v3787_v28 }
 0xc06   :  { %v3742_v52 = vpop.permute.xlu0 %3741 }
 0xc07   :  { %v3770_v10 = vrot.slane %v3742_v52, %v7308_v26 }
 0xc09   :  { %v3789_v21 = vsel %vm508_vm8, %v3770_v10, %v3788_v27  ;;  %v6546_v27 = vld [vmem:[%s9539_s7 + $0x8] sm:$0xf] }
 0xc0b   :  { %v8630_v11 = vpop.permute.xlu1 %4177  ;;  %v4181_v17 = vpop.permute.xlu0 %4180 }
 0xc0c   :  { %v4203_v29 = vrot.slane %v8630_v11, %v7308_v26  ;;  %v4207_v8 = vrot.slane %v4181_v17, %v7308_v26 }
 0xc0e   :  { %v4232_v44 = vsel %vm504_vm6, %v4207_v8, %v4203_v29  ;;  %v8735_v29 = vunpack.c.l.bf16 %v6546_v27 }
 0xc0f   :  { %v8632_v1 = vpop.permute.xlu1 %4183  ;;  %v3745_v25 = vpop.permute.xlu0 %3744 }
 0xc10   :  { %v3774_v0 = vrot.slane %v3745_v25, %v7308_v26  ;;  %v4211_v37 = vrot.slane %v8632_v1, %v7308_v26  ;;  %v3204_v25 = vsel %vm514_vm11, %v3194_v48, %v3203_v19  ;;  %v4678_v8 = vrot.slane %v8735_v29, %v7151_v38 }
 0xc11   :  { %v3205_v35 = vsel %vm516_vm12, %v3198_v31, %v3204_v25  ;;  %v4685_v19 = vrot.slane %v8735_v29, %v7278_v7  ;;  %v9605_v25 = vld [vmem:[#allocation12_spill] sm:$0xff]  ;;  %vm4549_vm13 = vcmp.gt.f32.partialorder %v8735_v29, 0.0 }
 0xc12   :  { %v3790_v11 = vsel %vm510_vm9, %v3774_v0, %v3789_v21  ;;  %4680 = vbcast.lane.b32.xlu1 %v4678_v8, 256 }
 0xc13   :  { %v3748_v18 = vpop.permute.xlu1 %3747  ;;  %v8636_v59 = vpop.permute.xlu0 %4186 }
 0xc14   :  { %v3778_v46 = vrot.slane %v3748_v18, %v7308_v26  ;;  %v4215_v17 = vrot.slane %v8636_v59, %v7308_v26  ;;  %v4233_v59 = vsel %vm506_vm7, %v4211_v37, %v4232_v44 }
 0xc16   :  { %v3791_v60 = vsel %vm512_vm10, %v3778_v46, %v3790_v11  ;;  %4687 = vbcast.lane.b32.xlu1 %v4685_v19, 256 }
 0xc17   :  { %v3751_v41 = vpop.permute.xlu1 %3750  ;;  %v4190_v15 = vpop.permute.xlu0 %4189 }
 0xc18   :  { %v3782_v42 = vrot.slane %v3751_v41, %v7308_v26  ;;  %v4219_v18 = vrot.slane %v4190_v15, %v7308_v26  ;;  %v4234_v15 = vsel %vm508_vm8, %v4215_v17, %v4233_v59 }
 0xc1a   :  { %v3792_v50 = vsel %vm514_vm11, %v3782_v42, %v3791_v60  ;;  %v4235_v16 = vsel %vm510_vm9, %v4219_v18, %v4234_v15  ;;  %v4671_v42 = vrot.slane %v8735_v29, %v7145_v36 }
 0xc1b   :  { %v3754_v5 = vpop.permute.xlu1 %3753  ;;  %v4193_v2 = vpop.permute.xlu0 %4192 }
 0xc1c   :  { %v3786_v52 = vrot.slane %v3754_v5, %v7308_v26  ;;  %v4223_v53 = vrot.slane %v4193_v2, %v7308_v26  ;;  %v9601_v5 = vld [vmem:[#allocation8_spill] sm:$0xff]  ;;  %4673 = vbcast.lane.b32.xlu0 %v4671_v42, 256 }
 0xc1e   :  { %v3793_v41 = vsel %vm516_vm12, %v3786_v52, %v3792_v50  ;;  %v4236_v39 = vsel %vm512_vm10, %v4223_v53, %v4235_v16  ;;  %v9604_v52 = vld [vmem:[#allocation11_spill] sm:$0xff] }
 0xc1f   :  { %v4196_v3 = vpop.permute.xlu1 %4195  ;;  %v4199_v45 = vpop.permute.xlu0 %4198 }
 0xc20   :  { %v4227_v54 = vrot.slane %v4196_v3, %v7308_v26  ;;  %v4231_v6 = vrot.slane %v4199_v45, %v7308_v26  ;;  %v9602_v3 = vld [vmem:[#allocation14_spill] sm:$0xff] }
 0xc23   :  { %v3208_v56 = vpop.permute.xlu1 %3207  ;;  %v3795_v1 = vpop.permute.xlu0 %3794 }
 0xc24   :  { %6617 = vmatpush3.msra.mxu0 %v3208_v56  ;;  %6627 = vmatpush3.msra.mxu1 %v3795_v1  ;;  %v9606_v56 = vld [vmem:[#allocation10_spill] sm:$0xff] }
 0xc25   :  { %6619 = vmatmul.mubr.msk.f32.vlgmr.msra.gmra.mrb[6].mxu0 %vm520_vm14, %v3205_v35  ;;  %6621 = vmatprep.subr.mxu0 %v9597_v49 }
 0xc26   :  { %6629 = vmatmul.mubr.msk.f32.vlgmr.msra.gmra.mrb[10].mxu1 %vm520_vm14, %v3793_v41  ;;  %6622 = vmatpush3.msra.mxu0 %v7969_v24  ;;  %v4237_v24 = vsel %vm514_vm11, %v4227_v54, %v4236_v39 }
 0xc27   :  { %v4240_v30 = vpop.permute.xlu1 %4239  ;;  %6623 = vmatprep.mubr.msk.f32.mxu0 %vm6978_vm3, %v9597_v49  ;;  %6631 = vmatprep.subr.mxu0 %v9597_v49  ;;  %v4238_v62 = vsel %vm516_vm12, %v4231_v6, %v4237_v24  ;;  %v4321_v28 = vpop.permute.xlu0 %4320  ;;  %v8760_v6 = vld [vmem:[%s9537_s5] ss:$0 sm:$0xff] }
 0xc28   :  { %6701 = vmatprep.subr.bf16.mxu1 %v9598_v23  ;;  %4396 = vmatprep.mubr.f32.mxu1 %v9597_v49  ;;  %vm4322_vm4 = vcmp.eq.s32.totalorder %v4321_v28, 1 }
 0xc29   :  { %6624 = vmatmul.mubr.msk.f32.vlgmr.msra.gmra.mrb[8].mxu0 %vm520_vm14, %v3352_v4  ;;  %6703 = vmatpush1.bf16.msra.mxu1 %v9599_v40 }
 0xc2a   :  { %6632 = vmatpush3.msra.mxu0 %v4240_v30  ;;  %6633 = vmatprep.mubr.msk.f32.mxu0 %vm6978_vm3, %v9597_v49 }
 0xc2b   :  { %6705 = vmatprep.subr.bf16.mxu1 %v9600_v34  ;;  %6636 = vmatprep.subr.mxu0 %v9597_v49 }
 0xc2d   :  { %6634 = vmatmul.mubr.msk.f32.vlgmr.msra.gmra.mrb[10].mxu0 %vm520_vm14, %v4238_v62  ;;  %6707 = vmatpush1.bf16.msra.mxu1 %v9601_v5 }
 0xc2e   :  { %6646 = vmatprep.subr.mxu1 %v9597_v49  ;;  %6638 = vmatprep.mubr.msk.f32.mxu0 %vm6978_vm3, %v9597_v49 }
 0xcf8   :  { %v3278_v2 = vpop.f32.mrb[6].mxu0 }
 0xcf9   :  { %v3865_v12 = vpop.f32.mrb[10].mxu1  ;;  %v6620_v61 = vpop.f32.mrb[7].mxu0 }
 0xcfa   :  { %v6630_v47 = vpop.f32.mrb[11].mxu1 }
 0xcfc   :  { %v3421_v43 = vpop.f32.mrb[8].mxu0 }
 0xcfd   :  { %v3422_v32 = vadd.f32 %v3421_v43, %v3278_v2  ;;  %v6625_v10 = vpop.f32.mrb[9].mxu0 }
 0xcff   :  { %v3869_v51 = vadd.f32 %v3865_v12, %v3422_v32 }
 0xd00   :  { %v4310_v33 = vpop.f32.mrb[10].mxu0 }
 0xd01   :  { %v4314_v48 = vadd.f32 %v4310_v33, %v3869_v51  ;;  %v6635_v0 = vpop.f32.mrb[11].mxu0 }
 0xd03   :  { %v4315_v31 = vadd.f32 %v6949_v55, %v4314_v48 }
 0xd05   :  { %6872 = vtanh.f32 %v4315_v31 }
 0xd0f   :  { %v6873_v46 = vpop.eup %6872 }
 0xd10   :  { %v8726_v45 = vsel %vm4322_vm4, %v6873_v46, %v9602_v3 }
 0xd11   :  { %9603 = vst [vmem:[#allocation13_spill] sm:$0xff] %v8726_v45  ;;  %6548 = vmatmul.mubr.msk.f32.vlgmr.msra.gmra.mrb[12].mxu1 %vm160_vm5, %v8726_v45 }
 0xd12   :  { %6648 = vmatprep.mubr.msk.f32.mxu1 %vm6978_vm3, %v9597_v49 }
 0xde4   :  { %v4398_v21 = vpop.f32.mrb[12].mxu1 }
 0xde5   :  { %v4400_v37 = vpop.f32.mrb[13].mxu1  ;;  %v8748_v1 = vadd.f32 %v4398_v21, %v9606_v56 }
 0xde6   :  { %v4401_v14 = vadd.f32 %v4400_v37, %v9604_v52 }
 0xde8   :  { %v4411_v11 = vrot.slane %v4401_v14, %v9605_v25  ;;  %v4404_v60 = vcombine.high %v4401_v14, %v4401_v14 }
 0xdea   :  { %v4419_v17 = vcombine.high %v4411_v11, %v4411_v11  ;;  %v4427_v57 = vrot.slane %v4411_v11, %v9605_v25  ;;  %v4418_v50 = vrot.slane %v4404_v60, %v9605_v25 }
 0xdec   :  { %v4441_v18 = vrot.slane %v4419_v17, %v9605_v25  ;;  %v4456_v35 = vrot.slane %v4427_v57, %v7145_v36  ;;  %v4449_v53 = vcombine.high %v4427_v57, %v4427_v57  ;;  %v4434_v15 = vrot.slane %v4418_v50, %v9605_v25 }
 0xded   :  { %v4420_v33 = vcombine.high %v4418_v50, %v4418_v50 }
 0xdee   :  { %v4460_v44 = vrot.slane %v4441_v18, %v7145_v36  ;;  %v4493_v59 = vadd.f32 %v4456_v35, %v8748_v1  ;;  %v4464_v16 = vrot.slane %v4449_v53, %v7145_v36  ;;  %v4472_v24 = vrot.slane %v4434_v15, %v7145_v36  ;;  %v8808_v53 = vpop.permute.xlu1 %4680 }
 0xdef   :  { %v4450_v48 = vcombine.high %v4434_v15, %v4434_v15  ;;  %v4451_v55 = vcombine.high %v4441_v18, %v4441_v18  ;;  %v4448_v31 = vrot.slane %v4420_v33, %v9605_v25 }
 0xdf0   :  { %v4494_v54 = vadd.f32 %v4460_v44, %v8748_v1  ;;  %v4501_v41 = vmul.f32 0.2, %v4493_v59  ;;  %v4495_v40 = vadd.f32 %v4464_v16, %v8748_v1  ;;  %v4497_v62 = vadd.f32 %v4472_v24, %v8748_v1 }
 0xdf1   :  { %v4480_v28 = vrot.slane %v4450_v48, %v7145_v36  ;;  %v4468_v46 = vrot.slane %v4451_v55, %v7145_v36  ;;  %v4476_v3 = vrot.slane %v4448_v31, %v7145_v36  ;;  %v4452_v37 = vcombine.high %v4448_v31, %v4448_v31 }
 0xdf2   :  { %v4509_v30 = vmax.f32 %v4493_v59, %v4501_v41  ;;  %v4502_v39 = vmul.f32 0.2, %v4494_v54  ;;  %v4503_v5 = vmul.f32 0.2, %v4495_v40  ;;  %v4505_v12 = vmul.f32 0.2, %v4497_v62  ;;  %v8810_v59 = vpop.permute.xlu0 %4673 }
 0xdf3   :  { %v4499_v27 = vadd.f32 %v4480_v28, %v8748_v1  ;;  %v4496_v8 = vadd.f32 %v4468_v46, %v8748_v1  ;;  %v4498_v19 = vadd.f32 %v4476_v3, %v8748_v1  ;;  %v4484_v11 = vrot.slane %v4452_v37, %v7145_v36 }
 0xdf4   :  { %v4517_v4 = vmul.f32 %v8760_v6, %v4509_v30  ;;  %v4510_v23 = vmax.f32 %v4494_v54, %v4502_v39  ;;  %v4511_v2 = vmax.f32 %v4495_v40, %v4503_v5  ;;  %v4513_v47 = vmax.f32 %v4497_v62, %v4505_v12  ;;  %v8812_v54 = vpop.permute.xlu1 %4687 }
 0xdf5   :  { %v4507_v42 = vmul.f32 0.2, %v4499_v27  ;;  %v4504_v21 = vmul.f32 0.2, %v4496_v8  ;;  %v4506_v14 = vmul.f32 0.2, %v4498_v19  ;;  %v4500_v56 = vadd.f32 %v4484_v11, %v8748_v1 }
 0xdf6   :  { %4873 = vrot.lane.b32.xlu1 %v4517_v4, %s6981_s22  ;;  %v4518_v34 = vmul.f32 %v8760_v6, %v4510_v23  ;;  %v4519_v61 = vmul.f32 %v8760_v6, %v4511_v2  ;;  %v4521_v43 = vmul.f32 %v8760_v6, %v4513_v47  ;;  %v4525_v32 = vsel %vm160_vm5, %v4517_v4, 0.0 }
 0xdf7   :  { %v4515_v52 = vmax.f32 %v4499_v27, %v4507_v42  ;;  %v4512_v25 = vmax.f32 %v4496_v8, %v4504_v21  ;;  %v4514_v57 = vmax.f32 %v4498_v19, %v4506_v14  ;;  %v4508_v35 = vmul.f32 0.2, %v4500_v56 }
 0xdf8   :  { %4875 = vrot.lane.b32.xlu0 %v4518_v34, %s6981_s22  ;;  %v4528_v10 = vsel %vm160_vm5, %v4518_v34, 0.0  ;;  %v4531_v51 = vsel %vm160_vm5, %v4519_v61, 0.0  ;;  %v4537_v0 = vsel %vm160_vm5, %v4521_v43, 0.0 }
 0xdf9   :  { %v4523_v17 = vmul.f32 %v8760_v6, %v4515_v52  ;;  %v4520_v60 = vmul.f32 %v8760_v6, %v4512_v25  ;;  %v4522_v18 = vmul.f32 %v8760_v6, %v4514_v57  ;;  %v4516_v44 = vmax.f32 %v4500_v56, %v4508_v35 }
 0xdfa   :  { %5461 = vrot.lane.b32.xlu1 %v4517_v4, %s6982_s23 }
 0xdfb   :  { %v4524_v50 = vmul.f32 %v8760_v6, %v4516_v44  ;;  %v4534_v41 = vsel %vm160_vm5, %v4520_v60, 0.0  ;;  %v4540_v39 = vsel %vm160_vm5, %v4522_v18, 0.0  ;;  %v4543_v23 = vsel %vm160_vm5, %v4523_v17, 0.0 }
 0xdfc   :  { %5463 = vrot.lane.b32.xlu0 %v4518_v34, %s6982_s23 }
 0xdfd   :  { %v4546_v16 = vsel %vm160_vm5, %v4524_v50, 0.0 }
 0xdfe   :  { %5906 = vrot.lane.b32.xlu1 %v4517_v4, %s6983_s24 }
 0xe00   :  { %5908 = vrot.lane.b32.xlu0 %v4518_v34, %s6983_s24 }
 0xe04   :  { %5910 = vrot.lane.b32.xlu0 %v4519_v61, %s6983_s24 }
 0xe08   :  { %5914 = vrot.lane.b32.xlu0 %v4521_v43, %s6983_s24 }
 0xe22   :  { %4526 = vadd.xlane.f32.xlu1 %v4525_v32 }
 0xe27   :  { %4529 = vadd.xlane.f32.xlu0 %v4528_v10 }
 0xe2b   :  { %4532 = vadd.xlane.f32.xlu0 %v4531_v51 }
 0xe2f   :  { %4538 = vadd.xlane.f32.xlu0 %v4537_v0 }
 0xe33   :  { %4877 = vrot.lane.b32.xlu1 %v4519_v61, %s6981_s22 }
 0xe37   :  { %4881 = vrot.lane.b32.xlu1 %v4521_v43, %s6981_s22 }
 0xe3b   :  { %5465 = vrot.lane.b32.xlu1 %v4519_v61, %s6982_s23 }
 0xe3f   :  { %5469 = vrot.lane.b32.xlu1 %v4521_v43, %s6982_s23 }
 0xe43   :  { %4885 = vrot.lane.b32.xlu1 %v4523_v17, %s6981_s22 }
 0xe45   :  { %4879 = vrot.lane.b32.xlu0 %v4520_v60, %s6981_s22 }
 0xe47   :  { %5471 = vrot.lane.b32.xlu1 %v4522_v18, %s6982_s23 }
 0xe49   :  { %4883 = vrot.lane.b32.xlu0 %v4522_v18, %s6981_s22 }
 0xe4b   :  { %5473 = vrot.lane.b32.xlu1 %v4523_v17, %s6982_s23 }
 0xe4d   :  { %5467 = vrot.lane.b32.xlu0 %v4520_v60, %s6982_s23 }
 0xe4f   :  { %5918 = vrot.lane.b32.xlu1 %v4523_v17, %s6983_s24 }
 0xe51   :  { %5912 = vrot.lane.b32.xlu0 %v4520_v60, %s6983_s24 }
 0xe53   :  { %5475 = vrot.lane.b32.xlu1 %v4524_v50, %s6982_s23 }
 0xe55   :  { %5916 = vrot.lane.b32.xlu0 %v4522_v18, %s6983_s24 }
 0xe68   :  { %v4874_v30 = vpop.permute.xlu1 %4873 }
 0xe69   :  { %v4897_v6 = vsel %vm160_vm5, %v4874_v30, 0.0 }
 0xe6a   :  { %v4876_v15 = vpop.permute.xlu0 %4875 }
 0xe6b   :  { %v4900_v48 = vsel %vm160_vm5, %v4876_v15, 0.0 }
 0xe6c   :  { %v5462_v34 = vpop.permute.xlu1 %5461 }
 0xe6d   :  { %v5485_v43 = vsel %vm160_vm5, %v5462_v34, 0.0 }
 0xe6e   :  { %v5464_v4 = vpop.permute.xlu0 %5463 }
 0xe6f   :  { %v5488_v24 = vsel %vm160_vm5, %v5464_v4, 0.0 }
 0xe70   :  { %v5907_v5 = vpop.permute.xlu1 %5906 }
 0xe71   :  { %v5930_v10 = vsel %vm160_vm5, %v5907_v5, 0.0 }
 0xe72   :  { %v5909_v40 = vpop.permute.xlu0 %5908 }
 0xe73   :  { %v5933_v46 = vsel %vm160_vm5, %v5909_v40, 0.0 }
 0xe74   :  { %4535 = vadd.xlane.f32.xlu0 %v4534_v41 }
 0xe76   :  { %v5911_v62 = vpop.permute.xlu0 %5910 }
 0xe77   :  { %4547 = vadd.xlane.f32.xlu1 %v4546_v16  ;;  %v5936_v21 = vsel %vm160_vm5, %v5911_v62, 0.0 }
 0xe78   :  { %4541 = vadd.xlane.f32.xlu0 %v4540_v39 }
 0xe7a   :  { %v5915_v12 = vpop.permute.xlu0 %5914 }
 0xe7b   :  { %4898 = vadd.xlane.f32.xlu1 %v4897_v6  ;;  %v5942_v37 = vsel %vm160_vm5, %v5915_v12, 0.0  ;;  %v4692_v6 = vrot.slane %v8735_v29, %v7283_v9  ;;  %v4699_v12 = vrot.slane %v8735_v29, %v7298_v20 }
 0xe7c   :  { %4544 = vadd.xlane.f32.xlu0 %v4543_v23 }
 0xe7f   :  { %5489 = vadd.xlane.f32.xlu1 %v5488_v24 }
 0xe92   :  { %4887 = vrot.lane.b32.xlu0 %v4524_v50, %s6981_s22 }
 0xe96   :  { %5920 = vrot.lane.b32.xlu0 %v4524_v50, %s6983_s24 }
 0xeaf   :  { %v8822_v2 = vpop.xlane.xlu1 %4526 }
 0xeb3   :  { %v4878_v61 = vpop.permute.xlu1 %4877 }
 0xeb4   :  { %v8824_v47 = vpop.xlane.xlu0 %4529  ;;  %v4903_v28 = vsel %vm160_vm5, %v4878_v61, 0.0 }
 0xeb5   :  { %5486 = vadd.xlane.f32.xlu0 %v5485_v43  ;;  %v4565_v61 = vrot.slane %v8824_v47, %v7308_v26 }
 0xeb7   :  { %v4882_v32 = vpop.permute.xlu1 %4881 }
 0xeb8   :  { %v8828_v51 = vpop.xlane.xlu0 %4532  ;;  %v4909_v27 = vsel %vm160_vm5, %v4882_v32, 0.0  ;;  %v4561_v32 = vrot.slane %v8822_v2, %v7308_v26 }
 0xeb9   :  { %5931 = vadd.xlane.f32.xlu0 %v5930_v10  ;;  %v4569_v43 = vrot.slane %v8828_v51, %v7308_v26 }
 0xebb   :  { %v5466_v33 = vpop.permute.xlu1 %5465 }
 0xebc   :  { %v5491_v0 = vsel %vm160_vm5, %v5466_v33, 0.0  ;;  %v8832_v55 = vpop.xlane.xlu0 %4538  ;;  %v4590_v33 = vsel %vm504_vm6, %v4565_v61, %v4561_v32 }
 0xebd   :  { %4901 = vadd.xlane.f32.xlu0 %v4900_v48  ;;  %5492 = vadd.xlane.f32.xlu1 %v5491_v0  ;;  %v4591_v48 = vsel %vm506_vm7, %v4569_v43, %v4590_v33 }
 0xebf   :  { %v5470_v31 = vpop.permute.xlu1 %5469 }
 0xec0   :  { %v5497_v8 = vsel %vm160_vm5, %v5470_v31, 0.0  ;;  %v4880_v42 = vpop.permute.xlu0 %4879 }
 0xec1   :  { %4904 = vadd.xlane.f32.xlu0 %v4903_v28  ;;  %5934 = vadd.xlane.f32.xlu1 %v5933_v46  ;;  %v4906_v11 = vsel %vm160_vm5, %v4880_v42, 0.0  ;;  %v4577_v28 = vrot.slane %v8832_v55, %v7308_v26 }
 0xec3   :  { %v4886_v3 = vpop.permute.xlu1 %4885 }
 0xec4   :  { %v4884_v52 = vpop.permute.xlu0 %4883  ;;  %v4915_v35 = vsel %vm160_vm5, %v4886_v3, 0.0 }
 0xec5   :  { %4910 = vadd.xlane.f32.xlu0 %v4909_v27  ;;  %5498 = vadd.xlane.f32.xlu1 %v5497_v8  ;;  %v4912_v60 = vsel %vm160_vm5, %v4884_v52, 0.0 }
 0xec7   :  { %v5472_v19 = vpop.permute.xlu1 %5471 }
 0xec8   :  { %v5500_v25 = vsel %vm160_vm5, %v5472_v19, 0.0  ;;  %v5468_v18 = vpop.permute.xlu0 %5467 }
 0xec9   :  { %5937 = vadd.xlane.f32.xlu0 %v5936_v21  ;;  %5943 = vadd.xlane.f32.xlu1 %v5942_v37  ;;  %v5494_v15 = vsel %vm160_vm5, %v5468_v18, 0.0 }
 0xecb   :  { %v5474_v14 = vpop.permute.xlu1 %5473 }
 0xecc   :  { %v5503_v57 = vsel %vm160_vm5, %v5474_v14, 0.0  ;;  %v5913_v50 = vpop.permute.xlu0 %5912  ;;  %v4713_v14 = vrot.slane %v8735_v29, %v7475_v58 }
 0xecd   :  { %5501 = vadd.xlane.f32.xlu0 %v5500_v25  ;;  %4907 = vadd.xlane.f32.xlu1 %v4906_v11  ;;  %v5939_v16 = vsel %vm160_vm5, %v5913_v50, 0.0 }
 0xecf   :  { %v5919_v17 = vpop.permute.xlu1 %5918 }
 0xed0   :  { %v5948_v56 = vsel %vm160_vm5, %v5919_v17, 0.0  ;;  %v5917_v30 = vpop.permute.xlu0 %5916 }
 0xed1   :  { %5504 = vadd.xlane.f32.xlu0 %v5503_v57  ;;  %4913 = vadd.xlane.f32.xlu1 %v4912_v60  ;;  %v5945_v39 = vsel %vm160_vm5, %v5917_v30, 0.0 }
 0xed3   :  { %v5476_v44 = vpop.permute.xlu1 %5475 }
 0xed4   :  { %v5506_v41 = vsel %vm160_vm5, %v5476_v44, 0.0 }
 0xed5   :  { %5949 = vadd.xlane.f32.xlu0 %v5948_v56  ;;  %4916 = vadd.xlane.f32.xlu1 %v4915_v35 }
 0xed9   :  { %5507 = vadd.xlane.f32.xlu0 %v5506_v41  ;;  %5495 = vadd.xlane.f32.xlu1 %v5494_v15 }
 0xedd   :  { %5940 = vadd.xlane.f32.xlu1 %v5939_v16 }
 0xee1   :  { %5946 = vadd.xlane.f32.xlu1 %v5945_v39 }
 0xeef   :  { %4694 = vbcast.lane.b32.xlu0 %v4692_v6, 256 }
 0xf01   :  { %v8852_v4 = vpop.xlane.xlu0 %4535 }
 0xf02   :  { %v4573_v10 = vrot.slane %v8852_v4, %v7308_v26 }
 0xf04   :  { %v4592_v0 = vsel %vm508_vm8, %v4573_v10, %v4591_v48  ;;  %v8879_v3 = vpop.xlane.xlu1 %4547 }
 0xf05   :  { %v8854_v23 = vpop.xlane.xlu0 %4541  ;;  %v4593_v27 = vsel %vm510_vm9, %v4577_v28, %v4592_v0  ;;  %v4589_v19 = vrot.slane %v8879_v3, %v7308_v26 }
 0xf06   :  { %v4581_v31 = vrot.slane %v8854_v23, %v7308_v26 }
 0xf08   :  { %v4594_v8 = vsel %vm512_vm10, %v4581_v31, %v4593_v27  ;;  %v8893_v25 = vpop.xlane.xlu1 %4898 }
 0xf09   :  { %v8856_v24 = vpop.xlane.xlu0 %4544 }
 0xf0a   :  { %v4585_v46 = vrot.slane %v8856_v24, %v7308_v26 }
 0xf0c   :  { %v4595_v42 = vsel %vm514_vm11, %v4585_v46, %v4594_v8  ;;  %v8895_v11 = vpop.xlane.xlu1 %5489 }
 0xf0d   :  { %v4888_v40 = vpop.permute.xlu0 %4887  ;;  %v4596_v21 = vsel %vm516_vm12, %v4589_v19, %v4595_v42 }
 0xf0e   :  { %v4918_v34 = vsel %vm160_vm5, %v4888_v40, 0.0  ;;  %v4598_v37 = vsel %vm4549_vm13, %v4596_v21, -1e+30 }
 0xf0f   :  { %4919 = vadd.xlane.f32.xlu1 %v4918_v34  ;;  %v4599_v52 = vsel %vm520_vm14, %v4598_v37, -inf }
 0xf11   :  { %v5921_v62 = vpop.permute.xlu0 %5920 }
 0xf12   :  { %v5951_v5 = vsel %vm160_vm5, %v5921_v62, 0.0 }
 0xf13   :  { %5952 = vadd.xlane.f32.xlu1 %v5951_v5 }
 0xf24   :  { %4701 = vbcast.lane.b32.xlu1 %v4699_v12, 256  ;;  %v4932_v12 = vrot.slane %v8893_v25, %v7308_v26 }
 0xf42   :  { %v8901_v60 = vpop.xlane.xlu0 %5486 }
 0xf46   :  { %v8905_v56 = vpop.xlane.xlu0 %5931 }
 0xf47   :  { %v5965_v10 = vrot.slane %v8905_v56, %v7308_v26 }
 0xf48   :  { %4600 = vmax.xlane.f32.xlu1 %v4599_v52 }
 0xf4a   :  { %v8897_v17 = vpop.xlane.xlu1 %5492  ;;  %v8909_v44 = vpop.xlane.xlu0 %4901 }
 0xf4b   :  { %v4936_v62 = vrot.slane %v8909_v44, %v7308_v26 }
 0xf4d   :  { %v4961_v33 = vsel %vm504_vm6, %v4936_v62, %v4932_v12 }
 0xf4e   :  { %v8899_v57 = vpop.xlane.xlu1 %5934  ;;  %v8913_v41 = vpop.xlane.xlu0 %4904 }
 0xf4f   :  { %v4940_v5 = vrot.slane %v8913_v41, %v7308_v26  ;;  %v5969_v61 = vrot.slane %v8899_v57, %v7308_v26 }
 0xf51   :  { %v4962_v31 = vsel %vm506_vm7, %v4940_v5, %v4961_v33  ;;  %v5994_v46 = vsel %vm504_vm6, %v5969_v61, %v5965_v10 }
 0xf52   :  { %v8903_v18 = vpop.xlane.xlu1 %5498  ;;  %v8917_v16 = vpop.xlane.xlu0 %4910 }
 0xf53   :  { %v4948_v42 = vrot.slane %v8917_v16, %v7308_v26 }
 0xf56   :  { %v8907_v35 = vpop.xlane.xlu1 %5943  ;;  %v8921_v39 = vpop.xlane.xlu0 %5937 }
 0xf57   :  { %v5973_v32 = vrot.slane %v8921_v39, %v7308_v26 }
 0xf59   :  { %4715 = vbcast.lane.b32.xlu1 %v4713_v14, 256  ;;  %v5995_v19 = vsel %vm506_vm7, %v5973_v32, %v5994_v46  ;;  %v5981_v14 = vrot.slane %v8907_v35, %v7308_v26 }
 0xf5a   :  { %v8911_v50 = vpop.xlane.xlu1 %4907  ;;  %v8925_v40 = vpop.xlane.xlu0 %5501 }
 0xf5b   :  { %v4944_v43 = vrot.slane %v8911_v50, %v7308_v26 }
 0xf5d   :  { %v4963_v27 = vsel %vm508_vm8, %v4944_v43, %v4962_v31 }
 0xf5e   :  { %v8915_v15 = vpop.xlane.xlu1 %4913  ;;  %v8944_v48 = vpop.xlane.xlu0 %5504  ;;  %v4964_v62 = vsel %vm510_vm9, %v4948_v42, %v4963_v27 }
 0xf5f   :  { %v4952_v8 = vrot.slane %v8915_v15, %v7308_v26 }
 0xf61   :  { %v4965_v12 = vsel %vm512_vm10, %v4952_v8, %v4964_v62  ;;  %v5520_v62 = vrot.slane %v8901_v60, %v7308_v26 }
 0xf62   :  { %v8919_v30 = vpop.xlane.xlu1 %4916  ;;  %v8969_v61 = vpop.xlane.xlu0 %5949 }
 0xf63   :  { %v4956_v21 = vrot.slane %v8919_v30, %v7308_v26  ;;  %v5989_v31 = vrot.slane %v8969_v61, %v7308_v26 }
 0xf65   :  { %v4966_v10 = vsel %vm514_vm11, %v4956_v21, %v4965_v12  ;;  %v5528_v12 = vrot.slane %v8897_v17, %v7308_v26 }
 0xf66   :  { %v8923_v6 = vpop.xlane.xlu1 %5495 }
 0xf6a   :  { %v8927_v34 = vpop.xlane.xlu1 %5940 }
 0xf6b   :  { %v5977_v0 = vrot.slane %v8927_v34, %v7308_v26 }
 0xf6d   :  { %v5996_v37 = vsel %vm508_vm8, %v5977_v0, %v5995_v19 }
 0xf6e   :  { %v8949_v28 = vpop.xlane.xlu1 %5946  ;;  %v5997_v32 = vsel %vm510_vm9, %v5981_v14, %v5996_v37  ;;  %v4706_v14 = vrot.slane %v8735_v29, %v7288_v13 }
 0xf6f   :  { %v5985_v52 = vrot.slane %v8949_v28, %v7308_v26 }
 0xf71   :  { %v5998_v33 = vsel %vm512_vm10, %v5985_v52, %v5997_v32  ;;  %v5532_v32 = vrot.slane %v8923_v6, %v7308_v26 }
 0xf72   :  { %v5999_v19 = vsel %vm514_vm11, %v5989_v31, %v5998_v33  ;;  %v5536_v31 = vrot.slane %v8903_v18, %v7308_v26 }
 0xf9c   :  { %v8966_v5 = vpop.xlane.xlu1 %4919 }
 0xf9d   :  { %v4960_v43 = vrot.slane %v8966_v5, %v7308_v26 }
 0xf9f   :  { %v4967_v0 = vsel %vm516_vm12, %v4960_v43, %v4966_v10  ;;  %v5524_v43 = vrot.slane %v8895_v11, %v7308_v26 }
 0xfa0   :  { %v8979_v46 = vpop.xlane.xlu1 %5952  ;;  %v4969_v27 = vsel %vm4549_vm13, %v4967_v0, -1e+30 }
 0xfa1   :  { %v5993_v8 = vrot.slane %v8979_v46, %v7308_v26  ;;  %v4970_v42 = vsel %vm520_vm14, %v4969_v27, -inf  ;;  %v5549_v10 = vsel %vm504_vm6, %v5524_v43, %v5520_v62 }
 0xfa2   :  { %4971 = vmax.xlane.f32.xlu0 %v4970_v42  ;;  %v5550_v33 = vsel %vm506_vm7, %v5528_v12, %v5549_v10 }
 0xfa3   :  { %v6000_v21 = vsel %vm516_vm12, %v5993_v8, %v5999_v19  ;;  %v5551_v0 = vsel %vm508_vm8, %v5532_v32, %v5550_v33  ;;  %v5540_v8 = vrot.slane %v8925_v40, %v7308_v26  ;;  %v5544_v19 = vrot.slane %v8944_v48, %v7308_v26 }
 0xfa4   :  { %v6002_v37 = vsel %vm4549_vm13, %v6000_v21, -1e+30  ;;  %v5552_v27 = vsel %vm510_vm9, %v5536_v31, %v5551_v0  ;;  %v9012_v21 = vpop.xlane.xlu0 %5507 }
 0xfa5   :  { %v6003_v52 = vsel %vm520_vm14, %v6002_v37, -inf  ;;  %v5553_v42 = vsel %vm512_vm10, %v5540_v8, %v5552_v27 }
 0xfa6   :  { %6004 = vmax.xlane.f32.xlu1 %v6003_v52  ;;  %v5554_v37 = vsel %vm514_vm11, %v5544_v19, %v5553_v42  ;;  %v5548_v52 = vrot.slane %v9012_v21, %v7308_v26 }
 0xfa8   :  { %v5555_v62 = vsel %vm516_vm12, %v5548_v52, %v5554_v37 }
 0xfa9   :  { %v5557_v12 = vsel %vm4549_vm13, %v5555_v62, -1e+30 }
 0xfaa   :  { %v5558_v0 = vsel %vm520_vm14, %v5557_v12, -inf }
 0xfb8   :  { %4708 = vbcast.lane.b32.xlu0 %v4706_v14, 256  ;;  %v9017_v14 = vpop.permute.xlu1 %4701 }
 0xfd5   :  { %v9022_v43 = vpop.xlane.xlu1 %4600 }
 0xfd6   :  { %v4606_v32 = vrot.slane %v9022_v43, %v7145_v36  ;;  %v4610_v10 = vrot.slane %v9022_v43, %v7151_v38  ;;  %v4614_v33 = vrot.slane %v9022_v43, %v7278_v7  ;;  %v4618_v31 = vrot.slane %v9022_v43, %v7283_v9 }
 0xfd7   :  { %5559 = vmax.xlane.f32.xlu0 %v5558_v0  ;;  %v4622_v19 = vrot.slane %v9022_v43, %v7298_v20 }
 0xfd8   :  { %v4644_v27 = vsub.f32 %v8824_v47, %v4610_v10  ;;  %v4645_v8 = vsub.f32 %v8828_v51, %v4614_v33  ;;  %v4646_v42 = vsub.f32 %v8852_v4, %v4618_v31  ;;  %v4643_v52 = vsub.f32 %v8822_v2, %v4606_v32  ;;  %v9049_v31 = vpop.permute.xlu0 %4694 }
 0xfd9   :  { %v4647_v0 = vsub.f32 %v8832_v55, %v4622_v19  ;;  %v4720_v2 = vrot.slane %v8735_v29, %v7436_v22  ;;  %v4630_v19 = vrot.slane %v9022_v43, %v7475_v58 }
 0xfda   :  { %v4653_v37 = vmul.f32 1.442695, %v4644_v27  ;;  %v4655_v62 = vmul.f32 1.442695, %v4645_v8  ;;  %v4657_v45 = vmul.f32 1.442695, %v4646_v42  ;;  %v4626_v42 = vrot.slane %v9022_v43, %v7288_v13 }
 0xfdb   :  { %v4651_v12 = vmul.f32 1.442695, %v4643_v52  ;;  %v4659_v47 = vmul.f32 1.442695, %v4647_v0  ;;  %v4649_v52 = vsub.f32 %v8856_v24, %v4630_v19 }
 0xfdc   :  { %6874 = vpow2.f32 %v4653_v37  ;;  %v4648_v37 = vsub.f32 %v8854_v23, %v4626_v42 }
 0xfdd   :  { %6876 = vpow2.f32 %v4655_v62 }
 0xfde   :  { %6878 = vpow2.f32 %v4657_v45  ;;  %v4661_v62 = vmul.f32 1.442695, %v4648_v37 }
 0xfdf   :  { %6880 = vpow2.f32 %v4651_v12  ;;  %v4663_v12 = vmul.f32 1.442695, %v4649_v52  ;;  %v9086_v52 = vpop.permute.xlu1 %4715 }
 0xfe0   :  { %6882 = vpow2.f32 %v4659_v47 }
 0xfe1   :  { %6884 = vpow2.f32 %v4661_v62 }
 0xfe2   :  { %6886 = vpow2.f32 %v4663_v12 }
 0xfe6   :  { %v6875_v10 = vpop.eup %6874 }
 0xfe7   :  { %v9041_v51 = vmul.f32 %v6875_v10, %v8808_v53  ;;  %v6877_v4 = vpop.eup %6876 }
 0xfe8   :  { %v6879_v32 = vpop.eup %6878  ;;  %v9047_v33 = vmul.f32 %v6877_v4, %v8812_v54 }
 0xfe9   :  { %4752 = vperm.xlu1 %6725, %v9041_v51   ;;  %v6881_v55 = vpop.eup %6880  ;;  %v9053_v45 = vmul.f32 %v6879_v32, %v9049_v31 }
 0xfea   :  { %v9056_v27 = vmul.f32 %v6881_v55, %v8810_v59  ;;  %v6883_v8 = vpop.eup %6882 }
 0xfeb   :  { %v9061_v29 = vmul.f32 %v6883_v8, %v9017_v14  ;;  %v6885_v32 = vpop.eup %6884 }
 0xfec   :  { %v6887_v37 = vpop.eup %6886 }
 0xfed   :  { %4755 = vperm.xlu1 %6725, %v9047_v33   ;;  %4722 = vbcast.lane.b32.xlu0 %v4720_v2, 256 }
 0xff1   :  { %4749 = vperm.xlu0 %6724, %v9056_v27   ;;  %4758 = vperm.xlu1 %6725, %v9053_v45  }
 0xff5   :  { %4761 = vperm.xlu1 %6725, %v9061_v29  }
0x102f   :  { %v9070_v0 = vpop.xlane.xlu0 %4971 }
0x1030   :  { %v4977_v47 = vrot.slane %v9070_v0, %v7145_v36  ;;  %v4985_v10 = vrot.slane %v9070_v0, %v7278_v7  ;;  %v4993_v4 = vrot.slane %v9070_v0, %v7298_v20 }
0x1032   :  { %v5014_v2 = vsub.f32 %v8893_v25, %v4977_v47  ;;  %v5016_v23 = vsub.f32 %v8913_v41, %v4985_v10  ;;  %v5018_v19 = vsub.f32 %v8917_v16, %v4993_v4  ;;  %v9090_v25 = vmul.f32 %v6887_v37, %v9086_v52 }
0x1033   :  { %v9080_v24 = vpop.permute.xlu0 %4708  ;;  %v4997_v37 = vrot.slane %v9070_v0, %v7288_v13 }
0x1034   :  { %v9083_v55 = vmul.f32 %v6885_v32, %v9080_v24  ;;  %v5022_v8 = vmul.f32 1.442695, %v5014_v2  ;;  %v5026_v42 = vmul.f32 1.442695, %v5016_v23  ;;  %v5030_v41 = vmul.f32 1.442695, %v5018_v19 }
0x1035   :  { %v4634_v2 = vrot.slane %v9022_v43, %v7436_v22  ;;  %v4981_v23 = vrot.slane %v9070_v0, %v7151_v38  ;;  %v5001_v43 = vrot.slane %v9070_v0, %v7475_v58 }
0x1036   :  { %4764 = vperm.xlu1 %6725, %v9083_v55   ;;  %6888 = vpow2.f32 %v5022_v8  ;;  %v4989_v8 = vrot.slane %v9070_v0, %v7283_v9 }
0x1037   :  { %6890 = vpow2.f32 %v5026_v42  ;;  %v4650_v32 = vsub.f32 %v8879_v3, %v4634_v2  ;;  %v5015_v42 = vsub.f32 %v8909_v44, %v4981_v23  ;;  %v5019_v3 = vsub.f32 %v8915_v15, %v4997_v37 }
0x1038   :  { %6892 = vpow2.f32 %v5030_v41 }
0x1039   :  { %v4665_v19 = vmul.f32 1.442695, %v4650_v32  ;;  %v5024_v41 = vmul.f32 1.442695, %v5015_v42  ;;  %v5032_v2 = vmul.f32 1.442695, %v5019_v3  ;;  %v5020_v32 = vsub.f32 %v8919_v30, %v5001_v43 }
0x103a   :  { %4767 = vperm.xlu1 %6725, %v9090_v25  }
0x103b   :  { %6894 = vpow2.f32 %v4665_v19  ;;  %v5034_v30 = vmul.f32 1.442695, %v5020_v32 }
0x103c   :  { %6896 = vpow2.f32 %v5024_v41 }
0x1040   :  { %v6889_v62 = vpop.eup %6888 }
0x1041   :  { %v9094_v12 = vmul.f32 %v6889_v62, %v8810_v59  ;;  %v6891_v47 = vpop.eup %6890  ;;  %v5017_v62 = vsub.f32 %v8911_v50, %v4989_v8  ;;  %v5005_v8 = vrot.slane %v9070_v0, %v7436_v22 }
0x1042   :  { %v9098_v16 = vmul.f32 %v6891_v47, %v8812_v54  ;;  %v6893_v10 = vpop.eup %6892  ;;  %v9118_v47 = vpop.xlane.xlu1 %6004 }
0x1043   :  { %5055 = vperm.xlu1 %6725, %v9094_v12   ;;  %v9102_v4 = vmul.f32 %v6893_v10, %v9017_v14  ;;  %v5028_v10 = vmul.f32 1.442695, %v5017_v62  ;;  %v6010_v44 = vrot.slane %v9118_v47, %v7145_v36  ;;  %v6018_v15 = vrot.slane %v9118_v47, %v7278_v7 }
0x1044   :  { %v5021_v0 = vsub.f32 %v8966_v5, %v5005_v8 }
0x1045   :  { %6898 = vpow2.f32 %v5028_v10  ;;  %v6047_v19 = vsub.f32 %v8905_v56, %v6010_v44  ;;  %v6895_v37 = vpop.eup %6894  ;;  %v6049_v44 = vsub.f32 %v8921_v39, %v6018_v15 }
0x1046   :  { %6900 = vpow2.f32 %v5032_v2  ;;  %v6897_v3 = vpop.eup %6896  ;;  %v5036_v8 = vmul.f32 1.442695, %v5021_v0 }
0x1047   :  { %5061 = vperm.xlu1 %6725, %v9098_v16   ;;  %v6055_v56 = vmul.f32 1.442695, %v6047_v19  ;;  %6902 = vpow2.f32 %v5034_v30  ;;  %v6059_v19 = vmul.f32 1.442695, %v6049_v44 }
0x104b   :  { %5067 = vperm.xlu1 %6725, %v9102_v4  }
0x104f   :  { %v6899_v5 = vpop.eup %6898 }
0x1050   :  { %v6901_v30 = vpop.eup %6900 }
0x1051   :  { %v6903_v44 = vpop.eup %6902 }
0x1064   :  { %v9123_v23 = vpop.xlane.xlu0 %5559 }
0x1065   :  { %v5565_v50 = vrot.slane %v9123_v23, %v7145_v36  ;;  %v5569_v41 = vrot.slane %v9123_v23, %v7151_v38  ;;  %v5573_v2 = vrot.slane %v9123_v23, %v7278_v7  ;;  %v5577_v15 = vrot.slane %v9123_v23, %v7283_v9 }
0x1066   :  { %v5593_v0 = vrot.slane %v9123_v23, %v7436_v22 }
0x1067   :  { %v5602_v42 = vsub.f32 %v8901_v60, %v5565_v50  ;;  %v5585_v60 = vrot.slane %v9123_v23, %v7288_v13  ;;  %v5603_v32 = vsub.f32 %v8895_v11, %v5569_v41  ;;  %v9150_v50 = vmul.f32 %v6897_v3, %v8808_v53 }
0x1068   :  { %v9136_v62 = vpop.permute.xlu0 %4722  ;;  %v5604_v11 = vsub.f32 %v8897_v17, %v5573_v2  ;;  %v9160_v41 = vmul.f32 %v6899_v5, %v9049_v31  ;;  %v6014_v3 = vrot.slane %v9118_v47, %v7151_v38  ;;  %v5605_v17 = vsub.f32 %v8923_v6, %v5577_v15 }
0x1069   :  { %v9139_v43 = vmul.f32 %v6895_v37, %v9136_v62  ;;  %v5610_v10 = vmul.f32 1.442695, %v5602_v42  ;;  %v5589_v42 = vrot.slane %v9123_v23, %v7475_v58  ;;  %v5607_v39 = vsub.f32 %v8925_v40, %v5585_v60 }
0x106a   :  { %v5612_v37 = vmul.f32 1.442695, %v5603_v32  ;;  %v5614_v60 = vmul.f32 1.442695, %v5604_v11  ;;  %v6034_v2 = vrot.slane %v9118_v47, %v7475_v58  ;;  %v5609_v5 = vsub.f32 %v9012_v21, %v5593_v0 }
0x106b   :  { %4770 = vperm.xlu0 %6724, %v9139_v43   ;;  %6904 = vpow2.f32 %v5610_v10  ;;  %v5620_v40 = vmul.f32 1.442695, %v5607_v39  ;;  %v5608_v10 = vsub.f32 %v8944_v48, %v5589_v42  ;;  %v6048_v48 = vsub.f32 %v8899_v57, %v6014_v3 }
0x106c   :  { %6906 = vpow2.f32 %v6055_v56  ;;  %v9170_v56 = vmul.f32 %v6901_v30, %v9080_v24  ;;  %v5581_v42 = vrot.slane %v9123_v23, %v7298_v20  ;;  %v9183_v15 = vmul.f32 %v6903_v44, %v9086_v52 }
0x106d   :  { %6908 = vpow2.f32 %v5036_v8  ;;  %v5622_v8 = vmul.f32 1.442695, %v5608_v10  ;;  %v6022_v21 = vrot.slane %v9118_v47, %v7283_v9  ;;  %v6053_v57 = vsub.f32 %v8969_v61, %v6034_v2 }
0x106e   :  { %6910 = vpow2.f32 %v6059_v19  ;;  %v5616_v19 = vmul.f32 1.442695, %v5605_v17  ;;  %v6057_v30 = vmul.f32 1.442695, %v6048_v48  ;;  %v5606_v3 = vsub.f32 %v8903_v18, %v5581_v42 }
0x106f   :  { %5058 = vperm.xlu0 %6724, %v9150_v50   ;;  %6912 = vpow2.f32 %v5612_v37  ;;  %v5624_v37 = vmul.f32 1.442695, %v5609_v5  ;;  %v6067_v61 = vmul.f32 1.442695, %v6053_v57  ;;  %v6050_v18 = vsub.f32 %v8927_v34, %v6022_v21 }
0x1070   :  { %6914 = vpow2.f32 %v5620_v40  ;;  %v5618_v17 = vmul.f32 1.442695, %v5606_v3  ;;  %v6030_v5 = vrot.slane %v9118_v47, %v7288_v13 }
0x1071   :  { %6916 = vpow2.f32 %v5614_v60  ;;  %v6026_v60 = vrot.slane %v9118_v47, %v7298_v20  ;;  %v6061_v48 = vmul.f32 1.442695, %v6050_v18 }
0x1072   :  { %6918 = vpow2.f32 %v5622_v8  ;;  %v6052_v21 = vsub.f32 %v8949_v28, %v6030_v5 }
0x1073   :  { %5064 = vperm.xlu0 %6724, %v9160_v41   ;;  %6920 = vpow2.f32 %v5616_v19  ;;  %v6051_v34 = vsub.f32 %v8907_v35, %v6026_v60 }
0x1074   :  { %6922 = vpow2.f32 %v5624_v37  ;;  %v6065_v3 = vmul.f32 1.442695, %v6052_v21  ;;  %v4750_v21 = vpop.permute.xlu0 %4749 }
0x1075   :  { %v6905_v32 = vpop.eup %6904  ;;  %6924 = vpow2.f32 %v6057_v30  ;;  %v6063_v57 = vmul.f32 1.442695, %v6051_v34 }
0x1076   :  { %v9180_v6 = vmul.f32 %v6905_v32, %v8810_v59  ;;  %v6907_v39 = vpop.eup %6906  ;;  %6926 = vpow2.f32 %v6067_v61 }
0x1077   :  { %5070 = vperm.xlu0 %6724, %v9170_v56   ;;  %v6909_v23 = vpop.eup %6908  ;;  %v9191_v11 = vmul.f32 %v6907_v39, %v8810_v59  ;;  %6928 = vpow2.f32 %v5618_v17 }
0x1078   :  { %5643 = vperm.xlu1 %6725, %v9180_v6   ;;  %v6911_v0 = vpop.eup %6910  ;;  %v9195_v40 = vmul.f32 %v6909_v23, %v9136_v62  ;;  %6930 = vpow2.f32 %v6061_v48 }
0x1079   :  { %v6913_v10 = vpop.eup %6912  ;;  %v9202_v59 = vmul.f32 %v6911_v0, %v8812_v54  ;;  %6932 = vpow2.f32 %v6063_v57  ;;  %v4775_v57 = vrot.slane %v4750_v21, %v7308_v26 }
0x107a   :  { %v6915_v44 = vpop.eup %6914  ;;  %v9206_v2 = vmul.f32 %v6913_v10, %v8808_v53  ;;  %6934 = vpow2.f32 %v6065_v3 }
0x107b   :  { %5073 = vperm.xlu0 %6724, %v9183_v15   ;;  %v6917_v32 = vpop.eup %6916  ;;  %v9213_v8 = vmul.f32 %v6915_v44, %v9080_v24 }
0x107c   :  { %6088 = vperm.xlu1 %6725, %v9191_v11   ;;  %v6919_v42 = vpop.eup %6918  ;;  %v9217_v19 = vmul.f32 %v6917_v32, %v8812_v54  ;;  %v6038_v54 = vrot.slane %v9118_v47, %v7436_v22 }
0x107d   :  { %v6921_v39 = vpop.eup %6920  ;;  %v9223_v37 = vmul.f32 %v6919_v42, %v9086_v52 }
0x107e   :  { %v6923_v23 = vpop.eup %6922  ;;  %v9226_v30 = vmul.f32 %v6921_v39, %v9049_v31  ;;  %v6054_v61 = vsub.f32 %v8979_v46, %v6038_v54 }
0x107f   :  { %5076 = vperm.xlu0 %6724, %v9195_v40   ;;  %v6925_v35 = vpop.eup %6924  ;;  %v9233_v28 = vmul.f32 %v6923_v23, %v9136_v62 }
0x1080   :  { %6094 = vperm.xlu1 %6725, %v9202_v59   ;;  %v6927_v0 = vpop.eup %6926  ;;  %v9236_v10 = vmul.f32 %v6925_v35, %v8808_v53  ;;  %v6069_v44 = vmul.f32 1.442695, %v6054_v61 }
0x1081   :  { %v6929_v60 = vpop.eup %6928  ;;  %v9242_v47 = vmul.f32 %v6927_v0, %v9086_v52 }
0x1082   :  { %v9245_v17 = vmul.f32 %v6929_v60, %v9017_v14  ;;  %v6931_v18 = vpop.eup %6930  ;;  %6936 = vpow2.f32 %v6069_v44 }
0x1083   :  { %5646 = vperm.xlu0 %6724, %v9206_v2   ;;  %v9250_v53 = vmul.f32 %v6931_v18, %v9049_v31  ;;  %v6933_v46 = vpop.eup %6932  ;;  %v4753_v31 = vpop.permute.xlu1 %4752 }
0x1084   :  { %5658 = vperm.xlu1 %6725, %v9213_v8   ;;  %v9254_v32 = vmul.f32 %v6933_v46, %v9017_v14  ;;  %v6935_v52 = vpop.eup %6934  ;;  %v4779_v23 = vrot.slane %v4753_v31, %v7308_v26 }
0x1085   :  { %v9258_v5 = vmul.f32 %v6935_v52, %v9080_v24 }
0x1086   :  { %v4804_v24 = vsel %vm504_vm6, %v4779_v23, %v4775_v57 }
0x1087   :  { %5649 = vperm.xlu0 %6724, %v9217_v19   ;;  %v4756_v42 = vpop.permute.xlu1 %4755 }
0x1088   :  { %5661 = vperm.xlu1 %6725, %v9223_v37   ;;  %v4783_v54 = vrot.slane %v4756_v42, %v7308_v26 }
0x108a   :  { %v4805_v3 = vsel %vm506_vm7, %v4783_v54, %v4804_v24 }
0x108b   :  { %5652 = vperm.xlu0 %6724, %v9226_v30   ;;  %v4759_v39 = vpop.permute.xlu1 %4758 }
0x108c   :  { %5664 = vperm.xlu1 %6725, %v9233_v28   ;;  %v6937_v48 = vpop.eup %6936 }
0x108d   :  { %v9262_v34 = vmul.f32 %v6937_v48, %v9136_v62  ;;  %v4787_v62 = vrot.slane %v4759_v39, %v7308_v26 }
0x108f   :  { %6091 = vperm.xlu0 %6724, %v9236_v10   ;;  %v4762_v14 = vpop.permute.xlu1 %4761  ;;  %v4806_v61 = vsel %vm508_vm8, %v4787_v62, %v4805_v3 }
0x1090   :  { %6106 = vperm.xlu1 %6725, %v9242_v47   ;;  %v4791_v60 = vrot.slane %v4762_v14, %v7308_v26 }
0x1092   :  { %v4807_v52 = vsel %vm510_vm9, %v4791_v60, %v4806_v61 }
0x1093   :  { %5655 = vperm.xlu0 %6724, %v9245_v17  }
0x1097   :  { %6097 = vperm.xlu0 %6724, %v9250_v53  }
0x109b   :  { %6100 = vperm.xlu0 %6724, %v9254_v32  }
0x109f   :  { %6103 = vperm.xlu0 %6724, %v9258_v5  }
0x10a3   :  { %6109 = vperm.xlu0 %6724, %v9262_v34  }
0x10b5   :  { %v4765_v35 = vpop.permute.xlu1 %4764 }
0x10b6   :  { %v4795_v18 = vrot.slane %v4765_v35, %v7308_v26 }
0x10b8   :  { %v4808_v31 = vsel %vm512_vm10, %v4795_v18, %v4807_v52 }
0x10b9   :  { %v4768_v0 = vpop.permute.xlu1 %4767 }
0x10ba   :  { %v4799_v44 = vrot.slane %v4768_v0, %v7308_v26 }
0x10bc   :  { %v4809_v21 = vsel %vm514_vm11, %v4799_v44, %v4808_v31 }
0x10c2   :  { %v5056_v46 = vpop.permute.xlu1 %5055 }
0x10c3   :  { %v5081_v54 = vrot.slane %v5056_v46, %v7308_v26 }
0x10c6   :  { %v5062_v23 = vpop.permute.xlu1 %5061 }
0x10c7   :  { %v5089_v61 = vrot.slane %v5062_v23, %v7308_v26 }
0x10ca   :  { %v5068_v3 = vpop.permute.xlu1 %5067 }
0x10ea   :  { %v4771_v48 = vpop.permute.xlu0 %4770 }
0x10eb   :  { %v4803_v42 = vrot.slane %v4771_v48, %v7308_v26 }
0x10ed   :  { %v4810_v39 = vsel %vm516_vm12, %v4803_v42, %v4809_v21  ;;  %v5097_v42 = vrot.slane %v5068_v3, %v7308_v26 }
0x10ee   :  { %v5059_v57 = vpop.permute.xlu0 %5058  ;;  %v4812_v14 = vsel %vm520_vm14, %v4810_v39, 0.0 }
0x10ef   :  { %4813 = vadd.xlane.f32.xlu0 %v4812_v14  ;;  %v5085_v24 = vrot.slane %v5059_v57, %v7308_v26 }
0x10f1   :  { %v5110_v0 = vsel %vm504_vm6, %v5085_v24, %v5081_v54 }
0x10f2   :  { %v5065_v35 = vpop.permute.xlu0 %5064  ;;  %v5111_v44 = vsel %vm506_vm7, %v5089_v61, %v5110_v0 }
0x10f3   :  { %v5093_v60 = vrot.slane %v5065_v35, %v7308_v26 }
0x10f5   :  { %v5112_v48 = vsel %vm508_vm8, %v5093_v60, %v5111_v44 }
0x10f6   :  { %v5071_v62 = vpop.permute.xlu0 %5070  ;;  %v5113_v39 = vsel %vm510_vm9, %v5097_v42, %v5112_v48 }
0x10f7   :  { %v5644_v18 = vpop.permute.xlu1 %5643  ;;  %v5101_v31 = vrot.slane %v5071_v62, %v7308_v26 }
0x10f8   :  { %v5669_v42 = vrot.slane %v5644_v18, %v7308_v26 }
0x10f9   :  { %v5114_v14 = vsel %vm512_vm10, %v5101_v31, %v5113_v39 }
0x10fa   :  { %v5074_v52 = vpop.permute.xlu0 %5073 }
0x10fb   :  { %v5105_v46 = vrot.slane %v5074_v52, %v7308_v26  ;;  %v6089_v21 = vpop.permute.xlu1 %6088 }
0x10fd   :  { %v5115_v35 = vsel %vm514_vm11, %v5105_v46, %v5114_v14 }
0x10fe   :  { %v5077_v57 = vpop.permute.xlu0 %5076 }
0x10ff   :  { %v5109_v23 = vrot.slane %v5077_v57, %v7308_v26  ;;  %v6095_v24 = vpop.permute.xlu1 %6094 }
0x1101   :  { %v5116_v54 = vsel %vm516_vm12, %v5109_v23, %v5115_v35 }
0x1102   :  { %v5647_v0 = vpop.permute.xlu0 %5646  ;;  %v5118_v62 = vsel %vm520_vm14, %v5116_v54, 0.0 }
0x1103   :  { %5119 = vadd.xlane.f32.xlu1 %v5118_v62  ;;  %v5659_v60 = vpop.permute.xlu1 %5658  ;;  %v5673_v52 = vrot.slane %v5647_v0, %v7308_v26 }
0x1104   :  { %v5689_v54 = vrot.slane %v5659_v60, %v7308_v26 }
0x1105   :  { %v5698_v39 = vsel %vm504_vm6, %v5673_v52, %v5669_v42 }
0x1106   :  { %v5650_v3 = vpop.permute.xlu0 %5649 }
0x1107   :  { %v5662_v44 = vpop.permute.xlu1 %5661  ;;  %v5677_v31 = vrot.slane %v5650_v3, %v7308_v26 }
0x1108   :  { %v5693_v0 = vrot.slane %v5662_v44, %v7308_v26 }
0x1109   :  { %v5699_v14 = vsel %vm506_vm7, %v5677_v31, %v5698_v39  ;;  %v6114_v39 = vrot.slane %v6089_v21, %v7308_v26 }
0x110a   :  { %v5653_v61 = vpop.permute.xlu0 %5652 }
0x110b   :  { %v5681_v46 = vrot.slane %v5653_v61, %v7308_v26  ;;  %v5665_v23 = vpop.permute.xlu1 %5664 }
0x110c   :  { %v5697_v18 = vrot.slane %v5665_v23, %v7308_v26 }
0x110d   :  { %v5700_v62 = vsel %vm508_vm8, %v5681_v46, %v5699_v14  ;;  %v6122_v14 = vrot.slane %v6095_v24, %v7308_v26 }
0x110e   :  { %v6092_v48 = vpop.permute.xlu0 %6091 }
0x110f   :  { %v6118_v52 = vrot.slane %v6092_v48, %v7308_v26 }
0x1111   :  { %v6143_v44 = vsel %vm504_vm6, %v6118_v52, %v6114_v39 }
0x1112   :  { %v5656_v57 = vpop.permute.xlu0 %5655  ;;  %v6144_v48 = vsel %vm506_vm7, %v6122_v14, %v6143_v44 }
0x1113   :  { %v5685_v35 = vrot.slane %v5656_v57, %v7308_v26 }
0x1115   :  { %v5701_v3 = vsel %vm510_vm9, %v5685_v35, %v5700_v62 }
0x1116   :  { %v6098_v49 = vpop.permute.xlu0 %6097  ;;  %v5702_v61 = vsel %vm512_vm10, %v5689_v54, %v5701_v3  ;;  %v6107_v54 = vpop.permute.xlu1 %6106 }
0x1117   :  { %v5703_v31 = vsel %vm514_vm11, %v5693_v0, %v5702_v61  ;;  %v6126_v57 = vrot.slane %v6098_v49, %v7308_v26 }
0x1118   :  { %v5704_v42 = vsel %vm516_vm12, %v5697_v18, %v5703_v31  ;;  %v6138_v18 = vrot.slane %v6107_v54, %v7308_v26 }
0x1119   :  { %v5706_v60 = vsel %vm520_vm14, %v5704_v42, 0.0  ;;  %v6145_v62 = vsel %vm508_vm8, %v6126_v57, %v6144_v48 }
0x111a   :  { %5707 = vadd.xlane.f32.xlu0 %v5706_v60  ;;  %v6101_v46 = vpop.permute.xlu0 %6100 }
0x111b   :  { %v6130_v23 = vrot.slane %v6101_v46, %v7308_v26 }
0x111d   :  { %v6146_v0 = vsel %vm510_vm9, %v6130_v23, %v6145_v62 }
0x111e   :  { %v6104_v35 = vpop.permute.xlu0 %6103 }
0x111f   :  { %v6134_v21 = vrot.slane %v6104_v35, %v7308_v26 }
0x1121   :  { %v6147_v3 = vsel %vm512_vm10, %v6134_v21, %v6146_v0 }
0x1122   :  { %v6110_v61 = vpop.permute.xlu0 %6109  ;;  %v6148_v24 = vsel %vm514_vm11, %v6138_v18, %v6147_v3 }
0x1123   :  { %v6142_v49 = vrot.slane %v6110_v61, %v7308_v26 }
0x1125   :  { %v6149_v52 = vsel %vm516_vm12, %v6142_v49, %v6148_v24 }
0x1126   :  { %v6151_v31 = vsel %vm520_vm14, %v6149_v52, 0.0 }
0x1127   :  { %6152 = vadd.xlane.f32.xlu1 %v6151_v31 }
0x117c   :  { %v4814_v42 = vpop.xlane.xlu0 %4813 }
0x117d   :  { %6938 = vrcp.f32 %v4814_v42 }
0x1187   :  { %v6939_v39 = vpop.eup %6938 }
0x1188   :  { %v4824_v60 = vrot.slane %v6939_v39, %v7151_v38  ;;  %v4820_v46 = vrot.slane %v6939_v39, %v7145_v36  ;;  %v4828_v14 = vrot.slane %v6939_v39, %v7278_v7  ;;  %v4836_v23 = vrot.slane %v6939_v39, %v7298_v20 }
0x1189   :  { %v4832_v54 = vrot.slane %v6939_v39, %v7283_v9  ;;  %v4840_v62 = vrot.slane %v6939_v39, %v7288_v13  ;;  %v4848_v0 = vrot.slane %v6939_v39, %v7436_v22  ;;  %v4844_v3 = vrot.slane %v6939_v39, %v7475_v58 }
0x118a   :  { %v4858_v44 = vmul.f32 %v4824_v60, %v9041_v51  ;;  %v4857_v57 = vmul.f32 %v4820_v46, %v9056_v27  ;;  %v4859_v48 = vmul.f32 %v4828_v14, %v9047_v33  ;;  %v4861_v35 = vmul.f32 %v4836_v23, %v9061_v29 }
0x118b   :  { %v4860_v51 = vmul.f32 %v4832_v54, %v9053_v45  ;;  %v4862_v27 = vmul.f32 %v4840_v62, %v9083_v55  ;;  %v4864_v33 = vmul.f32 %v4848_v0, %v9139_v43  ;;  %v4863_v29 = vmul.f32 %v4844_v3, %v9090_v25 }
0x118c   :  { %5330 = vperm.xlu0 %6724, %v4858_v44   ;;  %5327 = vperm.xlu1 %6725, %v4857_v57  }
0x1190   :  { %v5120_v21 = vpop.xlane.xlu1 %5119  ;;  %5333 = vperm.xlu0 %6724, %v4859_v48   ;;  %5339 = vperm.xlu1 %6725, %v4861_v35  }
0x1191   :  { %6940 = vrcp.f32 %v5120_v21 }
0x1194   :  { %5336 = vperm.xlu0 %6724, %v4860_v51   ;;  %5342 = vperm.xlu1 %6725, %v4862_v27  }
0x1198   :  { %5348 = vperm.xlu0 %6724, %v4864_v33   ;;  %5345 = vperm.xlu1 %6725, %v4863_v29  }
0x119b   :  { %v6941_v18 = vpop.eup %6940 }
0x119c   :  { %v5126_v61 = vrot.slane %v6941_v18, %v7145_v36  ;;  %v5130_v49 = vrot.slane %v6941_v18, %v7151_v38  ;;  %v5138_v24 = vrot.slane %v6941_v18, %v7283_v9  ;;  %v5134_v52 = vrot.slane %v6941_v18, %v7278_v7 }
0x119d   :  { %v5146_v31 = vrot.slane %v6941_v18, %v7288_v13  ;;  %v5142_v42 = vrot.slane %v6941_v18, %v7298_v20  ;;  %v5150_v39 = vrot.slane %v6941_v18, %v7475_v58 }
0x119e   :  { %v5163_v45 = vmul.f32 %v5126_v61, %v9094_v12  ;;  %v5164_v55 = vmul.f32 %v5130_v49, %v9150_v50  ;;  %v5166_v43 = vmul.f32 %v5138_v24, %v9160_v41  ;;  %v5165_v25 = vmul.f32 %v5134_v52, %v9098_v16 }
0x119f   :  { %v5168_v12 = vmul.f32 %v5146_v31, %v9170_v56  ;;  %v5167_v50 = vmul.f32 %v5142_v42, %v9102_v4  ;;  %v5169_v41 = vmul.f32 %v5150_v39, %v9183_v15  ;;  %v5154_v16 = vrot.slane %v6941_v18, %v7436_v22 }
0x11a0   :  { %5180 = vperm.xlu0 %6724, %v5163_v45   ;;  %5183 = vperm.xlu1 %6725, %v5164_v55  }
0x11a1   :  { %v5170_v46 = vmul.f32 %v5154_v16, %v9195_v40 }
0x11a4   :  { %5189 = vperm.xlu0 %6724, %v5166_v43   ;;  %5186 = vperm.xlu1 %6725, %v5165_v25  }
0x11a7   :  { %v5708_v60 = vpop.xlane.xlu0 %5707 }
0x11a8   :  { %6942 = vrcp.f32 %v5708_v60  ;;  %5195 = vperm.xlu0 %6724, %v5168_v12   ;;  %5192 = vperm.xlu1 %6725, %v5167_v50  }
0x11ac   :  { %5198 = vperm.xlu1 %6725, %v5169_v41  }
0x11b0   :  { %5201 = vperm.xlu1 %6725, %v5170_v46  }
0x11b2   :  { %v6943_v44 = vpop.eup %6942 }
0x11b3   :  { %v5718_v57 = vrot.slane %v6943_v44, %v7151_v38  ;;  %v5714_v56 = vrot.slane %v6943_v44, %v7145_v36  ;;  %v5722_v48 = vrot.slane %v6943_v44, %v7278_v7  ;;  %v5726_v40 = vrot.slane %v6943_v44, %v7283_v9 }
0x11b4   :  { %v6153_v4 = vpop.xlane.xlu1 %6152  ;;  %v5730_v51 = vrot.slane %v6943_v44, %v7298_v20  ;;  %v5742_v3 = vrot.slane %v6943_v44, %v7436_v22 }
0x11b5   :  { %6944 = vrcp.f32 %v6153_v4  ;;  %v5752_v14 = vmul.f32 %v5718_v57, %v9206_v2  ;;  %v5751_v23 = vmul.f32 %v5714_v56, %v9180_v6  ;;  %v5753_v15 = vmul.f32 %v5722_v48, %v9217_v19 }
0x11b6   :  { %v5754_v35 = vmul.f32 %v5726_v40, %v9226_v30  ;;  %v5755_v19 = vmul.f32 %v5730_v51, %v9245_v17 }
0x11b7   :  { %5771 = vperm.xlu0 %6724, %v5752_v14   ;;  %5768 = vperm.xlu1 %6725, %v5751_v23  }
0x11bb   :  { %5774 = vperm.xlu0 %6724, %v5753_v15  }
0x11bf   :  { %v6945_v54 = vpop.eup %6944  ;;  %5777 = vperm.xlu0 %6724, %v5754_v35  }
0x11c0   :  { %v6163_v62 = vrot.slane %v6945_v54, %v7151_v38  ;;  %v6159_v21 = vrot.slane %v6945_v54, %v7145_v36  ;;  %v6167_v27 = vrot.slane %v6945_v54, %v7278_v7  ;;  %v6171_v0 = vrot.slane %v6945_v54, %v7283_v9 }
0x11c1   :  { %v5734_v38 = vrot.slane %v6943_v44, %v7288_v13  ;;  %v5738_v7 = vrot.slane %v6943_v44, %v7475_v58  ;;  %v6179_v9 = vrot.slane %v6945_v54, %v7288_v13  ;;  %v6183_v33 = vrot.slane %v6945_v54, %v7475_v58  ;;  %v6547_v13 = vld [vmem:[%s9540_s8 + $0x10] sm:$0xff] }
0x11c2   :  { %v6197_v2 = vmul.f32 %v6163_v62, %v9236_v10  ;;  %v6196_v6 = vmul.f32 %v6159_v21, %v9191_v11  ;;  %v6198_v30 = vmul.f32 %v6167_v27, %v9202_v59  ;;  %v6199_v36 = vmul.f32 %v6171_v0, %v9250_v53 }
0x11c3   :  { %v5756_v11 = vmul.f32 %v5734_v38, %v9213_v8  ;;  %v6175_v10 = vrot.slane %v6945_v54, %v7298_v20  ;;  %v5757_v59 = vmul.f32 %v5738_v7, %v9223_v37  ;;  %v6201_v53 = vmul.f32 %v6179_v9, %v9258_v5 }
0x11c4   :  { %6216 = vperm.xlu0 %6724, %v6197_v2   ;;  %6213 = vperm.xlu1 %6725, %v6196_v6   ;;  %v5758_v8 = vmul.f32 %v5742_v3, %v9233_v28  ;;  %v6187_v20 = vrot.slane %v6945_v54, %v7436_v22  ;;  %v6202_v37 = vmul.f32 %v6183_v33, %v9242_v47  ;;  %vm6353_vm15 = vcmp.gt.f32.partialorder %v6547_v13, 0.0 }
0x11c5   :  { %v6200_v17 = vmul.f32 %v6175_v10, %v9254_v32  ;;  %v6354_v22 = vsel %vm6353_vm15, 1, %v9586_v63 }
0x11c6   :  { %v6203_v32 = vmul.f32 %v6187_v20, %v9262_v34 }
0x11c8   :  { %5780 = vperm.xlu0 %6724, %v5755_v19   ;;  %6219 = vperm.xlu1 %6725, %v6198_v30  }
0x11cc   :  { %6222 = vperm.xlu0 %6724, %v6199_v36   ;;  %5783 = vperm.xlu1 %6725, %v5756_v11  }
0x11d0   :  { %6225 = vperm.xlu0 %6724, %v6200_v17   ;;  %5786 = vperm.xlu1 %6725, %v5757_v59  }
0x11d4   :  { %6228 = vperm.xlu0 %6724, %v6201_v53   ;;  %5789 = vperm.xlu1 %6725, %v5758_v8  }
0x11d8   :  { %6234 = vperm.xlu0 %6724, %v6203_v32   ;;  %6231 = vperm.xlu1 %6725, %v6202_v37  }
0x11dc   :  { %5830 = vrot.lane.b32.xlu0 %v8748_v1, %s6982_s23  ;;  %5243 = vrot.lane.b32.xlu1 %v8748_v1, %s6981_s22 }
0x11e0   :  { %6356 = vperm.xlu0 %6724, %v6354_v22   ;;  %6275 = vrot.lane.b32.xlu1 %v8748_v1, %s6983_s24 }
0x120b   :  { %v5328_v58 = vpop.permute.xlu1 %5327  ;;  %v5331_v28 = vpop.permute.xlu0 %5330 }
0x120c   :  { %v5353_v46 = vrot.slane %v5328_v58, %v7308_v26  ;;  %v5357_v44 = vrot.slane %v5331_v28, %v7308_v26 }
0x120e   :  { %v5382_v40 = vsel %vm504_vm6, %v5357_v44, %v5353_v46  ;;  %v9607_v44 = vmov 0.0  }
0x120f   :  { %v5340_v47 = vpop.permute.xlu1 %5339  ;;  %v5334_v5 = vpop.permute.xlu0 %5333 }
0x1210   :  { %v5361_v4 = vrot.slane %v5334_v5, %v7308_v26  ;;  %v5369_v51 = vrot.slane %v5340_v47, %v7308_v26 }
0x1212   :  { %v5383_v62 = vsel %vm506_vm7, %v5361_v4, %v5382_v40 }
0x1213   :  { %v5343_v34 = vpop.permute.xlu1 %5342  ;;  %v5337_v29 = vpop.permute.xlu0 %5336 }
0x1214   :  { %v5365_v14 = vrot.slane %v5337_v29, %v7308_v26  ;;  %v5373_v7 = vrot.slane %v5343_v34, %v7308_v26 }
0x1216   :  { %v5384_v21 = vsel %vm508_vm8, %v5365_v14, %v5383_v62 }
0x1217   :  { %v9403_v18 = vpop.permute.xlu1 %5345  ;;  %v9405_v61 = vpop.permute.xlu0 %5348  ;;  %v5385_v11 = vsel %vm510_vm9, %v5369_v51, %v5384_v21  ;;  %v6437_v21 = vld [vmem:[%s9542_s10 + $0x18] sm:$0xff] }
0x1218   :  { %v5377_v3 = vrot.slane %v9403_v18, %v7308_v26  ;;  %v5386_v33 = vsel %vm512_vm10, %v5373_v7, %v5385_v11 }
0x121f   :  { %v5184_v49 = vpop.permute.xlu1 %5183  ;;  %v5181_v45 = vpop.permute.xlu0 %5180 }
0x1220   :  { %v5210_v23 = vrot.slane %v5184_v49, %v7308_v26  ;;  %v5206_v48 = vrot.slane %v5181_v45, %v7308_v26 }
0x1222   :  { %v5235_v2 = vsel %vm504_vm6, %v5210_v23, %v5206_v48 }
0x1223   :  { %v5187_v55 = vpop.permute.xlu1 %5186  ;;  %v5190_v24 = vpop.permute.xlu0 %5189 }
0x1224   :  { %v5214_v15 = vrot.slane %v5187_v55, %v7308_v26  ;;  %v5218_v6 = vrot.slane %v5190_v24, %v7308_v26  ;;  %v5381_v55 = vrot.slane %v9405_v61, %v7308_v26 }
0x1226   :  { %v5236_v27 = vsel %vm506_vm7, %v5214_v15, %v5235_v2  ;;  %v9608_v15 = vmov 0.0|0.0  }
0x1227   :  { %v5193_v52 = vpop.permute.xlu1 %5192  ;;  %v5196_v63 = vpop.permute.xlu0 %5195  ;;  %v5237_v17 = vsel %vm508_vm8, %v5218_v6, %v5236_v27 }
0x1228   :  { %v5222_v19 = vrot.slane %v5193_v52, %v7308_v26  ;;  %v5226_v59 = vrot.slane %v5196_v63, %v7308_v26 }
0x122a   :  { %v5238_v53 = vsel %vm510_vm9, %v5222_v19, %v5237_v17  ;;  %v6951_v17 = vld [vmem:[%s9538_s6] ss:$0 sm:$0xff] }
0x122b   :  { %v5199_v43 = vpop.permute.xlu1 %5198  ;;  %v5239_v29 = vsel %vm512_vm10, %v5226_v59, %v5238_v53  ;;  %v6360_v53 = vld [vmem:[%s9541_s9] sm:$0x1]  ;;  %s6952_s9 = scalar_lea.vmem %s6521_s13, 16 }
0x122c   :  { %v5230_v8 = vrot.slane %v5199_v43, %v7308_v26  ;;  %v5387_v43 = vsel %vm514_vm11, %v5377_v3, %v5386_v33  ;;  %p6953_p0 = scmp.ne.s32.totalorder %s6521_s13, %s6952_s9  ;;  %p6958_p2 = scmp.lt.s32.totalorder %s6956_s14, %s6952_s9 }
0x122d   :  { %v5388_v14 = vsel %vm516_vm12, %v5381_v55, %v5387_v43 }
0x122e   :  { %v5240_v24 = vsel %vm514_vm11, %v5230_v8, %v5239_v29  ;;  %v9609_v8 = vld [vmem:[#allocation13_spill] sm:$0xff]  ;;  %p6959_p3 = por %p6958_p2, %p6957_p1 }
0x122f   :  { %v5202_v42 = vpop.permute.xlu1 %5201 }
0x1230   :  { %v5234_v32 = vrot.slane %v5202_v42, %v7308_v26  ;;  %p6960_p4 = pnand %p6959_p3, %p6953_p0 }
0x1236   :  { %v5772_v25 = vpop.permute.xlu0 %5771  ;;  %v5769_v50 = vpop.permute.xlu1 %5768 }
0x1237   :  { %v5794_v30 = vrot.slane %v5769_v50, %v7308_v26  ;;  %v5798_v0 = vrot.slane %v5772_v25, %v7308_v26  ;;  %v5241_v25 = vsel %vm516_vm12, %v5234_v32, %v5240_v24 }
0x1239   :  { %v5823_v37 = vsel %vm504_vm6, %v5798_v0, %v5794_v30 }
0x123a   :  { %v5775_v31 = vpop.permute.xlu0 %5774 }
0x123b   :  { %v5802_v10 = vrot.slane %v5775_v31, %v7308_v26 }
0x123d   :  { %v5824_v28 = vsel %vm506_vm7, %v5802_v10, %v5823_v37  ;;  %v6438_v37 = vld [vmem:[%s9543_s11] sm:$0x1] }
0x123e   :  { %v5778_v12 = vpop.permute.xlu0 %5777 }
0x123f   :  { %v5806_v9 = vrot.slane %v5778_v12, %v7308_v26 }
0x1241   :  { %v5825_v18 = vsel %vm508_vm8, %v5806_v9, %v5824_v28 }
0x1243   :  { %v9407_v39 = vpop.permute.xlu1 %6213  ;;  %v6217_v60 = vpop.permute.xlu0 %6216 }
0x1244   :  { %v6239_v47 = vrot.slane %v9407_v39, %v7308_v26  ;;  %v6243_v5 = vrot.slane %v6217_v60, %v7308_v26 }
0x1246   :  { %v6268_v39 = vsel %vm504_vm6, %v6243_v5, %v6239_v47  ;;  %vm6512_vm6 = vcmask 57344  }
0x1247   :  { %v9409_v41 = vpop.permute.xlu1 %6219  ;;  %v5781_v16 = vpop.permute.xlu0 %5780 }
0x1248   :  { %v5810_v20 = vrot.slane %v5781_v16, %v7308_v26  ;;  %v6247_v49 = vrot.slane %v9409_v41, %v7308_v26 }
0x124a   :  { %v5826_v52 = vsel %vm510_vm9, %v5810_v20, %v5825_v18  ;;  %v6269_v41 = vsel %vm506_vm7, %v6247_v49, %v6268_v39 }
0x124b   :  { %v5784_v57 = vpop.permute.xlu1 %5783  ;;  %v9413_v56 = vpop.permute.xlu0 %6222 }
0x124c   :  { %v5814_v13 = vrot.slane %v5784_v57, %v7308_v26  ;;  %v6251_v63 = vrot.slane %v9413_v56, %v7308_v26 }
0x124e   :  { %v5827_v31 = vsel %vm512_vm10, %v5814_v13, %v5826_v52  ;;  %v6270_v57 = vsel %vm508_vm8, %v6251_v63, %v6269_v41 }
0x124f   :  { %v5787_v35 = vpop.permute.xlu1 %5786  ;;  %v6226_v54 = vpop.permute.xlu0 %6225 }
0x1250   :  { %v5818_v34 = vrot.slane %v5787_v35, %v7308_v26  ;;  %v6255_v42 = vrot.slane %v6226_v54, %v7308_v26  ;;  %v6435_v35 = vld [vmem:[%s9542_s10 + $0x8] sm:$0xff]  ;;  %v6436_v54 = vld [vmem:[%s9542_s10 + $0x10] sm:$0xff] }
0x1251   :  { %v6712_v2 = vpack.c.bf16 %v6437_v21, %v6436_v54 }
0x1252   :  { %v5828_v61 = vsel %vm514_vm11, %v5818_v34, %v5827_v31  ;;  %v6271_v56 = vsel %vm510_vm9, %v6255_v42, %v6270_v57 }
0x1253   :  { %v5790_v38 = vpop.permute.xlu1 %5789  ;;  %v6229_v36 = vpop.permute.xlu0 %6228 }
0x1254   :  { %v5822_v45 = vrot.slane %v5790_v38, %v7308_v26  ;;  %v6259_v60 = vrot.slane %v6229_v36, %v7308_v26 }
0x1256   :  { %v5829_v16 = vsel %vm516_vm12, %v5822_v45, %v5828_v61  ;;  %v6272_v23 = vsel %vm512_vm10, %v6259_v60, %v6271_v56 }
0x1257   :  { %v6232_v22 = vpop.permute.xlu1 %6231  ;;  %v6235_v58 = vpop.permute.xlu0 %6234 }
0x1258   :  { %v6263_v46 = vrot.slane %v6232_v22, %v7308_v26  ;;  %v6267_v48 = vrot.slane %v6235_v58, %v7308_v26  ;;  %v6434_v26 = vld [vmem:[%s9542_s10] sm:$0xff] }
0x1259   :  { %v6709_v62 = vpack.c.bf16 %v6435_v35, %v6434_v26 }
0x125b   :  { %v5244_v12 = vpop.permute.xlu1 %5243  ;;  %v5831_v50 = vpop.permute.xlu0 %5830 }
0x125c   :  { %6637 = vmatpush3.msra.mxu0 %v5244_v12  ;;  %6647 = vmatpush3.msra.mxu1 %v5831_v50 }
0x125d   :  { %6639 = vmatmul.mubr.msk.f32.vlgmr.msra.gmra.mrb[12].mxu0 %vm520_vm14, %v5241_v25  ;;  %6641 = vmatprep.subr.mxu0 %v9607_v44 }
0x125e   :  { %6649 = vmatmul.mubr.msk.f32.vlgmr.msra.gmra.mrb[14].mxu1 %vm520_vm14, %v5829_v16  ;;  %6642 = vmatpush3.msra.mxu0 %v8748_v1  ;;  %v6273_v1 = vsel %vm514_vm11, %v6263_v46, %v6272_v23 }
0x125f   :  { %v6276_v4 = vpop.permute.xlu1 %6275  ;;  %6643 = vmatprep.mubr.msk.f32.mxu0 %vm6978_vm3, %v9607_v44  ;;  %6651 = vmatprep.subr.mxu0 %v9607_v44  ;;  %v6274_v40 = vsel %vm516_vm12, %v6267_v48, %v6273_v1  ;;  %v6357_v9 = vpop.permute.xlu0 %6356 }
0x1260   :  { %6656 = vmatprep.subr.mxu1 %v9607_v44  ;;  %6658 = vmatprep.mubr.msk.f32.mxu1 %vm6978_vm3, %v9607_v44 }
0x1261   :  { %6644 = vmatmul.mubr.msk.f32.vlgmr.msra.gmra.mrb[14].mxu0 %vm520_vm14, %v5388_v14 }
0x1262   :  { %6652 = vmatpush3.msra.mxu0 %v6276_v4  ;;  %6653 = vmatprep.mubr.msk.f32.mxu0 %vm6978_vm3, %v9607_v44 }
0x1263   :  { %6708 = vmatprep.subr.bf16.mxu0 %v9608_v15 }
0x1265   :  { %6654 = vmatmul.mubr.msk.f32.vlgmr.msra.gmra.mrb[16].mxu0 %vm520_vm14, %v6274_v40 }
0x1266   :  { %6669 = vmatprep.mubr.msk.f32.mxu0 %vm6978_vm3, %v9607_v44  ;;  %6710 = vmatpush3.bf16.msra.mxu0 %v6709_v62  ;;  %vm6358_vm3 = vcmp.eq.s32.totalorder %v6357_v9, 1 }
0x1267   :  { %6711 = vmatprep.subr.bf16.mxu0 %v9608_v15 }
0x126a   :  { %6713 = vmatpush3.bf16.msra.mxu0 %v6712_v2 }
0x1330   :  { %v5314_v6 = vpop.f32.mrb[12].mxu0 }
0x1331   :  { %v5901_v51 = vpop.f32.mrb[14].mxu1  ;;  %v6640_v27 = vpop.f32.mrb[13].mxu0 }
0x1332   :  { %v6650_v19 = vpop.f32.mrb[15].mxu1 }
0x1334   :  { %v5457_v30 = vpop.f32.mrb[14].mxu0 }
0x1335   :  { %v5458_v0 = vadd.f32 %v5457_v30, %v5314_v6  ;;  %v6645_v38 = vpop.f32.mrb[15].mxu0 }
0x1337   :  { %v5905_v36 = vadd.f32 %v5901_v51, %v5458_v0 }
0x1338   :  { %v6346_v11 = vpop.f32.mrb[16].mxu0 }
0x1339   :  { %v6350_v10 = vadd.f32 %v6346_v11, %v5905_v36  ;;  %v6655_v7 = vpop.f32.mrb[17].mxu0 }
0x133b   :  { %v6351_v59 = vadd.f32 %v6951_v17, %v6350_v10 }
0x133d   :  { %6946 = vtanh.f32 %v6351_v59 }
0x1347   :  { %v6947_v3 = vpop.eup %6946 }
0x1348   :  { %v6359_v20 = vsel %vm6358_vm3, %v6947_v3, %v9609_v8 }
0x1349   :  { %6657 = vmatpush3.msra.mxu1 %v6359_v20 }
0x134a   :  { %6659 = vmatmul.mubr.msk.f32.vlgmr.msra.gmra.mrb[16].mxu1 %vm520_vm14, %v6360_v53 }
0x141d   :  { %v6430_v33 = vpop.f32.mrb[16].mxu1 }
0x141e   :  { %v6660_v32 = vpop.f32.mrb[17].mxu1  ;;  %6670 = vmatmul.mubr.msk.f32.vlgmr.msra.gmra.mrb[18].mxu0 %vm160_vm5, %v6430_v33 }
0x14f1   :  { %v6508_v13 = vpop.f32.mrb[18].mxu0 }
0x14f2   :  { %v6509_v22 = vadd.f32 %v6508_v13, %v6438_v37  ;;  %v6671_v58 = vpop.f32.mrb[19].mxu0 }
0x14f4   :  { %6513 = vst.msk [vmem:[#allocation2] sm:$0x1] %vm6512_vm6, %v6509_v22 }
0x14f5   :  { %6963 = shalt.err (!%p6960_p4)
}
0x14f6   :  { %s6964_s11 = scalar_lea.hbm %s9544_s12, 16 }
0x14f7   :  { %p6965_p5 = scmp.ne.s32.totalorder %s9544_s12, %s6964_s11  ;;  %p6968_p6 = scmp.lt.u32.totalorder %s6964_s11, %s9544_s12 }
0x14f9   :  { %p6970_p7 = pnand %p6968_p6, %p6965_p5 }
0x14fb   :  { %6973 = shalt.err (!%p6970_p7)
}
0x14fc   :  { %6523 = dma.vmem_to_hbm [thread:$0]  %s6521_s13, 16, %s9544_s12, [#allocation3]  }
0x14fd   :  { %6974 = dma.done.wait [#allocation3], 16  }
0x14fe   :  { %6975 = vsyncadd [#allocation3], 4294967280 }
0x14ff   :  { %6527 = vsyncpa [#allocation3], 1 }

</bundles_post_ra>
